<compile_context>
chip_gen: v5e
topology: v5e:2x2
jax: 0.10.0
libtpu: 0.0.40
codegen_flags: <defaults>
</compile_context>

<pallas_src>
import functools

import jax
import jax.numpy as jnp
from jax.experimental import pallas as pl
from jax.experimental.pallas import tpu as pltpu

EPS = 1e-5


# ----------------------------------------------------------------------------
# Fused (deconv o conv) weight construction (tiny, runs once in XLA glue)
# ----------------------------------------------------------------------------
def _build_fused_weights(deconv_w, deconv_b, conv_w):
    """Pre-contract ConvTranspose3d(k=2,s=2) and Conv3d(k=3) weights.

    Returns wf of shape (27*C1, 8*Cout), block-structured / zero-padded:
      K row    = q*C1 + ci     with q = (di*3 + rj)*3 + rk the distinct
                 (depth-slab, h-offset, w-offset) neighbor, ci == Cin being the
                 ones-channel row (carries the deconv bias + border zeroing),
      lane col = p*Cout + co   with p = (a*2 + b)*2 + c the output parity.
    Parity p only uses the 8 neighbors with di in {a,a+1}, rj in {b,b+1},
    rk in {c,c+1}; the remaining 19 K-blocks per parity are zero.
    """
    Cin, Cmid = deconv_w.shape[0], deconv_w.shape[1]
    Cout = conv_w.shape[0]
    C1 = Cin + 1

    # Augment deconv weight with a bias row: V[Cin, cm, *, *, *] = deconv_b[cm].
    V = jnp.concatenate(
        [deconv_w,
         jnp.broadcast_to(deconv_b.reshape(1, Cmid, 1, 1, 1), (1, Cmid, 2, 2, 2))],
        axis=0)  # (C1, Cmid, 2, 2, 2)

    def nbr(par, tap):
        # upsampled index 2*base + par + tap - 1 = 2*(base + e) + f
        e = (par + tap - 1) // 2
        f = (par + tap - 1) % 2
        return e - par + 1, f          # neighbor index in {0,1}, deconv tap

    w27 = jnp.zeros((27, C1, 8, Cout), jnp.float32)
    for a in range(2):
        for b in range(2):
            for c in range(2):
                p = (a * 2 + b) * 2 + c
                for td in range(3):
                    i, fd = nbr(a, td)
                    for th in range(3):
                        j, fh = nbr(b, th)
                        for tw in range(3):
                            k, fw = nbr(c, tw)
                            q = ((a + i) * 3 + (b + j)) * 3 + (c + k)
                            contrib = V[:, :, fd, fh, fw] @ conv_w[:, :, td, th, tw].T
                            w27 = w27.at[q, :, p, :].add(contrib)
    return w27.reshape(27 * C1, 8 * Cout)


# ----------------------------------------------------------------------------
# Pallas kernel 1: fused deconv+conv matmul with BN-stats epilogue
# ----------------------------------------------------------------------------
def _fused_conv_kernel(x_ref, wf_ref, bc_ref, mask_ref, z_ref, sum_ref, sq_ref,
                       *, TD, Wp2, R):
    # x_ref : (TD+2, P2+2, C1)  padded, ones-augmented, plane-flattened input tile
    # wf_ref: (27*C1, 8*Cout)   block-structured fused weight (VMEM resident)
    # bc_ref: (1, 8*Cout) f32   conv bias, tiled per parity
    # mask  : (R, 1) f32        1 for valid (w < W) rows, 0 for pad-column rows
    # z_ref : (TD, R, 8*Cout)   pre-BN output, stored in z dtype (bf16 default)
    wf = wf_ref[...]
    bc = bc_ref[...]
    mask = mask_ref[...]
    C8 = bc.shape[-1]

    s_acc = jnp.zeros((1, C8), jnp.float32)
    q_acc = jnp.zeros((1, C8), jnp.float32)

    for d in range(TD):  # static unroll over the depth tile
        # 27 distinct (depth-slab, row-offset) slices, extracted once, one
        # lane-concat, ONE matmul producing all 8 parities along lanes.
        cols = jnp.concatenate(
            [x_ref[d + di, pl.ds(rj * Wp2 + rk, R), :]
             for di in range(3) for rj in range(3) for rk in range(3)],
            axis=1)                                             # (R, 27*C1)
        zf = jnp.dot(cols, wf, preferred_element_type=jnp.float32) + bc
        # Stream result straight out (no parts list / big concat held live).
        z_ref[d] = zf.astype(z_ref.dtype)
        # BN statistics epilogue (pad-column junk rows masked out).
        zm = zf * mask
        s_acc = s_acc + jnp.sum(zm, axis=0, keepdims=True)
        q_acc = q_acc + jnp.sum(zm * zf, axis=0, keepdims=True)

    sum_ref[...] = s_acc
    sq_ref[...] = q_acc


def fused_deconv_conv(xt, wf, bc, mask, *, N, nDT, TD, P2, Wp2, R, C1, Cout,
                      z_dtype):
    C8 = 8 * Cout
    kernel = functools.partial(_fused_conv_kernel, TD=TD, Wp2=Wp2, R=R)
    return pl.pallas_call(
        kernel,
        out_shape=(
            jax.ShapeDtypeStruct((N, nDT, TD, R, C8), z_dtype),     # z (pre-BN)
            jax.ShapeDtypeStruct((N, nDT, 1, C8), jnp.float32),     # per-tile sum
            jax.ShapeDtypeStruct((N, nDT, 1, C8), jnp.float32),     # per-tile sum sq
        ),
        grid_spec=pltpu.PrefetchScalarGridSpec(
            num_scalar_prefetch=0,
            grid=(N, nDT),
            in_specs=[
                # one depth tile (TD slices + 2-slab halo) per step; each input
                # slab is fetched from HBM once (no triple-duplicated views)
                pl.BlockSpec((None, None, TD + 2, P2 + 2, C1),
                             lambda n, t: (n, t, 0, 0, 0)),
                # fused weights / bias / mask stay VMEM-resident
                pl.BlockSpec((27 * C1, C8), lambda n, t: (0, 0)),
                pl.BlockSpec((1, C8), lambda n, t: (0, 0)),
                pl.BlockSpec((R, 1), lambda n, t: (0, 0)),
            ],
            out_specs=(
                pl.BlockSpec((None, None, TD, R, C8),
                             lambda n, t: (n, t, 0, 0, 0)),
                pl.BlockSpec((None, None, 1, C8), lambda n, t: (n, t, 0, 0)),
                pl.BlockSpec((None, None, 1, C8), lambda n, t: (n, t, 0, 0)),
            ),
        ),
        compiler_params=pltpu.CompilerParams(
            dimension_semantics=("parallel", "parallel")),
    )(xt, wf, bc, mask)


# ----------------------------------------------------------------------------
# Pallas kernel 2: fused BN scale-shift + ReLU (lane-dense packed layout)
# ----------------------------------------------------------------------------
def _scale_shift_relu_kernel(z_ref, a_ref, b_ref, o_ref):
    z = z_ref[...].astype(jnp.float32)
    o_ref[...] = jnp.maximum(z * a_ref[...] + b_ref[...], 0.0).astype(o_ref.dtype)


def scale_shift_relu(z, scale_vec, shift_vec, *, out_dtype):
    N, nDT, TD, R, C8 = z.shape
    return pl.pallas_call(
        _scale_shift_relu_kernel,
        out_shape=jax.ShapeDtypeStruct((N, nDT, TD, R, C8), out_dtype),
        grid_spec=pltpu.PrefetchScalarGridSpec(
            num_scalar_prefetch=0,
            grid=(N, nDT),
            in_specs=[
                pl.BlockSpec((None, None, TD, R, C8),
                             lambda n, t: (n, t, 0, 0, 0)),
                pl.BlockSpec((1, C8), lambda n, t: (0, 0)),
                pl.BlockSpec((1, C8), lambda n, t: (0, 0)),
            ],
            out_specs=pl.BlockSpec((None, None, TD, R, C8),
                                   lambda n, t: (n, t, 0, 0, 0)),
        ),
        compiler_params=pltpu.CompilerParams(
            dimension_semantics=("parallel", "parallel")),
    )(z, scale_vec, shift_vec)


# ----------------------------------------------------------------------------
# DeConvBlock forward
# ----------------------------------------------------------------------------
def deconv_block_forward(x_ncdhw, params, *, compute_dtype=jnp.bfloat16,
                         z_dtype=jnp.bfloat16, out_dtype=jnp.float32,
                         depth_tile=None, return_packed=False):
    N, Cin, D, H, W = x_ncdhw.shape
    Cout = params["conv_w"].shape[0]
    C1 = Cin + 1
    Hp2, Wp2 = H + 2, W + 2
    P2 = Hp2 * Wp2            # rows of one padded (H+2, W+2) plane, flattened
    R = H * Wp2               # output rows per depth slice (incl. 2 junk cols/row)
    C8 = 8 * Cout
    TD = D if depth_tile is None else depth_tile
    if D % TD != 0:
        raise ValueError("depth_tile must divide D")
    nDT = D // TD

    # ---- cheap glue on the SMALL (pre-upsample) input ------------------------
    # channels-last, append ones channel (deconv bias + boundary zeroing),
    # zero-pad spatially by 1, cut depth tiles with a 2-slab halo
    # (nDT == 1, the default, has zero halo duplication), flatten planes.
    x = jnp.transpose(x_ncdhw, (0, 2, 3, 4, 1)).astype(jnp.float32)   # N,D,H,W,Cin
    xa = jnp.concatenate([x, jnp.ones((N, D, H, W, 1), jnp.float32)], axis=-1)
    xp = jnp.pad(xa, ((0, 0), (1, 1), (1, 1), (1, 1), (0, 0)))        # N,D+2,H+2,W+2,C1
    if nDT == 1:
        xt = xp[:, None]
    else:
        xt = jnp.stack([xp[:, t * TD:t * TD + TD + 2] for t in range(nDT)], axis=1)
    xt = xt.reshape(N, nDT, TD + 2, P2, C1)
    xt = jnp.pad(xt, ((0, 0), (0, 0), (0, 0), (0, 2), (0, 0)))        # 2 guard rows/plane
    xt = xt.astype(compute_dtype)

    wf = _build_fused_weights(params["deconv_w"], params["deconv_b"],
                              params["conv_w"]).astype(compute_dtype)  # (27*C1, 8*Cout)
    bc = jnp.tile(params["conv_b"].astype(jnp.float32), 8).reshape(1, C8)
    mask = (jnp.arange(R) % Wp2 < W).astype(jnp.float32).reshape(R, 1)

    # ---- pass 1: fused deconv+conv matmul + BN-stats epilogue ----------------
    z, psum, psq = fused_deconv_conv(xt, wf, bc, mask, N=N, nDT=nDT, TD=TD,
                                     P2=P2, Wp2=Wp2, R=R, C1=C1, Cout=Cout,
                                     z_dtype=z_dtype)

    # ---- finalize BN batch statistics (tiny, per-channel) --------------------
    cnt = float(N * D * H * W * 8)                       # = N * 2D * 2H * 2W
    s = jnp.sum(psum.reshape(-1, 8, Cout), axis=(0, 1))
    q = jnp.sum(psq.reshape(-1, 8, Cout), axis=(0, 1))
    mean = s / cnt
    var = jnp.maximum(q / cnt - mean * mean, 0.0)        # biased (training-mode) var
    inv = params["bn_gamma"] / jnp.sqrt(var + EPS)
    sh = params["bn_beta"] - mean * inv
    scale_vec = jnp.tile(inv, 8).reshape(1, C8)          # parity-major, channel-minor
    shift_vec = jnp.tile(sh, 8).reshape(1, C8)

    # ---- pass 2: fused normalize + ReLU (lane-dense packed tiles) ------------
    out = scale_shift_relu(z, scale_vec, shift_vec, out_dtype=out_dtype)

    if return_packed:
        # (N, nDT, TD, H*(W+2), 8*Cout) packed layout for a fused consumer.
        return out

    # ---- single boundary pass: drop pad columns, parity un-interleave, NCDHW -
    out = out.reshape(N, nDT, TD, H, Wp2, 2, 2, 2, Cout)[:, :, :, :, :W]
    out = jnp.transpose(out, (0, 8, 1, 2, 5, 3, 6, 4, 7))  # n,co,t,d,a,h,b,w,c
    return out.reshape(N, Cout, 2 * D, 2 * H, 2 * W)


# ----------------------------------------------------------------------------
# Pure-jnp reference (PyTorch semantics in f32) for correctness checking.
# ----------------------------------------------------------------------------
def deconv_block_reference(x_ncdhw, params):
    N, Cin, D, H, W = x_ncdhw.shape
    Cout = params["conv_w"].shape[0]
    x = jnp.transpose(x_ncdhw, (0, 2, 3, 4, 1)).astype(jnp.float32)
    Wd = jnp.transpose(params["deconv_w"], (0, 2, 3, 4, 1)).reshape(Cin, 8 * Cin)
    bd = jnp.tile(params["deconv_b"], 8)
    y = x.reshape(-1, Cin) @ Wd + bd
    y = y.reshape(N, D, H, W, 2, 2, 2, Cin)
    y = jnp.transpose(y, (0, 1, 4, 2, 5, 3, 6, 7)).reshape(N, 2 * D, 2 * H, 2 * W, Cin)
    D2, H2, W2 = 2 * D, 2 * H, 2 * W
    Wc = jnp.transpose(params["conv_w"], (2, 3, 4, 1, 0)).reshape(27 * Cin, Cout)
    yp = jnp.pad(y, ((0, 0), (1, 1), (1, 1), (1, 1), (0, 0)))
    patches = []
    for kd in range(3):
        for kh in range(3):
            for kw in range(3):
                patches.append(yp[:, kd:kd + D2, kh:kh + H2, kw:kw + W2, :])
    cols = jnp.stack(patches, axis=4).reshape(N * D2 * H2 * W2, 27 * Cin)
    z = cols @ Wc + params["conv_b"]
    mean = jnp.mean(z, axis=0)
    var = jnp.mean(z * z, axis=0) - mean * mean
    zn = (z - mean) / jnp.sqrt(var + EPS) * params["bn_gamma"] + params["bn_beta"]
    out = jnp.maximum(zn, 0.0).reshape(N, D2, H2, W2, Cout)
    return jnp.transpose(out, (0, 4, 1, 2, 3))


# ----------------------------------------------------------------------------
if __name__ == "__main__":
    key = jax.random.PRNGKey(0)
    k0, k1, k2, k3, k4, k5, k6 = jax.random.split(key, 7)

    N, Cin, Cout = 2, 4, 8
    D = H = W = 4  # small spatial size; deconv doubles it to 8

    x = jax.random.normal(k0, (N, Cin, D, H, W), dtype=jnp.float32)

    params = {
        # ConvTranspose3d weight: (in_channels, out_channels, 2, 2, 2)
        "deconv_w": 0.1 * jax.random.normal(k1, (Cin, Cin, 2, 2, 2), jnp.float32),
        "deconv_b": 0.1 * jax.random.normal(k2, (Cin,), jnp.float32),
        # Conv3d weight: (out_channels, in_channels, 3, 3, 3)
        "conv_w": 0.1 * jax.random.normal(k3, (Cout, Cin, 3, 3, 3), jnp.float32),
        "conv_b": 0.1 * jax.random.normal(k4, (Cout,), jnp.float32),
        # BatchNorm3d affine params
        "bn_gamma": 1.0 + 0.1 * jax.random.normal(k5, (Cout,), jnp.float32),
        "bn_beta": 0.1 * jax.random.normal(k6, (Cout,), jnp.float32),
    }

    fwd = jax.jit(deconv_block_forward,
                  static_argnames=("compute_dtype", "z_dtype", "out_dtype",
                                   "depth_tile", "return_packed"))

    ref = jax.block_until_ready(deconv_block_reference(x, params))

    # Exact path (f32 MXU operands, f32 intermediate) -- tight tolerance.
    out_f32 = jax.block_until_ready(
        fwd(x, params, compute_dtype=jnp.float32, z_dtype=jnp.float32))
    assert out_f32.shape == (N, Cout, 2 * D, 2 * H, 2 * W), out_f32.shape
    err_f32 = float(jnp.max(jnp.abs(out_f32 - ref)))
    assert jnp.allclose(out_f32, ref, atol=2e-4, rtol=2e-4), err_f32

    # Default performance path (bf16 MXU operands + bf16 intermediate z,
    # f32 accumulate and f32 BN/ReLU epilogue).
    out_perf = jax.block_until_ready(fwd(x, params))
    err_bf16 = float(jnp.max(jnp.abs(out_perf - ref)))
    assert jnp.allclose(out_perf, ref, atol=5e-2, rtol=5e-2), err_bf16

    print("KERNEL_OK")
</pallas_src>

<mosaic_0001>
module attributes {stable_mosaic.version = 11 : i64} {
  func.func @_fused_conv_kernel(%arg0: i32, %arg1: i32, %arg2: memref<1x1x6x38x5xf32, #tpu.memory_space<vmem>>, %arg3: memref<135x64xf32, #tpu.memory_space<vmem>>, %arg4: memref<1x64xf32, #tpu.memory_space<vmem>>, %arg5: memref<24x1xf32, #tpu.memory_space<vmem>>, %arg6: memref<1x1x4x24x64xf32, #tpu.memory_space<vmem>>, %arg7: memref<1x1x1x64xf32, #tpu.memory_space<vmem>>, %arg8: memref<1x1x1x64xf32, #tpu.memory_space<vmem>>) attributes {dimension_semantics = [#tpu.dimension_semantics<parallel>, #tpu.dimension_semantics<parallel>], iteration_bounds = array<i64: 2, 1>, scalar_prefetch = 0 : i64, scratch_operands = 0 : i64, tpu.core_type = #tpu.core_type<tc>, window_params = [{transform_indices = @transform_0, window_bounds = array<i64: 1, 1, 6, 38, 5>}, {pipeline_mode = #tpu.pipeline_mode<synchronous>, transform_indices = @transform_1, window_bounds = array<i64: 135, 64>}, {pipeline_mode = #tpu.pipeline_mode<synchronous>, transform_indices = @transform_2, window_bounds = array<i64: 1, 64>}, {pipeline_mode = #tpu.pipeline_mode<synchronous>, transform_indices = @transform_3, window_bounds = array<i64: 24, 1>}, {transform_indices = @transform_4, window_bounds = array<i64: 1, 1, 4, 24, 64>}, {transform_indices = @transform_5, window_bounds = array<i64: 1, 1, 1, 64>}, {transform_indices = @transform_6, window_bounds = array<i64: 1, 1, 1, 64>}]} {
    %c0 = arith.constant 0 : index
    %c0_0 = arith.constant 0 : index
    %0 = vector.load %arg3[%c0, %c0_0] : memref<135x64xf32, #tpu.memory_space<vmem>>, vector<135x64xf32>
    %c0_1 = arith.constant 0 : index
    %c0_2 = arith.constant 0 : index
    %1 = vector.load %arg4[%c0_1, %c0_2] : memref<1x64xf32, #tpu.memory_space<vmem>>, vector<1x64xf32>
    %c0_3 = arith.constant 0 : index
    %c0_4 = arith.constant 0 : index
    %2 = vector.load %arg5[%c0_3, %c0_4] : memref<24x1xf32, #tpu.memory_space<vmem>>, vector<24x1xf32>
    %cst = arith.constant 0.000000e+00 : f32
    %3 = vector.broadcast %cst : f32 to vector<1x64xf32>
    %cst_5 = arith.constant 0.000000e+00 : f32
    %4 = vector.broadcast %cst_5 : f32 to vector<1x64xf32>
    %c0_6 = arith.constant 0 : index
    %c0_7 = arith.constant 0 : index
    %c0_8 = arith.constant 0 : index
    %c0_9 = arith.constant 0 : index
    %c0_10 = arith.constant 0 : index
    %5 = vector.load %arg2[%c0_6, %c0_7, %c0_8, %c0_9, %c0_10] : memref<1x1x6x38x5xf32, #tpu.memory_space<vmem>>, vector<1x1x1x24x5xf32>
    %6 = vector.shape_cast %5 : vector<1x1x1x24x5xf32> to vector<24x5xf32>
    %c0_11 = arith.constant 0 : index
    %c0_12 = arith.constant 0 : index
    %c0_13 = arith.constant 0 : index
    %c1 = arith.constant 1 : index
    %c0_14 = arith.constant 0 : index
    %7 = vector.load %arg2[%c0_11, %c0_12, %c0_13, %c1, %c0_14] : memref<1x1x6x38x5xf32, #tpu.memory_space<vmem>>, vector<1x1x1x24x5xf32>
    %8 = vector.shape_cast %7 : vector<1x1x1x24x5xf32> to vector<24x5xf32>
    %c0_15 = arith.constant 0 : index
    %c0_16 = arith.constant 0 : index
    %c0_17 = arith.constant 0 : index
    %c2 = arith.constant 2 : index
    %c0_18 = arith.constant 0 : index
    %9 = vector.load %arg2[%c0_15, %c0_16, %c0_17, %c2, %c0_18] : memref<1x1x6x38x5xf32, #tpu.memory_space<vmem>>, vector<1x1x1x24x5xf32>
    %10 = vector.shape_cast %9 : vector<1x1x1x24x5xf32> to vector<24x5xf32>
    %c0_19 = arith.constant 0 : index
    %c0_20 = arith.constant 0 : index
    %c0_21 = arith.constant 0 : index
    %c6 = arith.constant 6 : index
    %c0_22 = arith.constant 0 : index
    %11 = vector.load %arg2[%c0_19, %c0_20, %c0_21, %c6, %c0_22] : memref<1x1x6x38x5xf32, #tpu.memory_space<vmem>>, vector<1x1x1x24x5xf32>
    %12 = vector.shape_cast %11 : vector<1x1x1x24x5xf32> to vector<24x5xf32>
    %c0_23 = arith.constant 0 : index
    %c0_24 = arith.constant 0 : index
    %c0_25 = arith.constant 0 : index
    %c7 = arith.constant 7 : index
    %c0_26 = arith.constant 0 : index
    %13 = vector.load %arg2[%c0_23, %c0_24, %c0_25, %c7, %c0_26] : memref<1x1x6x38x5xf32, #tpu.memory_space<vmem>>, vector<1x1x1x24x5xf32>
    %14 = vector.shape_cast %13 : vector<1x1x1x24x5xf32> to vector<24x5xf32>
    %c0_27 = arith.constant 0 : index
    %c0_28 = arith.constant 0 : index
    %c0_29 = arith.constant 0 : index
    %c8 = arith.constant 8 : index
    %c0_30 = arith.constant 0 : index
    %15 = vector.load %arg2[%c0_27, %c0_28, %c0_29, %c8, %c0_30] : memref<1x1x6x38x5xf32, #tpu.memory_space<vmem>>, vector<1x1x1x24x5xf32>
    %16 = vector.shape_cast %15 : vector<1x1x1x24x5xf32> to vector<24x5xf32>
    %c0_31 = arith.constant 0 : index
    %c0_32 = arith.constant 0 : index
    %c0_33 = arith.constant 0 : index
    %c12 = arith.constant 12 : index
    %c0_34 = arith.constant 0 : index
    %17 = vector.load %arg2[%c0_31, %c0_32, %c0_33, %c12, %c0_34] : memref<1x1x6x38x5xf32, #tpu.memory_space<vmem>>, vector<1x1x1x24x5xf32>
    %18 = vector.shape_cast %17 : vector<1x1x1x24x5xf32> to vector<24x5xf32>
    %c0_35 = arith.constant 0 : index
    %c0_36 = arith.constant 0 : index
    %c0_37 = arith.constant 0 : index
    %c13 = arith.constant 13 : index
    %c0_38 = arith.constant 0 : index
    %19 = vector.load %arg2[%c0_35, %c0_36, %c0_37, %c13, %c0_38] : memref<1x1x6x38x5xf32, #tpu.memory_space<vmem>>, vector<1x1x1x24x5xf32>
    %20 = vector.shape_cast %19 : vector<1x1x1x24x5xf32> to vector<24x5xf32>
    %c0_39 = arith.constant 0 : index
    %c0_40 = arith.constant 0 : index
    %c0_41 = arith.constant 0 : index
    %c14 = arith.constant 14 : index
    %c0_42 = arith.constant 0 : index
    %21 = vector.load %arg2[%c0_39, %c0_40, %c0_41, %c14, %c0_42] : memref<1x1x6x38x5xf32, #tpu.memory_space<vmem>>, vector<1x1x1x24x5xf32>
    %22 = vector.shape_cast %21 : vector<1x1x1x24x5xf32> to vector<24x5xf32>
    %c0_43 = arith.constant 0 : index
    %c0_44 = arith.constant 0 : index
    %c1_45 = arith.constant 1 : index
    %c0_46 = arith.constant 0 : index
    %c0_47 = arith.constant 0 : index
    %23 = vector.load %arg2[%c0_43, %c0_44, %c1_45, %c0_46, %c0_47] : memref<1x1x6x38x5xf32, #tpu.memory_space<vmem>>, vector<1x1x1x24x5xf32>
    %24 = vector.shape_cast %23 : vector<1x1x1x24x5xf32> to vector<24x5xf32>
    %c0_48 = arith.constant 0 : index
    %c0_49 = arith.constant 0 : index
    %c1_50 = arith.constant 1 : index
    %c1_51 = arith.constant 1 : index
    %c0_52 = arith.constant 0 : index
    %25 = vector.load %arg2[%c0_48, %c0_49, %c1_50, %c1_51, %c0_52] : memref<1x1x6x38x5xf32, #tpu.memory_space<vmem>>, vector<1x1x1x24x5xf32>
    %26 = vector.shape_cast %25 : vector<1x1x1x24x5xf32> to vector<24x5xf32>
    %c0_53 = arith.constant 0 : index
    %c0_54 = arith.constant 0 : index
    %c1_55 = arith.constant 1 : index
    %c2_56 = arith.constant 2 : index
    %c0_57 = arith.constant 0 : index
    %27 = vector.load %arg2[%c0_53, %c0_54, %c1_55, %c2_56, %c0_57] : memref<1x1x6x38x5xf32, #tpu.memory_space<vmem>>, vector<1x1x1x24x5xf32>
    %28 = vector.shape_cast %27 : vector<1x1x1x24x5xf32> to vector<24x5xf32>
    %c0_58 = arith.constant 0 : index
    %c0_59 = arith.constant 0 : index
    %c1_60 = arith.constant 1 : index
    %c6_61 = arith.constant 6 : index
    %c0_62 = arith.constant 0 : index
    %29 = vector.load %arg2[%c0_58, %c0_59, %c1_60, %c6_61, %c0_62] : memref<1x1x6x38x5xf32, #tpu.memory_space<vmem>>, vector<1x1x1x24x5xf32>
    %30 = vector.shape_cast %29 : vector<1x1x1x24x5xf32> to vector<24x5xf32>
    %c0_63 = arith.constant 0 : index
    %c0_64 = arith.constant 0 : index
    %c1_65 = arith.constant 1 : index
    %c7_66 = arith.constant 7 : index
    %c0_67 = arith.constant 0 : index
    %31 = vector.load %arg2[%c0_63, %c0_64, %c1_65, %c7_66, %c0_67] : memref<1x1x6x38x5xf32, #tpu.memory_space<vmem>>, vector<1x1x1x24x5xf32>
    %32 = vector.shape_cast %31 : vector<1x1x1x24x5xf32> to vector<24x5xf32>
    %c0_68 = arith.constant 0 : index
    %c0_69 = arith.constant 0 : index
    %c1_70 = arith.constant 1 : index
    %c8_71 = arith.constant 8 : index
    %c0_72 = arith.constant 0 : index
    %33 = vector.load %arg2[%c0_68, %c0_69, %c1_70, %c8_71, %c0_72] : memref<1x1x6x38x5xf32, #tpu.memory_space<vmem>>, vector<1x1x1x24x5xf32>
    %34 = vector.shape_cast %33 : vector<1x1x1x24x5xf32> to vector<24x5xf32>
    %c0_73 = arith.constant 0 : index
    %c0_74 = arith.constant 0 : index
    %c1_75 = arith.constant 1 : index
    %c12_76 = arith.constant 12 : index
    %c0_77 = arith.constant 0 : index
    %35 = vector.load %arg2[%c0_73, %c0_74, %c1_75, %c12_76, %c0_77] : memref<1x1x6x38x5xf32, #tpu.memory_space<vmem>>, vector<1x1x1x24x5xf32>
    %36 = vector.shape_cast %35 : vector<1x1x1x24x5xf32> to vector<24x5xf32>
    %c0_78 = arith.constant 0 : index
    %c0_79 = arith.constant 0 : index
    %c1_80 = arith.constant 1 : index
    %c13_81 = arith.constant 13 : index
    %c0_82 = arith.constant 0 : index
    %37 = vector.load %arg2[%c0_78, %c0_79, %c1_80, %c13_81, %c0_82] : memref<1x1x6x38x5xf32, #tpu.memory_space<vmem>>, vector<1x1x1x24x5xf32>
    %38 = vector.shape_cast %37 : vector<1x1x1x24x5xf32> to vector<24x5xf32>
    %c0_83 = arith.constant 0 : index
    %c0_84 = arith.constant 0 : index
    %c1_85 = arith.constant 1 : index
    %c14_86 = arith.constant 14 : index
    %c0_87 = arith.constant 0 : index
    %39 = vector.load %arg2[%c0_83, %c0_84, %c1_85, %c14_86, %c0_87] : memref<1x1x6x38x5xf32, #tpu.memory_space<vmem>>, vector<1x1x1x24x5xf32>
    %40 = vector.shape_cast %39 : vector<1x1x1x24x5xf32> to vector<24x5xf32>
    %c0_88 = arith.constant 0 : index
    %c0_89 = arith.constant 0 : index
    %c2_90 = arith.constant 2 : index
    %c0_91 = arith.constant 0 : index
    %c0_92 = arith.constant 0 : index
    %41 = vector.load %arg2[%c0_88, %c0_89, %c2_90, %c0_91, %c0_92] : memref<1x1x6x38x5xf32, #tpu.memory_space<vmem>>, vector<1x1x1x24x5xf32>
    %42 = vector.shape_cast %41 : vector<1x1x1x24x5xf32> to vector<24x5xf32>
    %c0_93 = arith.constant 0 : index
    %c0_94 = arith.constant 0 : index
    %c2_95 = arith.constant 2 : index
    %c1_96 = arith.constant 1 : index
    %c0_97 = arith.constant 0 : index
    %43 = vector.load %arg2[%c0_93, %c0_94, %c2_95, %c1_96, %c0_97] : memref<1x1x6x38x5xf32, #tpu.memory_space<vmem>>, vector<1x1x1x24x5xf32>
    %44 = vector.shape_cast %43 : vector<1x1x1x24x5xf32> to vector<24x5xf32>
    %c0_98 = arith.constant 0 : index
    %c0_99 = arith.constant 0 : index
    %c2_100 = arith.constant 2 : index
    %c2_101 = arith.constant 2 : index
    %c0_102 = arith.constant 0 : index
    %45 = vector.load %arg2[%c0_98, %c0_99, %c2_100, %c2_101, %c0_102] : memref<1x1x6x38x5xf32, #tpu.memory_space<vmem>>, vector<1x1x1x24x5xf32>
    %46 = vector.shape_cast %45 : vector<1x1x1x24x5xf32> to vector<24x5xf32>
    %c0_103 = arith.constant 0 : index
    %c0_104 = arith.constant 0 : index
    %c2_105 = arith.constant 2 : index
    %c6_106 = arith.constant 6 : index
    %c0_107 = arith.constant 0 : index
    %47 = vector.load %arg2[%c0_103, %c0_104, %c2_105, %c6_106, %c0_107] : memref<1x1x6x38x5xf32, #tpu.memory_space<vmem>>, vector<1x1x1x24x5xf32>
    %48 = vector.shape_cast %47 : vector<1x1x1x24x5xf32> to vector<24x5xf32>
    %c0_108 = arith.constant 0 : index
    %c0_109 = arith.constant 0 : index
    %c2_110 = arith.constant 2 : index
    %c7_111 = arith.constant 7 : index
    %c0_112 = arith.constant 0 : index
    %49 = vector.load %arg2[%c0_108, %c0_109, %c2_110, %c7_111, %c0_112] : memref<1x1x6x38x5xf32, #tpu.memory_space<vmem>>, vector<1x1x1x24x5xf32>
    %50 = vector.shape_cast %49 : vector<1x1x1x24x5xf32> to vector<24x5xf32>
    %c0_113 = arith.constant 0 : index
    %c0_114 = arith.constant 0 : index
    %c2_115 = arith.constant 2 : index
    %c8_116 = arith.constant 8 : index
    %c0_117 = arith.constant 0 : index
    %51 = vector.load %arg2[%c0_113, %c0_114, %c2_115, %c8_116, %c0_117] : memref<1x1x6x38x5xf32, #tpu.memory_space<vmem>>, vector<1x1x1x24x5xf32>
    %52 = vector.shape_cast %51 : vector<1x1x1x24x5xf32> to vector<24x5xf32>
    %c0_118 = arith.constant 0 : index
    %c0_119 = arith.constant 0 : index
    %c2_120 = arith.constant 2 : index
    %c12_121 = arith.constant 12 : index
    %c0_122 = arith.constant 0 : index
    %53 = vector.load %arg2[%c0_118, %c0_119, %c2_120, %c12_121, %c0_122] : memref<1x1x6x38x5xf32, #tpu.memory_space<vmem>>, vector<1x1x1x24x5xf32>
    %54 = vector.shape_cast %53 : vector<1x1x1x24x5xf32> to vector<24x5xf32>
    %c0_123 = arith.constant 0 : index
    %c0_124 = arith.constant 0 : index
    %c2_125 = arith.constant 2 : index
    %c13_126 = arith.constant 13 : index
    %c0_127 = arith.constant 0 : index
    %55 = vector.load %arg2[%c0_123, %c0_124, %c2_125, %c13_126, %c0_127] : memref<1x1x6x38x5xf32, #tpu.memory_space<vmem>>, vector<1x1x1x24x5xf32>
    %56 = vector.shape_cast %55 : vector<1x1x1x24x5xf32> to vector<24x5xf32>
    %c0_128 = arith.constant 0 : index
    %c0_129 = arith.constant 0 : index
    %c2_130 = arith.constant 2 : index
    %c14_131 = arith.constant 14 : index
    %c0_132 = arith.constant 0 : index
    %57 = vector.load %arg2[%c0_128, %c0_129, %c2_130, %c14_131, %c0_132] : memref<1x1x6x38x5xf32, #tpu.memory_space<vmem>>, vector<1x1x1x24x5xf32>
    %58 = vector.shape_cast %57 : vector<1x1x1x24x5xf32> to vector<24x5xf32>
    %59 = tpu.concatenate %6, %8, %10, %12, %14, %16, %18, %20, %22, %24, %26, %28, %30, %32, %34, %36 in 1 : vector<24x5xf32>, vector<24x5xf32>, vector<24x5xf32>, vector<24x5xf32>, vector<24x5xf32>, vector<24x5xf32>, vector<24x5xf32>, vector<24x5xf32>, vector<24x5xf32>, vector<24x5xf32>, vector<24x5xf32>, vector<24x5xf32>, vector<24x5xf32>, vector<24x5xf32>, vector<24x5xf32>, vector<24x5xf32> -> vector<24x80xf32>
    %60 = tpu.concatenate %38, %40, %42, %44, %46, %48, %50, %52, %54, %56, %58 in 1 : vector<24x5xf32>, vector<24x5xf32>, vector<24x5xf32>, vector<24x5xf32>, vector<24x5xf32>, vector<24x5xf32>, vector<24x5xf32>, vector<24x5xf32>, vector<24x5xf32>, vector<24x5xf32>, vector<24x5xf32> -> vector<24x55xf32>
    %61 = tpu.concatenate %59, %60 in 1 : vector<24x80xf32>, vector<24x55xf32> -> vector<24x135xf32>
    %cst_133 = arith.constant dense<0.000000e+00> : vector<24x64xf32>
    %62 = tpu.matmul %61, %0, %cst_133 {dimension_numbers = #tpu.dot_dimension_numbers<[1], [0], [0], [1], [0, 0, 1, 1], [], []>} : vector<24x135xf32>, vector<135x64xf32>, vector<24x64xf32> -> vector<24x64xf32>
    %63 = vector.broadcast %1 : vector<1x64xf32> to vector<24x64xf32>
    %64 = arith.addf %62, %63 : vector<24x64xf32>
    %c0_134 = arith.constant 0 : index
    %c0_135 = arith.constant 0 : index
    %c0_136 = arith.constant 0 : index
    %c0_137 = arith.constant 0 : index
    %c0_138 = arith.constant 0 : index
    %65 = vector.load %arg6[%c0_134, %c0_135, %c0_136, %c0_137, %c0_138] : memref<1x1x4x24x64xf32, #tpu.memory_space<vmem>>, vector<1x1x1x24x64xf32>
    %66 = vector.shape_cast %65 : vector<1x1x1x24x64xf32> to vector<24x64xf32>
    %67 = vector.shape_cast %64 : vector<24x64xf32> to vector<1x1x1x24x64xf32>
    tpu.vector_store %arg6[%c0_134, %c0_135, %c0_136, %c0_137, %c0_138], %67 {strides = array<i32>} : memref<1x1x4x24x64xf32, #tpu.memory_space<vmem>>, vector<1x1x1x24x64xf32>,
    %68 = vector.broadcast %2 : vector<24x1xf32> to vector<24x64xf32>
    %69 = arith.mulf %64, %68 : vector<24x64xf32>
    %cst_139 = arith.constant dense<0.000000e+00> : vector<64xf32>
    %70 = vector.multi_reduction <add>, %69, %cst_139 [0] : vector<24x64xf32> to vector<64xf32>
    %71 = vector.shape_cast %70 : vector<64xf32> to vector<1x64xf32>
    %72 = arith.addf %3, %71 : vector<1x64xf32>
    %73 = arith.mulf %69, %64 : vector<24x64xf32>
    %cst_140 = arith.constant dense<0.000000e+00> : vector<64xf32>
    %74 = vector.multi_reduction <add>, %73, %cst_140 [0] : vector<24x64xf32> to vector<64xf32>
    %75 = vector.shape_cast %74 : vector<64xf32> to vector<1x64xf32>
    %76 = arith.addf %4, %75 : vector<1x64xf32>
    %c0_141 = arith.constant 0 : index
    %c0_142 = arith.constant 0 : index
    %c1_143 = arith.constant 1 : index
    %c0_144 = arith.constant 0 : index
    %c0_145 = arith.constant 0 : index
    %77 = vector.load %arg2[%c0_141, %c0_142, %c1_143, %c0_144, %c0_145] : memref<1x1x6x38x5xf32, #tpu.memory_space<vmem>>, vector<1x1x1x24x5xf32>
    %78 = vector.shape_cast %77 : vector<1x1x1x24x5xf32> to vector<24x5xf32>
    %c0_146 = arith.constant 0 : index
    %c0_147 = arith.constant 0 : index
    %c1_148 = arith.constant 1 : index
    %c1_149 = arith.constant 1 : index
    %c0_150 = arith.constant 0 : index
    %79 = vector.load %arg2[%c0_146, %c0_147, %c1_148, %c1_149, %c0_150] : memref<1x1x6x38x5xf32, #tpu.memory_space<vmem>>, vector<1x1x1x24x5xf32>
    %80 = vector.shape_cast %79 : vector<1x1x1x24x5xf32> to vector<24x5xf32>
    %c0_151 = arith.constant 0 : index
    %c0_152 = arith.constant 0 : index
    %c1_153 = arith.constant 1 : index
    %c2_154 = arith.constant 2 : index
    %c0_155 = arith.constant 0 : index
    %81 = vector.load %arg2[%c0_151, %c0_152, %c1_153, %c2_154, %c0_155] : memref<1x1x6x38x5xf32, #tpu.memory_space<vmem>>, vector<1x1x1x24x5xf32>
    %82 = vector.shape_cast %81 : vector<1x1x1x24x5xf32> to vector<24x5xf32>
    %c0_156 = arith.constant 0 : index
    %c0_157 = arith.constant 0 : index
    %c1_158 = arith.constant 1 : index
    %c6_159 = arith.constant 6 : index
    %c0_160 = arith.constant 0 : index
    %83 = vector.load %arg2[%c0_156, %c0_157, %c1_158, %c6_159, %c0_160] : memref<1x1x6x38x5xf32, #tpu.memory_space<vmem>>, vector<1x1x1x24x5xf32>
    %84 = vector.shape_cast %83 : vector<1x1x1x24x5xf32> to vector<24x5xf32>
    %c0_161 = arith.constant 0 : index
    %c0_162 = arith.constant 0 : index
    %c1_163 = arith.constant 1 : index
    %c7_164 = arith.constant 7 : index
    %c0_165 = arith.constant 0 : index
    %85 = vector.load %arg2[%c0_161, %c0_162, %c1_163, %c7_164, %c0_165] : memref<1x1x6x38x5xf32, #tpu.memory_space<vmem>>, vector<1x1x1x24x5xf32>
    %86 = vector.shape_cast %85 : vector<1x1x1x24x5xf32> to vector<24x5xf32>
    %c0_166 = arith.constant 0 : index
    %c0_167 = arith.constant 0 : index
    %c1_168 = arith.constant 1 : index
    %c8_169 = arith.constant 8 : index
    %c0_170 = arith.constant 0 : index
    %87 = vector.load %arg2[%c0_166, %c0_167, %c1_168, %c8_169, %c0_170] : memref<1x1x6x38x5xf32, #tpu.memory_space<vmem>>, vector<1x1x1x24x5xf32>
    %88 = vector.shape_cast %87 : vector<1x1x1x24x5xf32> to vector<24x5xf32>
    %c0_171 = arith.constant 0 : index
    %c0_172 = arith.constant 0 : index
    %c1_173 = arith.constant 1 : index
    %c12_174 = arith.constant 12 : index
    %c0_175 = arith.constant 0 : index
    %89 = vector.load %arg2[%c0_171, %c0_172, %c1_173, %c12_174, %c0_175] : memref<1x1x6x38x5xf32, #tpu.memory_space<vmem>>, vector<1x1x1x24x5xf32>
    %90 = vector.shape_cast %89 : vector<1x1x1x24x5xf32> to vector<24x5xf32>
    %c0_176 = arith.constant 0 : index
    %c0_177 = arith.constant 0 : index
    %c1_178 = arith.constant 1 : index
    %c13_179 = arith.constant 13 : index
    %c0_180 = arith.constant 0 : index
    %91 = vector.load %arg2[%c0_176, %c0_177, %c1_178, %c13_179, %c0_180] : memref<1x1x6x38x5xf32, #tpu.memory_space<vmem>>, vector<1x1x1x24x5xf32>
    %92 = vector.shape_cast %91 : vector<1x1x1x24x5xf32> to vector<24x5xf32>
    %c0_181 = arith.constant 0 : index
    %c0_182 = arith.constant 0 : index
    %c1_183 = arith.constant 1 : index
    %c14_184 = arith.constant 14 : index
    %c0_185 = arith.constant 0 : index
    %93 = vector.load %arg2[%c0_181, %c0_182, %c1_183, %c14_184, %c0_185] : memref<1x1x6x38x5xf32, #tpu.memory_space<vmem>>, vector<1x1x1x24x5xf32>
    %94 = vector.shape_cast %93 : vector<1x1x1x24x5xf32> to vector<24x5xf32>
    %c0_186 = arith.constant 0 : index
    %c0_187 = arith.constant 0 : index
    %c2_188 = arith.constant 2 : index
    %c0_189 = arith.constant 0 : index
    %c0_190 = arith.constant 0 : index
    %95 = vector.load %arg2[%c0_186, %c0_187, %c2_188, %c0_189, %c0_190] : memref<1x1x6x38x5xf32, #tpu.memory_space<vmem>>, vector<1x1x1x24x5xf32>
    %96 = vector.shape_cast %95 : vector<1x1x1x24x5xf32> to vector<24x5xf32>
    %c0_191 = arith.constant 0 : index
    %c0_192 = arith.constant 0 : index
    %c2_193 = arith.constant 2 : index
    %c1_194 = arith.constant 1 : index
    %c0_195 = arith.constant 0 : index
    %97 = vector.load %arg2[%c0_191, %c0_192, %c2_193, %c1_194, %c0_195] : memref<1x1x6x38x5xf32, #tpu.memory_space<vmem>>, vector<1x1x1x24x5xf32>
    %98 = vector.shape_cast %97 : vector<1x1x1x24x5xf32> to vector<24x5xf32>
    %c0_196 = arith.constant 0 : index
    %c0_197 = arith.constant 0 : index
    %c2_198 = arith.constant 2 : index
    %c2_199 = arith.constant 2 : index
    %c0_200 = arith.constant 0 : index
    %99 = vector.load %arg2[%c0_196, %c0_197, %c2_198, %c2_199, %c0_200] : memref<1x1x6x38x5xf32, #tpu.memory_space<vmem>>, vector<1x1x1x24x5xf32>
    %100 = vector.shape_cast %99 : vector<1x1x1x24x5xf32> to vector<24x5xf32>
    %c0_201 = arith.constant 0 : index
    %c0_202 = arith.constant 0 : index
    %c2_203 = arith.constant 2 : index
    %c6_204 = arith.constant 6 : index
    %c0_205 = arith.constant 0 : index
    %101 = vector.load %arg2[%c0_201, %c0_202, %c2_203, %c6_204, %c0_205] : memref<1x1x6x38x5xf32, #tpu.memory_space<vmem>>, vector<1x1x1x24x5xf32>
    %102 = vector.shape_cast %101 : vector<1x1x1x24x5xf32> to vector<24x5xf32>
    %c0_206 = arith.constant 0 : index
    %c0_207 = arith.constant 0 : index
    %c2_208 = arith.constant 2 : index
    %c7_209 = arith.constant 7 : index
    %c0_210 = arith.constant 0 : index
    %103 = vector.load %arg2[%c0_206, %c0_207, %c2_208, %c7_209, %c0_210] : memref<1x1x6x38x5xf32, #tpu.memory_space<vmem>>, vector<1x1x1x24x5xf32>
    %104 = vector.shape_cast %103 : vector<1x1x1x24x5xf32> to vector<24x5xf32>
    %c0_211 = arith.constant 0 : index
    %c0_212 = arith.constant 0 : index
    %c2_213 = arith.constant 2 : index
    %c8_214 = arith.constant 8 : index
    %c0_215 = arith.constant 0 : index
    %105 = vector.load %arg2[%c0_211, %c0_212, %c2_213, %c8_214, %c0_215] : memref<1x1x6x38x5xf32, #tpu.memory_space<vmem>>, vector<1x1x1x24x5xf32>
    %106 = vector.shape_cast %105 : vector<1x1x1x24x5xf32> to vector<24x5xf32>
    %c0_216 = arith.constant 0 : index
    %c0_217 = arith.constant 0 : index
    %c2_218 = arith.constant 2 : index
    %c12_219 = arith.constant 12 : index
    %c0_220 = arith.constant 0 : index
    %107 = vector.load %arg2[%c0_216, %c0_217, %c2_218, %c12_219, %c0_220] : memref<1x1x6x38x5xf32, #tpu.memory_space<vmem>>, vector<1x1x1x24x5xf32>
    %108 = vector.shape_cast %107 : vector<1x1x1x24x5xf32> to vector<24x5xf32>
    %c0_221 = arith.constant 0 : index
    %c0_222 = arith.constant 0 : index
    %c2_223 = arith.constant 2 : index
    %c13_224 = arith.constant 13 : index
    %c0_225 = arith.constant 0 : index
    %109 = vector.load %arg2[%c0_221, %c0_222, %c2_223, %c13_224, %c0_225] : memref<1x1x6x38x5xf32, #tpu.memory_space<vmem>>, vector<1x1x1x24x5xf32>
    %110 = vector.shape_cast %109 : vector<1x1x1x24x5xf32> to vector<24x5xf32>
    %c0_226 = arith.constant 0 : index
    %c0_227 = arith.constant 0 : index
    %c2_228 = arith.constant 2 : index
    %c14_229 = arith.constant 14 : index
    %c0_230 = arith.constant 0 : index
    %111 = vector.load %arg2[%c0_226, %c0_227, %c2_228, %c14_229, %c0_230] : memref<1x1x6x38x5xf32, #tpu.memory_space<vmem>>, vector<1x1x1x24x5xf32>
    %112 = vector.shape_cast %111 : vector<1x1x1x24x5xf32> to vector<24x5xf32>
    %c0_231 = arith.constant 0 : index
    %c0_232 = arith.constant 0 : index
    %c3 = arith.constant 3 : index
    %c0_233 = arith.constant 0 : index
    %c0_234 = arith.constant 0 : index
    %113 = vector.load %arg2[%c0_231, %c0_232, %c3, %c0_233, %c0_234] : memref<1x1x6x38x5xf32, #tpu.memory_space<vmem>>, vector<1x1x1x24x5xf32>
    %114 = vector.shape_cast %113 : vector<1x1x1x24x5xf32> to vector<24x5xf32>
    %c0_235 = arith.constant 0 : index
    %c0_236 = arith.constant 0 : index
    %c3_237 = arith.constant 3 : index
    %c1_238 = arith.constant 1 : index
    %c0_239 = arith.constant 0 : index
    %115 = vector.load %arg2[%c0_235, %c0_236, %c3_237, %c1_238, %c0_239] : memref<1x1x6x38x5xf32, #tpu.memory_space<vmem>>, vector<1x1x1x24x5xf32>
    %116 = vector.shape_cast %115 : vector<1x1x1x24x5xf32> to vector<24x5xf32>
    %c0_240 = arith.constant 0 : index
    %c0_241 = arith.constant 0 : index
    %c3_242 = arith.constant 3 : index
    %c2_243 = arith.constant 2 : index
    %c0_244 = arith.constant 0 : index
    %117 = vector.load %arg2[%c0_240, %c0_241, %c3_242, %c2_243, %c0_244] : memref<1x1x6x38x5xf32, #tpu.memory_space<vmem>>, vector<1x1x1x24x5xf32>
    %118 = vector.shape_cast %117 : vector<1x1x1x24x5xf32> to vector<24x5xf32>
    %c0_245 = arith.constant 0 : index
    %c0_246 = arith.constant 0 : index
    %c3_247 = arith.constant 3 : index
    %c6_248 = arith.constant 6 : index
    %c0_249 = arith.constant 0 : index
    %119 = vector.load %arg2[%c0_245, %c0_246, %c3_247, %c6_248, %c0_249] : memref<1x1x6x38x5xf32, #tpu.memory_space<vmem>>, vector<1x1x1x24x5xf32>
    %120 = vector.shape_cast %119 : vector<1x1x1x24x5xf32> to vector<24x5xf32>
    %c0_250 = arith.constant 0 : index
    %c0_251 = arith.constant 0 : index
    %c3_252 = arith.constant 3 : index
    %c7_253 = arith.constant 7 : index
    %c0_254 = arith.constant 0 : index
    %121 = vector.load %arg2[%c0_250, %c0_251, %c3_252, %c7_253, %c0_254] : memref<1x1x6x38x5xf32, #tpu.memory_space<vmem>>, vector<1x1x1x24x5xf32>
    %122 = vector.shape_cast %121 : vector<1x1x1x24x5xf32> to vector<24x5xf32>
    %c0_255 = arith.constant 0 : index
    %c0_256 = arith.constant 0 : index
    %c3_257 = arith.constant 3 : index
    %c8_258 = arith.constant 8 : index
    %c0_259 = arith.constant 0 : index
    %123 = vector.load %arg2[%c0_255, %c0_256, %c3_257, %c8_258, %c0_259] : memref<1x1x6x38x5xf32, #tpu.memory_space<vmem>>, vector<1x1x1x24x5xf32>
    %124 = vector.shape_cast %123 : vector<1x1x1x24x5xf32> to vector<24x5xf32>
    %c0_260 = arith.constant 0 : index
    %c0_261 = arith.constant 0 : index
    %c3_262 = arith.constant 3 : index
    %c12_263 = arith.constant 12 : index
    %c0_264 = arith.constant 0 : index
    %125 = vector.load %arg2[%c0_260, %c0_261, %c3_262, %c12_263, %c0_264] : memref<1x1x6x38x5xf32, #tpu.memory_space<vmem>>, vector<1x1x1x24x5xf32>
    %126 = vector.shape_cast %125 : vector<1x1x1x24x5xf32> to vector<24x5xf32>
    %c0_265 = arith.constant 0 : index
    %c0_266 = arith.constant 0 : index
    %c3_267 = arith.constant 3 : index
    %c13_268 = arith.constant 13 : index
    %c0_269 = arith.constant 0 : index
    %127 = vector.load %arg2[%c0_265, %c0_266, %c3_267, %c13_268, %c0_269] : memref<1x1x6x38x5xf32, #tpu.memory_space<vmem>>, vector<1x1x1x24x5xf32>
    %128 = vector.shape_cast %127 : vector<1x1x1x24x5xf32> to vector<24x5xf32>
    %c0_270 = arith.constant 0 : index
    %c0_271 = arith.constant 0 : index
    %c3_272 = arith.constant 3 : index
    %c14_273 = arith.constant 14 : index
    %c0_274 = arith.constant 0 : index
    %129 = vector.load %arg2[%c0_270, %c0_271, %c3_272, %c14_273, %c0_274] : memref<1x1x6x38x5xf32, #tpu.memory_space<vmem>>, vector<1x1x1x24x5xf32>
    %130 = vector.shape_cast %129 : vector<1x1x1x24x5xf32> to vector<24x5xf32>
    %131 = tpu.concatenate %78, %80, %82, %84, %86, %88, %90, %92, %94, %96, %98, %100, %102, %104, %106, %108 in 1 : vector<24x5xf32>, vector<24x5xf32>, vector<24x5xf32>, vector<24x5xf32>, vector<24x5xf32>, vector<24x5xf32>, vector<24x5xf32>, vector<24x5xf32>, vector<24x5xf32>, vector<24x5xf32>, vector<24x5xf32>, vector<24x5xf32>, vector<24x5xf32>, vector<24x5xf32>, vector<24x5xf32>, vector<24x5xf32> -> vector<24x80xf32>
    %132 = tpu.concatenate %110, %112, %114, %116, %118, %120, %122, %124, %126, %128, %130 in 1 : vector<24x5xf32>, vector<24x5xf32>, vector<24x5xf32>, vector<24x5xf32>, vector<24x5xf32>, vector<24x5xf32>, vector<24x5xf32>, vector<24x5xf32>, vector<24x5xf32>, vector<24x5xf32>, vector<24x5xf32> -> vector<24x55xf32>
    %133 = tpu.concatenate %131, %132 in 1 : vector<24x80xf32>, vector<24x55xf32> -> vector<24x135xf32>
    %cst_275 = arith.constant dense<0.000000e+00> : vector<24x64xf32>
    %134 = tpu.matmul %133, %0, %cst_275 {dimension_numbers = #tpu.dot_dimension_numbers<[1], [0], [0], [1], [0, 0, 1, 1], [], []>} : vector<24x135xf32>, vector<135x64xf32>, vector<24x64xf32> -> vector<24x64xf32>
    %135 = vector.broadcast %1 : vector<1x64xf32> to vector<24x64xf32>
    %136 = arith.addf %134, %135 : vector<24x64xf32>
    %c0_276 = arith.constant 0 : index
    %c0_277 = arith.constant 0 : index
    %c1_278 = arith.constant 1 : index
    %c0_279 = arith.constant 0 : index
    %c0_280 = arith.constant 0 : index
    %137 = vector.load %arg6[%c0_276, %c0_277, %c1_278, %c0_279, %c0_280] : memref<1x1x4x24x64xf32, #tpu.memory_space<vmem>>, vector<1x1x1x24x64xf32>
    %138 = vector.shape_cast %137 : vector<1x1x1x24x64xf32> to vector<24x64xf32>
    %139 = vector.shape_cast %136 : vector<24x64xf32> to vector<1x1x1x24x64xf32>
    tpu.vector_store %arg6[%c0_276, %c0_277, %c1_278, %c0_279, %c0_280], %139 {strides = array<i32>} : memref<1x1x4x24x64xf32, #tpu.memory_space<vmem>>, vector<1x1x1x24x64xf32>,
    %140 = vector.broadcast %2 : vector<24x1xf32> to vector<24x64xf32>
    %141 = arith.mulf %136, %140 : vector<24x64xf32>
    %cst_281 = arith.constant dense<0.000000e+00> : vector<64xf32>
    %142 = vector.multi_reduction <add>, %141, %cst_281 [0] : vector<24x64xf32> to vector<64xf32>
    %143 = vector.shape_cast %142 : vector<64xf32> to vector<1x64xf32>
    %144 = arith.addf %72, %143 : vector<1x64xf32>
    %145 = arith.mulf %141, %136 : vector<24x64xf32>
    %cst_282 = arith.constant dense<0.000000e+00> : vector<64xf32>
    %146 = vector.multi_reduction <add>, %145, %cst_282 [0] : vector<24x64xf32> to vector<64xf32>
    %147 = vector.shape_cast %146 : vector<64xf32> to vector<1x64xf32>
    %148 = arith.addf %76, %147 : vector<1x64xf32>
    %c0_283 = arith.constant 0 : index
    %c0_284 = arith.constant 0 : index
    %c2_285 = arith.constant 2 : index
    %c0_286 = arith.constant 0 : index
    %c0_287 = arith.constant 0 : index
    %149 = vector.load %arg2[%c0_283, %c0_284, %c2_285, %c0_286, %c0_287] : memref<1x1x6x38x5xf32, #tpu.memory_space<vmem>>, vector<1x1x1x24x5xf32>
    %150 = vector.shape_cast %149 : vector<1x1x1x24x5xf32> to vector<24x5xf32>
    %c0_288 = arith.constant 0 : index
    %c0_289 = arith.constant 0 : index
    %c2_290 = arith.constant 2 : index
    %c1_291 = arith.constant 1 : index
    %c0_292 = arith.constant 0 : index
    %151 = vector.load %arg2[%c0_288, %c0_289, %c2_290, %c1_291, %c0_292] : memref<1x1x6x38x5xf32, #tpu.memory_space<vmem>>, vector<1x1x1x24x5xf32>
    %152 = vector.shape_cast %151 : vector<1x1x1x24x5xf32> to vector<24x5xf32>
    %c0_293 = arith.constant 0 : index
    %c0_294 = arith.constant 0 : index
    %c2_295 = arith.constant 2 : index
    %c2_296 = arith.constant 2 : index
    %c0_297 = arith.constant 0 : index
    %153 = vector.load %arg2[%c0_293, %c0_294, %c2_295, %c2_296, %c0_297] : memref<1x1x6x38x5xf32, #tpu.memory_space<vmem>>, vector<1x1x1x24x5xf32>
    %154 = vector.shape_cast %153 : vector<1x1x1x24x5xf32> to vector<24x5xf32>
    %c0_298 = arith.constant 0 : index
    %c0_299 = arith.constant 0 : index
    %c2_300 = arith.constant 2 : index
    %c6_301 = arith.constant 6 : index
    %c0_302 = arith.constant 0 : index
    %155 = vector.load %arg2[%c0_298, %c0_299, %c2_300, %c6_301, %c0_302] : memref<1x1x6x38x5xf32, #tpu.memory_space<vmem>>, vector<1x1x1x24x5xf32>
    %156 = vector.shape_cast %155 : vector<1x1x1x24x5xf32> to vector<24x5xf32>
    %c0_303 = arith.constant 0 : index
    %c0_304 = arith.constant 0 : index
    %c2_305 = arith.constant 2 : index
    %c7_306 = arith.constant 7 : index
    %c0_307 = arith.constant 0 : index
    %157 = vector.load %arg2[%c0_303, %c0_304, %c2_305, %c7_306, %c0_307] : memref<1x1x6x38x5xf32, #tpu.memory_space<vmem>>, vector<1x1x1x24x5xf32>
    %158 = vector.shape_cast %157 : vector<1x1x1x24x5xf32> to vector<24x5xf32>
    %c0_308 = arith.constant 0 : index
    %c0_309 = arith.constant 0 : index
    %c2_310 = arith.constant 2 : index
    %c8_311 = arith.constant 8 : index
    %c0_312 = arith.constant 0 : index
    %159 = vector.load %arg2[%c0_308, %c0_309, %c2_310, %c8_311, %c0_312] : memref<1x1x6x38x5xf32, #tpu.memory_space<vmem>>, vector<1x1x1x24x5xf32>
    %160 = vector.shape_cast %159 : vector<1x1x1x24x5xf32> to vector<24x5xf32>
    %c0_313 = arith.constant 0 : index
    %c0_314 = arith.constant 0 : index
    %c2_315 = arith.constant 2 : index
    %c12_316 = arith.constant 12 : index
    %c0_317 = arith.constant 0 : index
    %161 = vector.load %arg2[%c0_313, %c0_314, %c2_315, %c12_316, %c0_317] : memref<1x1x6x38x5xf32, #tpu.memory_space<vmem>>, vector<1x1x1x24x5xf32>
    %162 = vector.shape_cast %161 : vector<1x1x1x24x5xf32> to vector<24x5xf32>
    %c0_318 = arith.constant 0 : index
    %c0_319 = arith.constant 0 : index
    %c2_320 = arith.constant 2 : index
    %c13_321 = arith.constant 13 : index
    %c0_322 = arith.constant 0 : index
    %163 = vector.load %arg2[%c0_318, %c0_319, %c2_320, %c13_321, %c0_322] : memref<1x1x6x38x5xf32, #tpu.memory_space<vmem>>, vector<1x1x1x24x5xf32>
    %164 = vector.shape_cast %163 : vector<1x1x1x24x5xf32> to vector<24x5xf32>
    %c0_323 = arith.constant 0 : index
    %c0_324 = arith.constant 0 : index
    %c2_325 = arith.constant 2 : index
    %c14_326 = arith.constant 14 : index
    %c0_327 = arith.constant 0 : index
    %165 = vector.load %arg2[%c0_323, %c0_324, %c2_325, %c14_326, %c0_327] : memref<1x1x6x38x5xf32, #tpu.memory_space<vmem>>, vector<1x1x1x24x5xf32>
    %166 = vector.shape_cast %165 : vector<1x1x1x24x5xf32> to vector<24x5xf32>
    %c0_328 = arith.constant 0 : index
    %c0_329 = arith.constant 0 : index
    %c3_330 = arith.constant 3 : index
    %c0_331 = arith.constant 0 : index
    %c0_332 = arith.constant 0 : index
    %167 = vector.load %arg2[%c0_328, %c0_329, %c3_330, %c0_331, %c0_332] : memref<1x1x6x38x5xf32, #tpu.memory_space<vmem>>, vector<1x1x1x24x5xf32>
    %168 = vector.shape_cast %167 : vector<1x1x1x24x5xf32> to vector<24x5xf32>
    %c0_333 = arith.constant 0 : index
    %c0_334 = arith.constant 0 : index
    %c3_335 = arith.constant 3 : index
    %c1_336 = arith.constant 1 : index
    %c0_337 = arith.constant 0 : index
    %169 = vector.load %arg2[%c0_333, %c0_334, %c3_335, %c1_336, %c0_337] : memref<1x1x6x38x5xf32, #tpu.memory_space<vmem>>, vector<1x1x1x24x5xf32>
    %170 = vector.shape_cast %169 : vector<1x1x1x24x5xf32> to vector<24x5xf32>
    %c0_338 = arith.constant 0 : index
    %c0_339 = arith.constant 0 : index
    %c3_340 = arith.constant 3 : index
    %c2_341 = arith.constant 2 : index
    %c0_342 = arith.constant 0 : index
    %171 = vector.load %arg2[%c0_338, %c0_339, %c3_340, %c2_341, %c0_342] : memref<1x1x6x38x5xf32, #tpu.memory_space<vmem>>, vector<1x1x1x24x5xf32>
    %172 = vector.shape_cast %171 : vector<1x1x1x24x5xf32> to vector<24x5xf32>
    %c0_343 = arith.constant 0 : index
    %c0_344 = arith.constant 0 : index
    %c3_345 = arith.constant 3 : index
    %c6_346 = arith.constant 6 : index
    %c0_347 = arith.constant 0 : index
    %173 = vector.load %arg2[%c0_343, %c0_344, %c3_345, %c6_346, %c0_347] : memref<1x1x6x38x5xf32, #tpu.memory_space<vmem>>, vector<1x1x1x24x5xf32>
    %174 = vector.shape_cast %173 : vector<1x1x1x24x5xf32> to vector<24x5xf32>
    %c0_348 = arith.constant 0 : index
    %c0_349 = arith.constant 0 : index
    %c3_350 = arith.constant 3 : index
    %c7_351 = arith.constant 7 : index
    %c0_352 = arith.constant 0 : index
    %175 = vector.load %arg2[%c0_348, %c0_349, %c3_350, %c7_351, %c0_352] : memref<1x1x6x38x5xf32, #tpu.memory_space<vmem>>, vector<1x1x1x24x5xf32>
    %176 = vector.shape_cast %175 : vector<1x1x1x24x5xf32> to vector<24x5xf32>
    %c0_353 = arith.constant 0 : index
    %c0_354 = arith.constant 0 : index
    %c3_355 = arith.constant 3 : index
    %c8_356 = arith.constant 8 : index
    %c0_357 = arith.constant 0 : index
    %177 = vector.load %arg2[%c0_353, %c0_354, %c3_355, %c8_356, %c0_357] : memref<1x1x6x38x5xf32, #tpu.memory_space<vmem>>, vector<1x1x1x24x5xf32>
    %178 = vector.shape_cast %177 : vector<1x1x1x24x5xf32> to vector<24x5xf32>
    %c0_358 = arith.constant 0 : index
    %c0_359 = arith.constant 0 : index
    %c3_360 = arith.constant 3 : index
    %c12_361 = arith.constant 12 : index
    %c0_362 = arith.constant 0 : index
    %179 = vector.load %arg2[%c0_358, %c0_359, %c3_360, %c12_361, %c0_362] : memref<1x1x6x38x5xf32, #tpu.memory_space<vmem>>, vector<1x1x1x24x5xf32>
    %180 = vector.shape_cast %179 : vector<1x1x1x24x5xf32> to vector<24x5xf32>
    %c0_363 = arith.constant 0 : index
    %c0_364 = arith.constant 0 : index
    %c3_365 = arith.constant 3 : index
    %c13_366 = arith.constant 13 : index
    %c0_367 = arith.constant 0 : index
    %181 = vector.load %arg2[%c0_363, %c0_364, %c3_365, %c13_366, %c0_367] : memref<1x1x6x38x5xf32, #tpu.memory_space<vmem>>, vector<1x1x1x24x5xf32>
    %182 = vector.shape_cast %181 : vector<1x1x1x24x5xf32> to vector<24x5xf32>
    %c0_368 = arith.constant 0 : index
    %c0_369 = arith.constant 0 : index
    %c3_370 = arith.constant 3 : index
    %c14_371 = arith.constant 14 : index
    %c0_372 = arith.constant 0 : index
    %183 = vector.load %arg2[%c0_368, %c0_369, %c3_370, %c14_371, %c0_372] : memref<1x1x6x38x5xf32, #tpu.memory_space<vmem>>, vector<1x1x1x24x5xf32>
    %184 = vector.shape_cast %183 : vector<1x1x1x24x5xf32> to vector<24x5xf32>
    %c0_373 = arith.constant 0 : index
    %c0_374 = arith.constant 0 : index
    %c4 = arith.constant 4 : index
    %c0_375 = arith.constant 0 : index
    %c0_376 = arith.constant 0 : index
    %185 = vector.load %arg2[%c0_373, %c0_374, %c4, %c0_375, %c0_376] : memref<1x1x6x38x5xf32, #tpu.memory_space<vmem>>, vector<1x1x1x24x5xf32>
    %186 = vector.shape_cast %185 : vector<1x1x1x24x5xf32> to vector<24x5xf32>
    %c0_377 = arith.constant 0 : index
    %c0_378 = arith.constant 0 : index
    %c4_379 = arith.constant 4 : index
    %c1_380 = arith.constant 1 : index
    %c0_381 = arith.constant 0 : index
    %187 = vector.load %arg2[%c0_377, %c0_378, %c4_379, %c1_380, %c0_381] : memref<1x1x6x38x5xf32, #tpu.memory_space<vmem>>, vector<1x1x1x24x5xf32>
    %188 = vector.shape_cast %187 : vector<1x1x1x24x5xf32> to vector<24x5xf32>
    %c0_382 = arith.constant 0 : index
    %c0_383 = arith.constant 0 : index
    %c4_384 = arith.constant 4 : index
    %c2_385 = arith.constant 2 : index
    %c0_386 = arith.constant 0 : index
    %189 = vector.load %arg2[%c0_382, %c0_383, %c4_384, %c2_385, %c0_386] : memref<1x1x6x38x5xf32, #tpu.memory_space<vmem>>, vector<1x1x1x24x5xf32>
    %190 = vector.shape_cast %189 : vector<1x1x1x24x5xf32> to vector<24x5xf32>
    %c0_387 = arith.constant 0 : index
    %c0_388 = arith.constant 0 : index
    %c4_389 = arith.constant 4 : index
    %c6_390 = arith.constant 6 : index
    %c0_391 = arith.constant 0 : index
    %191 = vector.load %arg2[%c0_387, %c0_388, %c4_389, %c6_390, %c0_391] : memref<1x1x6x38x5xf32, #tpu.memory_space<vmem>>, vector<1x1x1x24x5xf32>
    %192 = vector.shape_cast %191 : vector<1x1x1x24x5xf32> to vector<24x5xf32>
    %c0_392 = arith.constant 0 : index
    %c0_393 = arith.constant 0 : index
    %c4_394 = arith.constant 4 : index
    %c7_395 = arith.constant 7 : index
    %c0_396 = arith.constant 0 : index
    %193 = vector.load %arg2[%c0_392, %c0_393, %c4_394, %c7_395, %c0_396] : memref<1x1x6x38x5xf32, #tpu.memory_space<vmem>>, vector<1x1x1x24x5xf32>
    %194 = vector.shape_cast %193 : vector<1x1x1x24x5xf32> to vector<24x5xf32>
    %c0_397 = arith.constant 0 : index
    %c0_398 = arith.constant 0 : index
    %c4_399 = arith.constant 4 : index
    %c8_400 = arith.constant 8 : index
    %c0_401 = arith.constant 0 : index
    %195 = vector.load %arg2[%c0_397, %c0_398, %c4_399, %c8_400, %c0_401] : memref<1x1x6x38x5xf32, #tpu.memory_space<vmem>>, vector<1x1x1x24x5xf32>
    %196 = vector.shape_cast %195 : vector<1x1x1x24x5xf32> to vector<24x5xf32>
    %c0_402 = arith.constant 0 : index
    %c0_403 = arith.constant 0 : index
    %c4_404 = arith.constant 4 : index
    %c12_405 = arith.constant 12 : index
    %c0_406 = arith.constant 0 : index
    %197 = vector.load %arg2[%c0_402, %c0_403, %c4_404, %c12_405, %c0_406] : memref<1x1x6x38x5xf32, #tpu.memory_space<vmem>>, vector<1x1x1x24x5xf32>
    %198 = vector.shape_cast %197 : vector<1x1x1x24x5xf32> to vector<24x5xf32>
    %c0_407 = arith.constant 0 : index
    %c0_408 = arith.constant 0 : index
    %c4_409 = arith.constant 4 : index
    %c13_410 = arith.constant 13 : index
    %c0_411 = arith.constant 0 : index
    %199 = vector.load %arg2[%c0_407, %c0_408, %c4_409, %c13_410, %c0_411] : memref<1x1x6x38x5xf32, #tpu.memory_space<vmem>>, vector<1x1x1x24x5xf32>
    %200 = vector.shape_cast %199 : vector<1x1x1x24x5xf32> to vector<24x5xf32>
    %c0_412 = arith.constant 0 : index
    %c0_413 = arith.constant 0 : index
    %c4_414 = arith.constant 4 : index
    %c14_415 = arith.constant 14 : index
    %c0_416 = arith.constant 0 : index
    %201 = vector.load %arg2[%c0_412, %c0_413, %c4_414, %c14_415, %c0_416] : memref<1x1x6x38x5xf32, #tpu.memory_space<vmem>>, vector<1x1x1x24x5xf32>
    %202 = vector.shape_cast %201 : vector<1x1x1x24x5xf32> to vector<24x5xf32>
    %203 = tpu.concatenate %150, %152, %154, %156, %158, %160, %162, %164, %166, %168, %170, %172, %174, %176, %178, %180 in 1 : vector<24x5xf32>, vector<24x5xf32>, vector<24x5xf32>, vector<24x5xf32>, vector<24x5xf32>, vector<24x5xf32>, vector<24x5xf32>, vector<24x5xf32>, vector<24x5xf32>, vector<24x5xf32>, vector<24x5xf32>, vector<24x5xf32>, vector<24x5xf32>, vector<24x5xf32>, vector<24x5xf32>, vector<24x5xf32> -> vector<24x80xf32>
    %204 = tpu.concatenate %182, %184, %186, %188, %190, %192, %194, %196, %198, %200, %202 in 1 : vector<24x5xf32>, vector<24x5xf32>, vector<24x5xf32>, vector<24x5xf32>, vector<24x5xf32>, vector<24x5xf32>, vector<24x5xf32>, vector<24x5xf32>, vector<24x5xf32>, vector<24x5xf32>, vector<24x5xf32> -> vector<24x55xf32>
    %205 = tpu.concatenate %203, %204 in 1 : vector<24x80xf32>, vector<24x55xf32> -> vector<24x135xf32>
    %cst_417 = arith.constant dense<0.000000e+00> : vector<24x64xf32>
    %206 = tpu.matmul %205, %0, %cst_417 {dimension_numbers = #tpu.dot_dimension_numbers<[1], [0], [0], [1], [0, 0, 1, 1], [], []>} : vector<24x135xf32>, vector<135x64xf32>, vector<24x64xf32> -> vector<24x64xf32>
    %207 = vector.broadcast %1 : vector<1x64xf32> to vector<24x64xf32>
    %208 = arith.addf %206, %207 : vector<24x64xf32>
    %c0_418 = arith.constant 0 : index
    %c0_419 = arith.constant 0 : index
    %c2_420 = arith.constant 2 : index
    %c0_421 = arith.constant 0 : index
    %c0_422 = arith.constant 0 : index
    %209 = vector.load %arg6[%c0_418, %c0_419, %c2_420, %c0_421, %c0_422] : memref<1x1x4x24x64xf32, #tpu.memory_space<vmem>>, vector<1x1x1x24x64xf32>
    %210 = vector.shape_cast %209 : vector<1x1x1x24x64xf32> to vector<24x64xf32>
    %211 = vector.shape_cast %208 : vector<24x64xf32> to vector<1x1x1x24x64xf32>
    tpu.vector_store %arg6[%c0_418, %c0_419, %c2_420, %c0_421, %c0_422], %211 {strides = array<i32>} : memref<1x1x4x24x64xf32, #tpu.memory_space<vmem>>, vector<1x1x1x24x64xf32>,
    %212 = vector.broadcast %2 : vector<24x1xf32> to vector<24x64xf32>
    %213 = arith.mulf %208, %212 : vector<24x64xf32>
    %cst_423 = arith.constant dense<0.000000e+00> : vector<64xf32>
    %214 = vector.multi_reduction <add>, %213, %cst_423 [0] : vector<24x64xf32> to vector<64xf32>
    %215 = vector.shape_cast %214 : vector<64xf32> to vector<1x64xf32>
    %216 = arith.addf %144, %215 : vector<1x64xf32>
    %217 = arith.mulf %213, %208 : vector<24x64xf32>
    %cst_424 = arith.constant dense<0.000000e+00> : vector<64xf32>
    %218 = vector.multi_reduction <add>, %217, %cst_424 [0] : vector<24x64xf32> to vector<64xf32>
    %219 = vector.shape_cast %218 : vector<64xf32> to vector<1x64xf32>
    %220 = arith.addf %148, %219 : vector<1x64xf32>
    %c0_425 = arith.constant 0 : index
    %c0_426 = arith.constant 0 : index
    %c3_427 = arith.constant 3 : index
    %c0_428 = arith.constant 0 : index
    %c0_429 = arith.constant 0 : index
    %221 = vector.load %arg2[%c0_425, %c0_426, %c3_427, %c0_428, %c0_429] : memref<1x1x6x38x5xf32, #tpu.memory_space<vmem>>, vector<1x1x1x24x5xf32>
    %222 = vector.shape_cast %221 : vector<1x1x1x24x5xf32> to vector<24x5xf32>
    %c0_430 = arith.constant 0 : index
    %c0_431 = arith.constant 0 : index
    %c3_432 = arith.constant 3 : index
    %c1_433 = arith.constant 1 : index
    %c0_434 = arith.constant 0 : index
    %223 = vector.load %arg2[%c0_430, %c0_431, %c3_432, %c1_433, %c0_434] : memref<1x1x6x38x5xf32, #tpu.memory_space<vmem>>, vector<1x1x1x24x5xf32>
    %224 = vector.shape_cast %223 : vector<1x1x1x24x5xf32> to vector<24x5xf32>
    %c0_435 = arith.constant 0 : index
    %c0_436 = arith.constant 0 : index
    %c3_437 = arith.constant 3 : index
    %c2_438 = arith.constant 2 : index
    %c0_439 = arith.constant 0 : index
    %225 = vector.load %arg2[%c0_435, %c0_436, %c3_437, %c2_438, %c0_439] : memref<1x1x6x38x5xf32, #tpu.memory_space<vmem>>, vector<1x1x1x24x5xf32>
    %226 = vector.shape_cast %225 : vector<1x1x1x24x5xf32> to vector<24x5xf32>
    %c0_440 = arith.constant 0 : index
    %c0_441 = arith.constant 0 : index
    %c3_442 = arith.constant 3 : index
    %c6_443 = arith.constant 6 : index
    %c0_444 = arith.constant 0 : index
    %227 = vector.load %arg2[%c0_440, %c0_441, %c3_442, %c6_443, %c0_444] : memref<1x1x6x38x5xf32, #tpu.memory_space<vmem>>, vector<1x1x1x24x5xf32>
    %228 = vector.shape_cast %227 : vector<1x1x1x24x5xf32> to vector<24x5xf32>
    %c0_445 = arith.constant 0 : index
    %c0_446 = arith.constant 0 : index
    %c3_447 = arith.constant 3 : index
    %c7_448 = arith.constant 7 : index
    %c0_449 = arith.constant 0 : index
    %229 = vector.load %arg2[%c0_445, %c0_446, %c3_447, %c7_448, %c0_449] : memref<1x1x6x38x5xf32, #tpu.memory_space<vmem>>, vector<1x1x1x24x5xf32>
    %230 = vector.shape_cast %229 : vector<1x1x1x24x5xf32> to vector<24x5xf32>
    %c0_450 = arith.constant 0 : index
    %c0_451 = arith.constant 0 : index
    %c3_452 = arith.constant 3 : index
    %c8_453 = arith.constant 8 : index
    %c0_454 = arith.constant 0 : index
    %231 = vector.load %arg2[%c0_450, %c0_451, %c3_452, %c8_453, %c0_454] : memref<1x1x6x38x5xf32, #tpu.memory_space<vmem>>, vector<1x1x1x24x5xf32>
    %232 = vector.shape_cast %231 : vector<1x1x1x24x5xf32> to vector<24x5xf32>
    %c0_455 = arith.constant 0 : index
    %c0_456 = arith.constant 0 : index
    %c3_457 = arith.constant 3 : index
    %c12_458 = arith.constant 12 : index
    %c0_459 = arith.constant 0 : index
    %233 = vector.load %arg2[%c0_455, %c0_456, %c3_457, %c12_458, %c0_459] : memref<1x1x6x38x5xf32, #tpu.memory_space<vmem>>, vector<1x1x1x24x5xf32>
    %234 = vector.shape_cast %233 : vector<1x1x1x24x5xf32> to vector<24x5xf32>
    %c0_460 = arith.constant 0 : index
    %c0_461 = arith.constant 0 : index
    %c3_462 = arith.constant 3 : index
    %c13_463 = arith.constant 13 : index
    %c0_464 = arith.constant 0 : index
    %235 = vector.load %arg2[%c0_460, %c0_461, %c3_462, %c13_463, %c0_464] : memref<1x1x6x38x5xf32, #tpu.memory_space<vmem>>, vector<1x1x1x24x5xf32>
    %236 = vector.shape_cast %235 : vector<1x1x1x24x5xf32> to vector<24x5xf32>
    %c0_465 = arith.constant 0 : index
    %c0_466 = arith.constant 0 : index
    %c3_467 = arith.constant 3 : index
    %c14_468 = arith.constant 14 : index
    %c0_469 = arith.constant 0 : index
    %237 = vector.load %arg2[%c0_465, %c0_466, %c3_467, %c14_468, %c0_469] : memref<1x1x6x38x5xf32, #tpu.memory_space<vmem>>, vector<1x1x1x24x5xf32>
    %238 = vector.shape_cast %237 : vector<1x1x1x24x5xf32> to vector<24x5xf32>
    %c0_470 = arith.constant 0 : index
    %c0_471 = arith.constant 0 : index
    %c4_472 = arith.constant 4 : index
    %c0_473 = arith.constant 0 : index
    %c0_474 = arith.constant 0 : index
    %239 = vector.load %arg2[%c0_470, %c0_471, %c4_472, %c0_473, %c0_474] : memref<1x1x6x38x5xf32, #tpu.memory_space<vmem>>, vector<1x1x1x24x5xf32>
    %240 = vector.shape_cast %239 : vector<1x1x1x24x5xf32> to vector<24x5xf32>
    %c0_475 = arith.constant 0 : index
    %c0_476 = arith.constant 0 : index
    %c4_477 = arith.constant 4 : index
    %c1_478 = arith.constant 1 : index
    %c0_479 = arith.constant 0 : index
    %241 = vector.load %arg2[%c0_475, %c0_476, %c4_477, %c1_478, %c0_479] : memref<1x1x6x38x5xf32, #tpu.memory_space<vmem>>, vector<1x1x1x24x5xf32>
    %242 = vector.shape_cast %241 : vector<1x1x1x24x5xf32> to vector<24x5xf32>
    %c0_480 = arith.constant 0 : index
    %c0_481 = arith.constant 0 : index
    %c4_482 = arith.constant 4 : index
    %c2_483 = arith.constant 2 : index
    %c0_484 = arith.constant 0 : index
    %243 = vector.load %arg2[%c0_480, %c0_481, %c4_482, %c2_483, %c0_484] : memref<1x1x6x38x5xf32, #tpu.memory_space<vmem>>, vector<1x1x1x24x5xf32>
    %244 = vector.shape_cast %243 : vector<1x1x1x24x5xf32> to vector<24x5xf32>
    %c0_485 = arith.constant 0 : index
    %c0_486 = arith.constant 0 : index
    %c4_487 = arith.constant 4 : index
    %c6_488 = arith.constant 6 : index
    %c0_489 = arith.constant 0 : index
    %245 = vector.load %arg2[%c0_485, %c0_486, %c4_487, %c6_488, %c0_489] : memref<1x1x6x38x5xf32, #tpu.memory_space<vmem>>, vector<1x1x1x24x5xf32>
    %246 = vector.shape_cast %245 : vector<1x1x1x24x5xf32> to vector<24x5xf32>
    %c0_490 = arith.constant 0 : index
    %c0_491 = arith.constant 0 : index
    %c4_492 = arith.constant 4 : index
    %c7_493 = arith.constant 7 : index
    %c0_494 = arith.constant 0 : index
    %247 = vector.load %arg2[%c0_490, %c0_491, %c4_492, %c7_493, %c0_494] : memref<1x1x6x38x5xf32, #tpu.memory_space<vmem>>, vector<1x1x1x24x5xf32>
    %248 = vector.shape_cast %247 : vector<1x1x1x24x5xf32> to vector<24x5xf32>
    %c0_495 = arith.constant 0 : index
    %c0_496 = arith.constant 0 : index
    %c4_497 = arith.constant 4 : index
    %c8_498 = arith.constant 8 : index
    %c0_499 = arith.constant 0 : index
    %249 = vector.load %arg2[%c0_495, %c0_496, %c4_497, %c8_498, %c0_499] : memref<1x1x6x38x5xf32, #tpu.memory_space<vmem>>, vector<1x1x1x24x5xf32>
    %250 = vector.shape_cast %249 : vector<1x1x1x24x5xf32> to vector<24x5xf32>
    %c0_500 = arith.constant 0 : index
    %c0_501 = arith.constant 0 : index
    %c4_502 = arith.constant 4 : index
    %c12_503 = arith.constant 12 : index
    %c0_504 = arith.constant 0 : index
    %251 = vector.load %arg2[%c0_500, %c0_501, %c4_502, %c12_503, %c0_504] : memref<1x1x6x38x5xf32, #tpu.memory_space<vmem>>, vector<1x1x1x24x5xf32>
    %252 = vector.shape_cast %251 : vector<1x1x1x24x5xf32> to vector<24x5xf32>
    %c0_505 = arith.constant 0 : index
    %c0_506 = arith.constant 0 : index
    %c4_507 = arith.constant 4 : index
    %c13_508 = arith.constant 13 : index
    %c0_509 = arith.constant 0 : index
    %253 = vector.load %arg2[%c0_505, %c0_506, %c4_507, %c13_508, %c0_509] : memref<1x1x6x38x5xf32, #tpu.memory_space<vmem>>, vector<1x1x1x24x5xf32>
    %254 = vector.shape_cast %253 : vector<1x1x1x24x5xf32> to vector<24x5xf32>
    %c0_510 = arith.constant 0 : index
    %c0_511 = arith.constant 0 : index
    %c4_512 = arith.constant 4 : index
    %c14_513 = arith.constant 14 : index
    %c0_514 = arith.constant 0 : index
    %255 = vector.load %arg2[%c0_510, %c0_511, %c4_512, %c14_513, %c0_514] : memref<1x1x6x38x5xf32, #tpu.memory_space<vmem>>, vector<1x1x1x24x5xf32>
    %256 = vector.shape_cast %255 : vector<1x1x1x24x5xf32> to vector<24x5xf32>
    %c0_515 = arith.constant 0 : index
    %c0_516 = arith.constant 0 : index
    %c5 = arith.constant 5 : index
    %c0_517 = arith.constant 0 : index
    %c0_518 = arith.constant 0 : index
    %257 = vector.load %arg2[%c0_515, %c0_516, %c5, %c0_517, %c0_518] : memref<1x1x6x38x5xf32, #tpu.memory_space<vmem>>, vector<1x1x1x24x5xf32>
    %258 = vector.shape_cast %257 : vector<1x1x1x24x5xf32> to vector<24x5xf32>
    %c0_519 = arith.constant 0 : index
    %c0_520 = arith.constant 0 : index
    %c5_521 = arith.constant 5 : index
    %c1_522 = arith.constant 1 : index
    %c0_523 = arith.constant 0 : index
    %259 = vector.load %arg2[%c0_519, %c0_520, %c5_521, %c1_522, %c0_523] : memref<1x1x6x38x5xf32, #tpu.memory_space<vmem>>, vector<1x1x1x24x5xf32>
    %260 = vector.shape_cast %259 : vector<1x1x1x24x5xf32> to vector<24x5xf32>
    %c0_524 = arith.constant 0 : index
    %c0_525 = arith.constant 0 : index
    %c5_526 = arith.constant 5 : index
    %c2_527 = arith.constant 2 : index
    %c0_528 = arith.constant 0 : index
    %261 = vector.load %arg2[%c0_524, %c0_525, %c5_526, %c2_527, %c0_528] : memref<1x1x6x38x5xf32, #tpu.memory_space<vmem>>, vector<1x1x1x24x5xf32>
    %262 = vector.shape_cast %261 : vector<1x1x1x24x5xf32> to vector<24x5xf32>
    %c0_529 = arith.constant 0 : index
    %c0_530 = arith.constant 0 : index
    %c5_531 = arith.constant 5 : index
    %c6_532 = arith.constant 6 : index
    %c0_533 = arith.constant 0 : index
    %263 = vector.load %arg2[%c0_529, %c0_530, %c5_531, %c6_532, %c0_533] : memref<1x1x6x38x5xf32, #tpu.memory_space<vmem>>, vector<1x1x1x24x5xf32>
    %264 = vector.shape_cast %263 : vector<1x1x1x24x5xf32> to vector<24x5xf32>
    %c0_534 = arith.constant 0 : index
    %c0_535 = arith.constant 0 : index
    %c5_536 = arith.constant 5 : index
    %c7_537 = arith.constant 7 : index
    %c0_538 = arith.constant 0 : index
    %265 = vector.load %arg2[%c0_534, %c0_535, %c5_536, %c7_537, %c0_538] : memref<1x1x6x38x5xf32, #tpu.memory_space<vmem>>, vector<1x1x1x24x5xf32>
    %266 = vector.shape_cast %265 : vector<1x1x1x24x5xf32> to vector<24x5xf32>
    %c0_539 = arith.constant 0 : index
    %c0_540 = arith.constant 0 : index
    %c5_541 = arith.constant 5 : index
    %c8_542 = arith.constant 8 : index
    %c0_543 = arith.constant 0 : index
    %267 = vector.load %arg2[%c0_539, %c0_540, %c5_541, %c8_542, %c0_543] : memref<1x1x6x38x5xf32, #tpu.memory_space<vmem>>, vector<1x1x1x24x5xf32>
    %268 = vector.shape_cast %267 : vector<1x1x1x24x5xf32> to vector<24x5xf32>
    %c0_544 = arith.constant 0 : index
    %c0_545 = arith.constant 0 : index
    %c5_546 = arith.constant 5 : index
    %c12_547 = arith.constant 12 : index
    %c0_548 = arith.constant 0 : index
    %269 = vector.load %arg2[%c0_544, %c0_545, %c5_546, %c12_547, %c0_548] : memref<1x1x6x38x5xf32, #tpu.memory_space<vmem>>, vector<1x1x1x24x5xf32>
    %270 = vector.shape_cast %269 : vector<1x1x1x24x5xf32> to vector<24x5xf32>
    %c0_549 = arith.constant 0 : index
    %c0_550 = arith.constant 0 : index
    %c5_551 = arith.constant 5 : index
    %c13_552 = arith.constant 13 : index
    %c0_553 = arith.constant 0 : index
    %271 = vector.load %arg2[%c0_549, %c0_550, %c5_551, %c13_552, %c0_553] : memref<1x1x6x38x5xf32, #tpu.memory_space<vmem>>, vector<1x1x1x24x5xf32>
    %272 = vector.shape_cast %271 : vector<1x1x1x24x5xf32> to vector<24x5xf32>
    %c0_554 = arith.constant 0 : index
    %c0_555 = arith.constant 0 : index
    %c5_556 = arith.constant 5 : index
    %c14_557 = arith.constant 14 : index
    %c0_558 = arith.constant 0 : index
    %273 = vector.load %arg2[%c0_554, %c0_555, %c5_556, %c14_557, %c0_558] : memref<1x1x6x38x5xf32, #tpu.memory_space<vmem>>, vector<1x1x1x24x5xf32>
    %274 = vector.shape_cast %273 : vector<1x1x1x24x5xf32> to vector<24x5xf32>
    %275 = tpu.concatenate %222, %224, %226, %228, %230, %232, %234, %236, %238, %240, %242, %244, %246, %248, %250, %252 in 1 : vector<24x5xf32>, vector<24x5xf32>, vector<24x5xf32>, vector<24x5xf32>, vector<24x5xf32>, vector<24x5xf32>, vector<24x5xf32>, vector<24x5xf32>, vector<24x5xf32>, vector<24x5xf32>, vector<24x5xf32>, vector<24x5xf32>, vector<24x5xf32>, vector<24x5xf32>, vector<24x5xf32>, vector<24x5xf32> -> vector<24x80xf32>
    %276 = tpu.concatenate %254, %256, %258, %260, %262, %264, %266, %268, %270, %272, %274 in 1 : vector<24x5xf32>, vector<24x5xf32>, vector<24x5xf32>, vector<24x5xf32>, vector<24x5xf32>, vector<24x5xf32>, vector<24x5xf32>, vector<24x5xf32>, vector<24x5xf32>, vector<24x5xf32>, vector<24x5xf32> -> vector<24x55xf32>
    %277 = tpu.concatenate %275, %276 in 1 : vector<24x80xf32>, vector<24x55xf32> -> vector<24x135xf32>
    %cst_559 = arith.constant dense<0.000000e+00> : vector<24x64xf32>
    %278 = tpu.matmul %277, %0, %cst_559 {dimension_numbers = #tpu.dot_dimension_numbers<[1], [0], [0], [1], [0, 0, 1, 1], [], []>} : vector<24x135xf32>, vector<135x64xf32>, vector<24x64xf32> -> vector<24x64xf32>
    %279 = vector.broadcast %1 : vector<1x64xf32> to vector<24x64xf32>
    %280 = arith.addf %278, %279 : vector<24x64xf32>
    %c0_560 = arith.constant 0 : index
    %c0_561 = arith.constant 0 : index
    %c3_562 = arith.constant 3 : index
    %c0_563 = arith.constant 0 : index
    %c0_564 = arith.constant 0 : index
    %281 = vector.load %arg6[%c0_560, %c0_561, %c3_562, %c0_563, %c0_564] : memref<1x1x4x24x64xf32, #tpu.memory_space<vmem>>, vector<1x1x1x24x64xf32>
    %282 = vector.shape_cast %281 : vector<1x1x1x24x64xf32> to vector<24x64xf32>
    %283 = vector.shape_cast %280 : vector<24x64xf32> to vector<1x1x1x24x64xf32>
    tpu.vector_store %arg6[%c0_560, %c0_561, %c3_562, %c0_563, %c0_564], %283 {strides = array<i32>} : memref<1x1x4x24x64xf32, #tpu.memory_space<vmem>>, vector<1x1x1x24x64xf32>,
    %284 = vector.broadcast %2 : vector<24x1xf32> to vector<24x64xf32>
    %285 = arith.mulf %280, %284 : vector<24x64xf32>
    %cst_565 = arith.constant dense<0.000000e+00> : vector<64xf32>
    %286 = vector.multi_reduction <add>, %285, %cst_565 [0] : vector<24x64xf32> to vector<64xf32>
    %287 = vector.shape_cast %286 : vector<64xf32> to vector<1x64xf32>
    %288 = arith.addf %216, %287 : vector<1x64xf32>
    %289 = arith.mulf %285, %280 : vector<24x64xf32>
    %cst_566 = arith.constant dense<0.000000e+00> : vector<64xf32>
    %290 = vector.multi_reduction <add>, %289, %cst_566 [0] : vector<24x64xf32> to vector<64xf32>
    %291 = vector.shape_cast %290 : vector<64xf32> to vector<1x64xf32>
    %292 = arith.addf %220, %291 : vector<1x64xf32>
    %c0_567 = arith.constant 0 : index
    %c0_568 = arith.constant 0 : index
    %c0_569 = arith.constant 0 : index
    %c0_570 = arith.constant 0 : index
    %293 = vector.load %arg7[%c0_567, %c0_568, %c0_569, %c0_570] : memref<1x1x1x64xf32, #tpu.memory_space<vmem>>, vector<1x1x1x64xf32>
    %294 = vector.shape_cast %293 : vector<1x1x1x64xf32> to vector<1x64xf32>
    %295 = vector.shape_cast %288 : vector<1x64xf32> to vector<1x1x1x64xf32>
    tpu.vector_store %arg7[%c0_567, %c0_568, %c0_569, %c0_570], %295 {strides = array<i32>} : memref<1x1x1x64xf32, #tpu.memory_space<vmem>>, vector<1x1x1x64xf32>,
    %c0_571 = arith.constant 0 : index
    %c0_572 = arith.constant 0 : index
    %c0_573 = arith.constant 0 : index
    %c0_574 = arith.constant 0 : index
    %296 = vector.load %arg8[%c0_571, %c0_572, %c0_573, %c0_574] : memref<1x1x1x64xf32, #tpu.memory_space<vmem>>, vector<1x1x1x64xf32>
    %297 = vector.shape_cast %296 : vector<1x1x1x64xf32> to vector<1x64xf32>
    %298 = vector.shape_cast %292 : vector<1x64xf32> to vector<1x1x1x64xf32>
    tpu.vector_store %arg8[%c0_571, %c0_572, %c0_573, %c0_574], %298 {strides = array<i32>} : memref<1x1x1x64xf32, #tpu.memory_space<vmem>>, vector<1x1x1x64xf32>,
    return
  }
  func.func @transform_0(%arg0: i32, %arg1: i32) -> (i32, i32, i32, i32, i32) {
    %c0_i32 = arith.constant 0 : i32
    %c0_i32_0 = arith.constant 0 : i32
    %c0_i32_1 = arith.constant 0 : i32
    %c0_i32_2 = arith.constant 0 : i32
    return %arg0, %arg1, %c0_i32, %c0_i32_0, %c0_i32_1 : i32, i32, i32, i32, i32
  }
  func.func @transform_1(%arg0: i32, %arg1: i32) -> (i32, i32) {
    %c0_i32 = arith.constant 0 : i32
    %c0_i32_0 = arith.constant 0 : i32
    %c0_i32_1 = arith.constant 0 : i32
    return %c0_i32, %c0_i32_0 : i32, i32
  }
  func.func @transform_2(%arg0: i32, %arg1: i32) -> (i32, i32) {
    %c0_i32 = arith.constant 0 : i32
    %c0_i32_0 = arith.constant 0 : i32
    %c0_i32_1 = arith.constant 0 : i32
    return %c0_i32, %c0_i32_0 : i32, i32
  }
  func.func @transform_3(%arg0: i32, %arg1: i32) -> (i32, i32) {
    %c0_i32 = arith.constant 0 : i32
    %c0_i32_0 = arith.constant 0 : i32
    %c0_i32_1 = arith.constant 0 : i32
    return %c0_i32, %c0_i32_0 : i32, i32
  }
  func.func @transform_4(%arg0: i32, %arg1: i32) -> (i32, i32, i32, i32, i32) {
    %c0_i32 = arith.constant 0 : i32
    %c0_i32_0 = arith.constant 0 : i32
    %c0_i32_1 = arith.constant 0 : i32
    %c0_i32_2 = arith.constant 0 : i32
    return %arg0, %arg1, %c0_i32, %c0_i32_0, %c0_i32_1 : i32, i32, i32, i32, i32
  }
  func.func @transform_5(%arg0: i32, %arg1: i32) -> (i32, i32, i32, i32) {
    %c0_i32 = arith.constant 0 : i32
    %c0_i32_0 = arith.constant 0 : i32
    %c0_i32_1 = arith.constant 0 : i32
    return %arg0, %arg1, %c0_i32, %c0_i32_0 : i32, i32, i32, i32
  }
  func.func @transform_6(%arg0: i32, %arg1: i32) -> (i32, i32, i32, i32) {
    %c0_i32 = arith.constant 0 : i32
    %c0_i32_0 = arith.constant 0 : i32
    %c0_i32_1 = arith.constant 0 : i32
    return %arg0, %arg1, %c0_i32, %c0_i32_0 : i32, i32, i32, i32
  }
}

module attributes {stable_mosaic.version = 11 : i64} {
  func.func @_scale_shift_relu_kernel(%arg0: i32, %arg1: i32, %arg2: memref<1x1x4x24x64xf32, #tpu.memory_space<vmem>>, %arg3: memref<1x64xf32, #tpu.memory_space<vmem>>, %arg4: memref<1x64xf32, #tpu.memory_space<vmem>>, %arg5: memref<1x1x4x24x64xf32, #tpu.memory_space<vmem>>) attributes {dimension_semantics = [#tpu.dimension_semantics<parallel>, #tpu.dimension_semantics<parallel>], iteration_bounds = array<i64: 2, 1>, scalar_prefetch = 0 : i64, scratch_operands = 0 : i64, tpu.core_type = #tpu.core_type<tc>, window_params = [{transform_indices = @transform_0, window_bounds = array<i64: 1, 1, 4, 24, 64>}, {pipeline_mode = #tpu.pipeline_mode<synchronous>, transform_indices = @transform_1, window_bounds = array<i64: 1, 64>}, {pipeline_mode = #tpu.pipeline_mode<synchronous>, transform_indices = @transform_2, window_bounds = array<i64: 1, 64>}, {transform_indices = @transform_3, window_bounds = array<i64: 1, 1, 4, 24, 64>}]} {
    %c0 = arith.constant 0 : index
    %c0_0 = arith.constant 0 : index
    %c0_1 = arith.constant 0 : index
    %c0_2 = arith.constant 0 : index
    %c0_3 = arith.constant 0 : index
    %0 = vector.load %arg2[%c0, %c0_0, %c0_1, %c0_2, %c0_3] : memref<1x1x4x24x64xf32, #tpu.memory_space<vmem>>, vector<1x1x4x24x64xf32>
    %1 = vector.shape_cast %0 : vector<1x1x4x24x64xf32> to vector<4x24x64xf32>
    %c0_4 = arith.constant 0 : index
    %c0_5 = arith.constant 0 : index
    %2 = vector.load %arg3[%c0_4, %c0_5] : memref<1x64xf32, #tpu.memory_space<vmem>>, vector<1x64xf32>
    %3 = vector.shape_cast %2 : vector<1x64xf32> to vector<1x1x64xf32>
    %4 = vector.broadcast %3 : vector<1x1x64xf32> to vector<4x24x64xf32>
    %5 = arith.mulf %1, %4 : vector<4x24x64xf32>
    %c0_6 = arith.constant 0 : index
    %c0_7 = arith.constant 0 : index
    %6 = vector.load %arg4[%c0_6, %c0_7] : memref<1x64xf32, #tpu.memory_space<vmem>>, vector<1x64xf32>
    %7 = vector.shape_cast %6 : vector<1x64xf32> to vector<1x1x64xf32>
    %8 = vector.broadcast %7 : vector<1x1x64xf32> to vector<4x24x64xf32>
    %9 = arith.addf %5, %8 : vector<4x24x64xf32>
    %cst = arith.constant 0.000000e+00 : f32
    %10 = vector.broadcast %cst : f32 to vector<4x24x64xf32>
    %11 = arith.maximumf %9, %10 : vector<4x24x64xf32>
    %c0_8 = arith.constant 0 : index
    %c0_9 = arith.constant 0 : index
    %c0_10 = arith.constant 0 : index
    %c0_11 = arith.constant 0 : index
    %c0_12 = arith.constant 0 : index
    %12 = vector.load %arg5[%c0_8, %c0_9, %c0_10, %c0_11, %c0_12] : memref<1x1x4x24x64xf32, #tpu.memory_space<vmem>>, vector<1x1x4x24x64xf32>
    %13 = vector.shape_cast %12 : vector<1x1x4x24x64xf32> to vector<4x24x64xf32>
    %14 = vector.shape_cast %11 : vector<4x24x64xf32> to vector<1x1x4x24x64xf32>
    tpu.vector_store %arg5[%c0_8, %c0_9, %c0_10, %c0_11, %c0_12], %14 {strides = array<i32>} : memref<1x1x4x24x64xf32, #tpu.memory_space<vmem>>, vector<1x1x4x24x64xf32>,
    return
  }
  func.func @transform_0(%arg0: i32, %arg1: i32) -> (i32, i32, i32, i32, i32) {
    %c0_i32 = arith.constant 0 : i32
    %c0_i32_0 = arith.constant 0 : i32
    %c0_i32_1 = arith.constant 0 : i32
    %c0_i32_2 = arith.constant 0 : i32
    return %arg0, %arg1, %c0_i32, %c0_i32_0, %c0_i32_1 : i32, i32, i32, i32, i32
  }
  func.func @transform_1(%arg0: i32, %arg1: i32) -> (i32, i32) {
    %c0_i32 = arith.constant 0 : i32
    %c0_i32_0 = arith.constant 0 : i32
    %c0_i32_1 = arith.constant 0 : i32
    return %c0_i32, %c0_i32_0 : i32, i32
  }
  func.func @transform_2(%arg0: i32, %arg1: i32) -> (i32, i32) {
    %c0_i32 = arith.constant 0 : i32
    %c0_i32_0 = arith.constant 0 : i32
    %c0_i32_1 = arith.constant 0 : i32
    return %c0_i32, %c0_i32_0 : i32, i32
  }
  func.func @transform_3(%arg0: i32, %arg1: i32) -> (i32, i32, i32, i32, i32) {
    %c0_i32 = arith.constant 0 : i32
    %c0_i32_0 = arith.constant 0 : i32
    %c0_i32_1 = arith.constant 0 : i32
    %c0_i32_2 = arith.constant 0 : i32
    return %arg0, %arg1, %c0_i32, %c0_i32_0, %c0_i32_1 : i32, i32, i32, i32, i32
  }
}

</mosaic_0001>

<bundles_post_ra>
// kernel: tile.18
= control target key start
LH: loop header
LB: loop body
LE: loop exit
PB: predicated region body
PF: predicated region fallthrough
CT: control target
= control target key end

     0   :  { %s22_s0 = inlined_call_operand.vmem [shape: f32[8], index: 0, kind: input, shape index: {}]   ;;  %s23_s1 = inlined_call_operand.vmem [shape: f32[8,8], index: 1, kind: output, shape index: {}]  }
   0x1   :  { %v4_v0 = vld [vmem:[%s22_s0] ss:$0 sm:$0xff] }
   0x2   :  { %5 = vst [vmem:[%s23_s1] sm:$0xff] %v4_v0 }

// kernel: tile.19
= control target key start
LH: loop header
LB: loop body
LE: loop exit
PB: predicated region body
PF: predicated region fallthrough
CT: control target
= control target key end

     0   :  { %s67_s10 = smov 56   ;;  %s68_s11 = smov 40   ;;  %vm3_vm0 = vcmask 64512   ;;  %vm9_vm1 = vcmask 523712   ;;  %vm15_vm2 = vcmask 458112   ;;  %vm21_vm3 = vcmask 392512   ;;  %s111_s0 = inlined_call_operand.vmem [shape: f32[8,8], index: 0, kind: input, shape index: {}]   ;;  %s112_s1 = inlined_call_operand.vmem [shape: f32[1,64], index: 1, kind: output, shape index: {}]  }
   0x1   :  { %v53_v0 = vld [vmem:[%s111_s0 + $0x7] sm:$0x1]   ;;  %v55_v1 = vld [vmem:[%s111_s0 + $0x5] sm:$0x1]   ;;  %v57_v2 = vld [vmem:[%s111_s0 + $0x3] sm:$0x1]  }
   0x2   :  { %7 = vrot.lane.b32.xlu0 %v53_v0, %s67_s10  ;;  %19 = vrot.lane.b32.xlu1 %v55_v1, %s68_s11  ;;  %s69_s14 = smov 24   ;;  %v54_v3 = vld [vmem:[%s111_s0 + $0x6] sm:$0x1]   ;;  %v56_v4 = vld [vmem:[%s111_s0 + $0x4] sm:$0x1]   ;;  %s70_s21 = smov 48  }
   0x3   :  { %31 = vrot.lane.b32.xlu2 %v57_v2, %s69_s14  ;;  %v58_v5 = vld [vmem:[%s111_s0 + $0x2] sm:$0x1]   ;;  %s71_s22 = smov 32   ;;  %s72_s23 = smov 16   ;;  %v59_v6 = vld [vmem:[%s111_s0 + $0x1] sm:$0x1]  }
   0x4   :  { %s73_s26 = smov 8   ;;  %v2_v7 = vld [vmem:[%s111_s0] sm:$0x1]   ;;  %vm27_vm4 = vcmask 326912   ;;  %vm33_vm5 = vcmask 261312   ;;  %vm39_vm6 = vcmask 195712  }
   0x5   :  { %4 = vst.msk [vmem:[#allocation0] sm:$0x1] %vm3_vm0, %v2_v7   ;;  %vm45_vm7 = vcmask 130112  }
   0xa   :  { %13 = vrot.lane.b32.xlu0 %v54_v3, %s70_s21  ;;  %25 = vrot.lane.b32.xlu1 %v56_v4, %s71_s22 }
   0xb   :  { %37 = vrot.lane.b32.xlu2 %v58_v5, %s72_s23 }
  0x12   :  { %43 = vrot.lane.b32.xlu0 %v59_v6, %s73_s26 }
  0x5d   :  { %v32_v8 = vpop.permute.xlu2 %31  }
  0x65   :  { %v38_v9 = vpop.permute.xlu2 %37  }
  0x74   :  { %v8_v10 = vpop.permute.xlu0 %7   ;;  %v20_v11 = vpop.permute.xlu1 %19  }
  0x75   :  { %10 = vst.msk [vmem:[#allocation0] sm:$0x1] %vm9_vm1, %v8_v10  }
  0x7c   :  { %v14_v12 = vpop.permute.xlu0 %13   ;;  %v26_v13 = vpop.permute.xlu1 %25  }
  0x7d   :  { %16 = vst.msk [vmem:[#allocation0] sm:$0x1] %vm15_vm2, %v14_v12  }
  0x7e   :  { %22 = vst.msk [vmem:[#allocation0] sm:$0x1] %vm21_vm3, %v20_v11  }
  0x7f   :  { %28 = vst.msk [vmem:[#allocation0] sm:$0x1] %vm27_vm4, %v26_v13  }
  0x80   :  { %34 = vst.msk [vmem:[#allocation0] sm:$0x1] %vm33_vm5, %v32_v8  }
  0x81   :  { %40 = vst.msk [vmem:[#allocation0] sm:$0x1] %vm39_vm6, %v38_v9  }
  0x84   :  { %v44_v14 = vpop.permute.xlu0 %43  }
  0x85   :  { %46 = vst.msk [vmem:[#allocation0] sm:$0x1] %vm45_vm7, %v44_v14  }
  0x8c   :  { %v49_v15 = vld [vmem:[#allocation0] sm:$0x1] }
  0x8d   :  { %52 = vst [vmem:[%s112_s1] sm:$0x1] %v49_v15 }

// kernel: deconv_block_forward.3
= control target key start
LH: loop header
LB: loop body
LE: loop exit
PB: predicated region body
PF: predicated region fallthrough
CT: control target
= control target key end

     0   :  { %s448_s12 = smov 0   ;;  %s450_s13 = smov 0   ;;  %s527_s0 = inlined_call_operand.vmem [shape: f32[2,1,4,24,64], index: 0, kind: input, shape index: {}]   ;;  %s528_s1 = inlined_call_operand.vmem [shape: f32[1,64], index: 1, kind: input, shape index: {}]   ;;  %s529_s2 = inlined_call_operand.vmem [shape: f32[1,64], index: 2, kind: input, shape index: {}]   ;;  %s530_s3 = inlined_call_operand.vmem [shape: f32[2,1,4,24,64], index: 3, kind: output, shape index: {}]  }
   0x1   :  { %s452_s14 = smov 0  }
   0x2 LB: > { %s25_s15 = sadd.s32 1, %s422_s13  ;;  %p372_p0 = scmp.ge.s32.totalorder %s426_s14, 1  ;;  %s426_s14 = sphi %s452_s14, %s13_s14   ;;  %s422_s13 = sphi %s450_s13, %s532_s13   ;;  %s418_s12 = sphi %s448_s12, %s531_s12  }
   0x3   : > { %p27_p1 = scmp.ge.s32.totalorder %s25_s15, 2  ;;  %p157_p2 = scmp.lt.s32.totalorder %s426_s14, 3 }
   0x5   : > { %s534_s15 = smov (%p27_p1, %s25_s15), 0  ;;  %p158_p3 = pnand %p372_p0, %p157_p2 }
   0x6   : > { %p189_p4 = scmp.lt.s32.totalorder (!%p158_p3), %s418_s12, 1 }
   0x7   : > { %161 = sbr.rel (%p158_p3) target bundleno = 35 (0x23), region = 32 }
   0xc   : > { %s536_s12 = smov (!%p189_p4, %s418_s12), 1  ;;  %v402_v0 = vld [vmem:[%s528_s1] ss:$0 sm:$0xff]  ;;  %vm263_vm0 = vcmask 523264  }
   0xd   : > { %s377_s16 = smul.u32 96, %s536_s12  ;;  %v403_v1 = vld [vmem:[%s529_s2] ss:$0 sm:$0xff] }
   0xf   : > { %s472_s21 = scalar_lea.vmem %s527_s0, %s377_s16  ;;  %s488_s26 = scalar_lea.vmem %s530_s3, %s377_s16 }
  0x10   : > { %v207_v2 = vld [vmem:[%s472_s21] sm:$0xff]  ;;  %v208_v3 = vld [vmem:[%s472_s21 + $0x8] sm:$0xff]  ;;  %v209_v4 = vld [vmem:[%s472_s21 + $0x10] sm:$0xff] }
  0x11   : > { %v223_v5 = vmul.f32 %v402_v0, %v207_v2  ;;  %v224_v6 = vmul.f32 %v402_v0, %v208_v3  ;;  %v225_v7 = vmul.f32 %v402_v0, %v209_v4  ;;  %v210_v8 = vld [vmem:[%s472_s21 + $0x18] sm:$0xff]  ;;  %v211_v9 = vld [vmem:[%s472_s21 + $0x20] sm:$0xff]  ;;  %v212_v10 = vld [vmem:[%s472_s21 + $0x28] sm:$0xff] }
  0x12   : > { %v226_v11 = vmul.f32 %v402_v0, %v210_v8  ;;  %v227_v12 = vmul.f32 %v402_v0, %v211_v9  ;;  %v228_v13 = vmul.f32 %v402_v0, %v212_v10  ;;  %v213_v14 = vld [vmem:[%s472_s21 + $0x30] sm:$0xff]  ;;  %v214_v15 = vld [vmem:[%s472_s21 + $0x38] sm:$0xff]  ;;  %v215_v24 = vld [vmem:[%s472_s21 + $0x40] sm:$0xff] }
  0x13   : > { %v239_v16 = vadd.f32 %v403_v1, %v223_v5  ;;  %v240_v17 = vadd.f32 %v403_v1, %v224_v6  ;;  %v241_v18 = vadd.f32 %v403_v1, %v225_v7  ;;  %v229_v19 = vmul.f32 %v402_v0, %v213_v14  ;;  %v216_v25 = vld [vmem:[%s472_s21 + $0x48] sm:$0xff]  ;;  %v217_v26 = vld [vmem:[%s472_s21 + $0x50] sm:$0xff]  ;;  %v218_v31 = vld [vmem:[%s472_s21 + $0x58] sm:$0xff] }
  0x14   : > { %v242_v20 = vadd.f32 %v403_v1, %v226_v11  ;;  %v243_v21 = vadd.f32 %v403_v1, %v227_v12  ;;  %v244_v22 = vadd.f32 %v403_v1, %v228_v13  ;;  %v230_v23 = vmul.f32 %v402_v0, %v214_v15 }
  0x15   : > { %v251_v27 = vmax.f32 %v239_v16, 0.0  ;;  %v252_v28 = vmax.f32 %v240_v17, 0.0  ;;  %v253_v29 = vmax.f32 %v241_v18, 0.0  ;;  %v245_v30 = vadd.f32 %v403_v1, %v229_v19 }
  0x16   : > { %v254_v32 = vmax.f32 %v242_v20, 0.0  ;;  %v246_v33 = vadd.f32 %v403_v1, %v230_v23  ;;  %v255_v34 = vmax.f32 %v243_v21, 0.0  ;;  %v231_v35 = vmul.f32 %v402_v0, %v215_v24 }
  0x17   : > { %264 = vst.msk [vmem:[%s488_s26] sm:$0xff] %vm263_vm0, %v251_v27  ;;  %v232_v36 = vmul.f32 %v402_v0, %v216_v25  ;;  %v233_v37 = vmul.f32 %v402_v0, %v217_v26  ;;  %v256_v38 = vmax.f32 %v244_v22, 0.0  ;;  %v234_v39 = vmul.f32 %v402_v0, %v218_v31 }
  0x18   : > { %265 = vst.msk [vmem:[%s488_s26 + $0x8] sm:$0xff] %vm263_vm0, %v252_v28  ;;  %v257_v40 = vmax.f32 %v245_v30, 0.0  ;;  %v247_v41 = vadd.f32 %v403_v1, %v231_v35  ;;  %v258_v44 = vmax.f32 %v246_v33, 0.0 }
  0x19   : > { %266 = vst.msk [vmem:[%s488_s26 + $0x10] sm:$0xff] %vm263_vm0, %v253_v29  ;;  %v248_v42 = vadd.f32 %v403_v1, %v232_v36  ;;  %v249_v43 = vadd.f32 %v403_v1, %v233_v37  ;;  %v250_v45 = vadd.f32 %v403_v1, %v234_v39 }
  0x1a   : > { %267 = vst.msk [vmem:[%s488_s26 + $0x18] sm:$0xff] %vm263_vm0, %v254_v32  ;;  %v259_v46 = vmax.f32 %v247_v41, 0.0 }
  0x1b   : > { %268 = vst.msk [vmem:[%s488_s26 + $0x20] sm:$0xff] %vm263_vm0, %v255_v34  ;;  %v260_v47 = vmax.f32 %v248_v42, 0.0  ;;  %v261_v48 = vmax.f32 %v249_v43, 0.0  ;;  %v262_v49 = vmax.f32 %v250_v45, 0.0 }
  0x1c   : > { %269 = vst.msk [vmem:[%s488_s26 + $0x28] sm:$0xff] %vm263_vm0, %v256_v38 }
  0x1d   : > { %270 = vst.msk [vmem:[%s488_s26 + $0x30] sm:$0xff] %vm263_vm0, %v257_v40 }
  0x1e   : > { %271 = vst.msk [vmem:[%s488_s26 + $0x38] sm:$0xff] %vm263_vm0, %v258_v44 }
  0x1f   : > { %272 = vst.msk [vmem:[%s488_s26 + $0x40] sm:$0xff] %vm263_vm0, %v259_v46 }
  0x20   : > { %273 = vst.msk [vmem:[%s488_s26 + $0x48] sm:$0xff] %vm263_vm0, %v260_v47 }
  0x21   : > { %274 = vst.msk [vmem:[%s488_s26 + $0x50] sm:$0xff] %vm263_vm0, %v261_v48 }
  0x22   : > { %275 = vst.msk [vmem:[%s488_s26 + $0x58] sm:$0xff] %vm263_vm0, %v262_v49 }
  0x23 PF: > { %s13_s14 = sadd.s32 1, %s426_s14   ;;  %s531_s12 = smov %s422_s13 }
  0x24   : > { %p10_p5 = scmp.ge.s32.totalorder %s13_s14, 4   ;;  %s532_s13 = smov %s534_s15 }
  0x26   :  { %12 = sbr.rel (!%p10_p5) target bundleno = 2 (0x2), region = 62 }

// kernel: deconv_block_forward.2
= control target key start
LH: loop header
LB: loop body
LE: loop exit
PB: predicated region body
PF: predicated region fallthrough
CT: control target
= control target key end

     0   :  { %s3597_s21 = smov 0   ;;  %s3599_s22 = smov 0   ;;  %s5338_s0 = inlined_call_operand.vmem [shape: f32[2,1,6,38,5], index: 0, kind: input, shape index: {}]   ;;  %s5339_s1 = inlined_call_operand.vmem [shape: f32[135,64], index: 1, kind: input, shape index: {}]   ;;  %s5340_s2 = inlined_call_operand.vmem [shape: f32[1,64], index: 2, kind: input, shape index: {}]   ;;  %s5341_s3 = inlined_call_operand.vmem [shape: f32[24,1], index: 3, kind: input, shape index: {}]   ;;  %s5342_s4 = inlined_call_operand.vmem [shape: f32[2,1,4,24,64], index: 4, kind: output, shape index: {0}]   ;;  %s5343_s5 = inlined_call_operand.vmem [shape: f32[2,1,1,64], index: 5, kind: output, shape index: {1}]   ;;  %s5344_s6 = inlined_call_operand.vmem [shape: f32[2,1,1,64], index: 6, kind: output, shape index: {2}]  }
   0x1   :  { %s3601_s23 = smov 0  }
   0x2 LB: > { %s29_s24 = sadd.s32 1, %s3539_s22  ;;  %p2719_p0 = scmp.ge.s32.totalorder %s3543_s23, 1  ;;  %s3543_s23 = sphi %s3601_s23, %s17_s23   ;;  %s3539_s22 = sphi %s3599_s22, %s5583_s22   ;;  %s3535_s21 = sphi %s3597_s21, %s5582_s21  }
   0x3   : > { %p31_p1 = scmp.ge.s32.totalorder %s29_s24, 2  ;;  %p241_p2 = scmp.lt.s32.totalorder %s3543_s23, 3 }
   0x5   : > { %s5585_s24 = smov (%p31_p1, %s29_s24), 0  ;;  %p242_p3 = pnand %p2719_p0, %p241_p2 }
   0x7   : > { %245 = sbr.rel (%p242_p3) target bundleno = 1143 (0x477), region = 36 }
   0xc   : > { %p291_p4 = scmp.lt.s32.totalorder %s3535_s21, 1  ;;  %s3545_s29 = smov 15   ;;  %vm589_vm0 = vcmask 39936   ;;  %vm593_vm1 = vcmask 80896   ;;  %vm5399_vm2 = vcmask 121856   ;;  %vm5380_vm3 = vcmask 162816  }
   0xd   : > { %s3546_s30 = smov 10   ;;  %s3547_s7 = smov 5   ;;  %vm5381_vm4 = vcmask 203776   ;;  %vm609_vm5 = vcmask 244736   ;;  %vm613_vm6 = vcmask 285696   ;;  %vm617_vm7 = vcmask 326656  }
   0xe   : > { %s5587_s21 = smov (!%p291_p4, %s3535_s21), 1  ;;  %s3548_s8 = smov 25   ;;  %vm621_vm8 = vcmask 367616   ;;  %vm625_vm9 = vcmask 408576   ;;  %vm819_vm10 = vcmask 1046528   ;;  %vm629_vm11 = vcmask 449536  }
   0xf   : > { %s3004_s25 = smul.u32 240, %s5587_s21  ;;  %s3549_s9 = smov 20   ;;  %vm633_vm12 = vcmask 490496   ;;  %vm637_vm13 = vcmask 531456   ;;  %vm5400_vm14 = vcmask 572416   ;;  %vm5394_vm15 = vcmask 613376  }
  0x10   : > { %s3550_s10 = smov 30   ;;  %s3551_s11 = smov 40  }
  0x11   : > { %s3621_s28 = scalar_lea.vmem %s5338_s0, %s3004_s25  ;;  %s3552_s12 = smov 35  }
  0x12   : > { %v352_v0 = vld [vmem:[%s3621_s28 + $0xe] sm:$0xff]  ;;  %v351_v1 = vld [vmem:[%s3621_s28 + $0x6] sm:$0xff]  ;;  %v353_v9 = vld [vmem:[%s3621_s28 + $0x16] sm:$0xff]  ;;  %s3553_s13 = smov 45   ;;  %s5376_s14 = smov 55  }
  0x13   : > { %v3067_v2 = vpack.i.bf16 %v352_v0, %v351_v1  ;;  %v348_v3 = vld [vmem:[%s3621_s28 + $0x2] sm:$0xff]  ;;  %v349_v4 = vld [vmem:[%s3621_s28 + $0xa] sm:$0xff]  ;;  %v350_v11 = vld [vmem:[%s3621_s28 + $0x12] sm:$0xff]  ;;  %v3117_v40 = vpack.i.bf16 %v353_v9, %v352_v0  ;;  %s3555_s15 = smov 50   ;;  %s5395_s16 = smov 60  }
  0x14   : > { %v345_v5 = vld [vmem:[%s3621_s28 + $0x1] sm:$0xff]  ;;  %v3057_v6 = vpack.i.bf16 %v349_v4, %v348_v3  ;;  %v346_v7 = vld [vmem:[%s3621_s28 + $0x9] sm:$0xff]  ;;  %v347_v13 = vld [vmem:[%s3621_s28 + $0x11] sm:$0xff]  ;;  %s5374_s17 = smov 70   ;;  %s5378_s18 = smov 65  }
  0x15   : > { %3068 = vrot.lane.b32.xlu2 %v3067_v2, %s3545_s29  ;;  %v3047_v8 = vpack.i.bf16 %v346_v7, %v345_v5  ;;  %v3633_v10 = vld [vmem:[%s3621_s28 + $0x2e] sm:$0xff]  ;;  %v356_v20 = vld [vmem:[%s3621_s28 + $0x17] sm:$0xff]  ;;  %v3741_v1 = vld [vmem:[%s3621_s28 + $0x3f] sm:$0xff]  ;;  %s5372_s19 = smov 75   ;;  %s5396_s20 = smov 80  }
  0x16   : > { %3058 = vrot.lane.b32.xlu1 %v3057_v6, %s3546_s30  ;;  %v3638_v12 = vld [vmem:[%s3621_s28 + $0x2a] sm:$0xff]  ;;  %v3072_v15 = vpack.i.bf16 %v3633_v10, %v353_v9  ;;  %v360_v27 = vld [vmem:[%s3621_s28 + $0x1c] sm:$0xff]  ;;  %v3669_v28 = vld [vmem:[%s3621_s28 + $0x34] sm:$0xff]  ;;  %s5473_s27 = smov 55  }
  0x17   : > { %3048 = vrot.lane.b32.xlu0 %v3047_v8, %s3547_s7  ;;  %v3642_v14 = vld [vmem:[%s3621_s28 + $0x29] sm:$0xff]  ;;  %v3062_v16 = vpack.i.bf16 %v3638_v12, %v350_v11  ;;  %v359_v30 = vld [vmem:[%s3621_s28 + $0x14] sm:$0xff]  ;;  %v3102_v33 = vpack.i.bf16 %v3669_v28, %v360_v27  ;;  %v363_v36 = vld [vmem:[%s3621_s28 + $0x1d] sm:$0xff] }
  0x18   : > { %v3052_v17 = vpack.i.bf16 %v3642_v14, %v347_v13  ;;  %v3650_v18 = vld [vmem:[%s3621_s28 + $0x8] sm:$0xff]  ;;  %v3653_v19 = vld [vmem:[%s3621_s28 + $0x10] sm:$0xff]  ;;  %v357_v31 = vld [vmem:[%s3621_s28 + $0x18] sm:$0xff] }
  0x19   : > { %5401 = vst [vmem:[#allocation2_spill] sm:$0xff] %v3653_v19  ;;  %v3658_v21 = vld [vmem:[%s3621_s28 + $0x2f] sm:$0xff]  ;;  %v354_v22 = vld [vmem:[%s3621_s28 + $0x7] sm:$0xff]  ;;  %v3087_v24 = vpack.i.bf16 %v3653_v19, %v3650_v18  ;;  %v3690_v43 = vld [vmem:[%s3621_s28 + $0x38] sm:$0xff] }
  0x1a   : > { %v355_v23 = vld [vmem:[%s3621_s28 + $0xf] sm:$0xff]  ;;  %v3082_v25 = vpack.i.bf16 %v3658_v21, %v356_v20  ;;  %v364_v46 = vld [vmem:[%s3621_s28 + $0x1e] sm:$0xff] }
  0x1b   : > { %v3077_v26 = vpack.i.bf16 %v355_v23, %v354_v22  ;;  %v358_v29 = vld [vmem:[%s3621_s28 + $0xc] sm:$0xff]  ;;  %v3682_v37 = vld [vmem:[%s3621_s28 + $0x35] sm:$0xff]  ;;  %v3725_v58 = vld [vmem:[%s3621_s28 + $0x3e] sm:$0xff] }
  0x1c   : > { %v2773_v32 = vld [vmem:[%s3621_s28 + $0x30] sm:$0xff]  ;;  %v3097_v34 = vpack.i.bf16 %v359_v30, %v358_v29  ;;  %v3112_v41 = vpack.i.bf16 %v3682_v37, %v363_v36  ;;  %v2722_v45 = vld [vmem:[%s3621_s28 + $0x28] sm:$0xff]  ;;  %v3711_v52 = vld [vmem:[%s3621_s28 + $0x39] sm:$0xff] }
  0x1d   : > { %3073 = vrot.lane.b32.xlu2 %v3072_v15, %s3545_s29  ;;  %v3092_v35 = vpack.i.bf16 %v2773_v32, %v357_v31  ;;  %v361_v38 = vld [vmem:[%s3621_s28 + $0xd] sm:$0xff]  ;;  %v362_v39 = vld [vmem:[%s3621_s28 + $0x15] sm:$0xff]  ;;  %v3127_v49 = vpack.i.bf16 %v2773_v32, %v2722_v45  ;;  %v3177_v4 = vpack.i.bf16 %v3690_v43, %v2773_v32  ;;  %v3754_v7 = vld [vmem:[%s3621_s28 + $0x44] sm:$0xff] }
  0x1e   : > { %3063 = vrot.lane.b32.xlu1 %v3062_v16, %s3546_s30  ;;  %v3107_v42 = vpack.i.bf16 %v362_v39, %v361_v38  ;;  %v3693_v44 = vld [vmem:[%s3621_s28 + $0x50] sm:$0xff]  ;;  %v3730_v60 = vld [vmem:[%s3621_s28 + $0x3a] sm:$0xff]  ;;  %v3776_v15 = vld [vmem:[%s3621_s28 + $0x46] sm:$0xff] }
  0x1f   : > { %3053 = vrot.lane.b32.xlu0 %v3052_v17, %s3547_s7  ;;  %v3699_v47 = vld [vmem:[%s3621_s28 + $0x36] sm:$0xff]  ;;  %v3132_v48 = vpack.i.bf16 %v3693_v44, %v3690_v43  ;;  %v3785_v16 = vld [vmem:[%s3621_s28 + $0x60] sm:$0xff]  ;;  %v3856_v36 = vld [vmem:[%s3621_s28 + $0x68] sm:$0xff] }
  0x20   : > { %v3122_v50 = vpack.i.bf16 %v3699_v47, %v364_v46  ;;  %v3707_v51 = vld [vmem:[%s3621_s28 + $0x32] sm:$0xff]  ;;  %v3157_v63 = vpack.i.bf16 %v3699_v47, %v3633_v10  ;;  %v2811_v8 = vld [vmem:[%s3621_s28 + $0x5c] sm:$0xff]  ;;  %v3839_v31 = vld [vmem:[%s3621_s28 + $0x67] sm:$0xff] }
  0x21   : > { %v2798_v53 = vld [vmem:[%s3621_s28 + $0x51] sm:$0xff]  ;;  %v3147_v55 = vpack.i.bf16 %v3707_v51, %v3638_v12  ;;  %v3759_v9 = vld [vmem:[%s3621_s28 + $0x3c] sm:$0xff]  ;;  %v3192_v12 = vpack.i.bf16 %v2811_v8, %v3754_v7 }
  0x22   : > { %v3715_v54 = vld [vmem:[%s3621_s28 + $0x31] sm:$0xff]  ;;  %v3142_v56 = vpack.i.bf16 %v2798_v53, %v3711_v52  ;;  %v3762_v10 = vld [vmem:[%s3621_s28 + $0x40] sm:$0xff]  ;;  %v3187_v13 = vpack.i.bf16 %v3759_v9, %v3669_v28 }
  0x23   : > { %v3137_v57 = vpack.i.bf16 %v3715_v54, %v3642_v14  ;;  %v2804_v59 = vld [vmem:[%s3621_s28 + $0x56] sm:$0xff]  ;;  %v3796_v20 = vld [vmem:[%s3621_s28 + $0x61] sm:$0xff] }
  0x24   : > { %v2801_v61 = vld [vmem:[%s3621_s28 + $0x52] sm:$0xff]  ;;  %v3162_v62 = vpack.i.bf16 %v2804_v59, %v3725_v58  ;;  %v3809_v23 = vld [vmem:[%s3621_s28 + $0x62] sm:$0xff] }
  0x25   : > { %3088 = vrot.lane.b32.xlu2 %v3087_v24, %s3548_s8  ;;  %v3152_v0 = vpack.i.bf16 %v2801_v61, %v3730_v60  ;;  %v2807_v2 = vld [vmem:[%s3621_s28 + $0x57] sm:$0xff]  ;;  %v3842_v32 = vld [vmem:[%s3621_s28 + $0x5f] sm:$0xff] }
  0x26   : > { %3083 = vrot.lane.b32.xlu1 %v3082_v25, %s3549_s9  ;;  %v3745_v3 = vld [vmem:[%s3621_s28 + $0x37] sm:$0xff]  ;;  %v3172_v5 = vpack.i.bf16 %v2807_v2, %v3741_v1 }
  0x27   : > { %3078 = vrot.lane.b32.xlu0 %v3077_v26, %s3549_s9  ;;  %v3167_v6 = vpack.i.bf16 %v3745_v3, %v3658_v21  ;;  %v3765_v11 = vld [vmem:[%s3621_s28 + $0x58] sm:$0xff]  ;;  %v3822_v26 = vld [vmem:[%s3621_s28 + $0x66] sm:$0xff] }
  0x28   : > { %v3182_v14 = vpack.i.bf16 %v3765_v11, %v3762_v10  ;;  %v3799_v21 = vld [vmem:[%s3621_s28 + $0x59] sm:$0xff] }
  0x29   : > { %v3812_v24 = vld [vmem:[%s3621_s28 + $0x5a] sm:$0xff] }
  0x2a   : > { %v3825_v27 = vld [vmem:[%s3621_s28 + $0x5e] sm:$0xff] }
  0x2d   : > { %3103 = vrot.lane.b32.xlu2 %v3102_v33, %s3550_s10 }
  0x2e   : > { %3098 = vrot.lane.b32.xlu1 %v3097_v34, %s3550_s10 }
  0x2f   : > { %3093 = vrot.lane.b32.xlu0 %v3092_v35, %s3548_s8 }
  0x35   : > { %3118 = vrot.lane.b32.xlu2 %v3117_v40, %s3551_s11 }
  0x36   : > { %3113 = vrot.lane.b32.xlu1 %v3112_v41, %s3552_s12  ;;  %v3871_v41 = vld [vmem:[%s3621_s28 + $0x6c] sm:$0xff] }
  0x37   : > { %3108 = vrot.lane.b32.xlu0 %v3107_v42, %s3552_s12  ;;  %v3874_v42 = vld [vmem:[%s3621_s28 + $0x64] sm:$0xff] }
  0x3d   : > { %3133 = vrot.lane.b32.xlu2 %v3132_v48, %s3553_s13  ;;  %v3888_v48 = vld [vmem:[%s3621_s28 + $0x6d] sm:$0xff] }
  0x3e   : > { %3128 = vrot.lane.b32.xlu1 %v3127_v49, %s3553_s13  ;;  %5411 = vst [vmem:[#allocation12_spill] sm:$0xff] %v3888_v48  ;;  %v3891_v49 = vld [vmem:[%s3621_s28 + $0x65] sm:$0xff] }
  0x3f   : > { %3123 = vrot.lane.b32.xlu0 %v3122_v50, %s3551_s11  ;;  %5412 = vst [vmem:[#allocation13_spill] sm:$0xff] %v3891_v49  ;;  %v3894_v50 = vld [vmem:[%s3621_s28 + $0x5d] sm:$0xff] }
  0x40   : > { %5413 = vst [vmem:[#allocation14_spill] sm:$0xff] %v3894_v50 }
  0x45   : > { %3148 = vrot.lane.b32.xlu2 %v3147_v55, %s5376_s14 }
  0x46   : > { %3143 = vrot.lane.b32.xlu1 %v3142_v56, %s3555_s15 }
  0x47   : > { %3138 = vrot.lane.b32.xlu0 %v3137_v57, %s3555_s15  ;;  %v3909_v57 = vld [vmem:[%s3621_s28 + $0x6e] sm:$0xff] }
  0x4d   : > { %3163 = vrot.lane.b32.xlu2 %v3162_v62, %s5395_s16 }
  0x4e   : > { %3158 = vrot.lane.b32.xlu1 %v3157_v63, %s5395_s16 }
  0x4f   : > { %3153 = vrot.lane.b32.xlu0 %v3152_v0, %s5376_s14 }
  0x55   : > { %3178 = vrot.lane.b32.xlu2 %v3177_v4, %s5374_s17 }
  0x56   : > { %3173 = vrot.lane.b32.xlu1 %v3172_v5, %s5378_s18 }
  0x57   : > { %3168 = vrot.lane.b32.xlu0 %v3167_v6, %s5378_s18 }
  0x5d   : > { %3193 = vrot.lane.b32.xlu2 %v3192_v12, %s5372_s19 }
  0x5e   : > { %3188 = vrot.lane.b32.xlu1 %v3187_v13, %s5372_s19  ;;  %s5428_s19 = smov 75  }
  0x5f   : > { %3183 = vrot.lane.b32.xlu0 %v3182_v14, %s5374_s17 }
  0x65   : > { %654 = vrot.lane.b32.xlu2 %v3776_v15, %s3547_s7 }
  0x66   : > { %652 = vrot.lane.b32.xlu1 %v3725_v58, %s3547_s7 }
  0x67   : > { %650 = vrot.lane.b32.xlu0 %v3699_v47, %s3547_s7 }
  0x6d   : > { %666 = vrot.lane.b32.xlu2 %v3785_v16, %s3546_s30 }
  0x6e   : > { %664 = vrot.lane.b32.xlu1 %v3765_v11, %s3546_s30 }
  0x6f   : > { %662 = vrot.lane.b32.xlu0 %v3693_v44, %s3546_s30  ;;  %v3793_v17 = vpop.permute.xlu2 %3068 }
  0x75   : > { %678 = vrot.lane.b32.xlu2 %v3796_v20, %s3545_s29 }
  0x76   : > { %676 = vrot.lane.b32.xlu1 %v3799_v21, %s3545_s29 }
  0x77   : > { %674 = vrot.lane.b32.xlu0 %v2798_v53, %s3545_s29  ;;  %v3806_v22 = vpop.permute.xlu2 %3073 }
  0x78   : > { %5402 = vst [vmem:[#allocation3_spill] sm:$0xff] %v3806_v22 }
  0x7d   : > { %690 = vrot.lane.b32.xlu2 %v3809_v23, %s3549_s9 }
  0x7e   : > { %688 = vrot.lane.b32.xlu1 %v3812_v24, %s3549_s9 }
  0x7f   : > { %686 = vrot.lane.b32.xlu0 %v2801_v61, %s3549_s9  ;;  %v3819_v25 = vpop.permute.xlu2 %3088 }
  0x85   : > { %702 = vrot.lane.b32.xlu2 %v3822_v26, %s3548_s8 }
  0x86   : > { %700 = vrot.lane.b32.xlu1 %v3825_v27, %s3548_s8 }
  0x87   : > { %698 = vrot.lane.b32.xlu0 %v2804_v59, %s3548_s8  ;;  %v3832_v28 = vpop.permute.xlu2 %3103 }
  0x88   : > { %5403 = vst [vmem:[#allocation4_spill] sm:$0xff] %v3832_v28  ;;  %v3834_v29 = vpop.permute.xlu1 %3058  ;;  %v3942_v28 = vld [vmem:[%s3621_s28 + $0x45] sm:$0xff] }
  0x89   : > { %v3836_v30 = vpop.permute.xlu0 %3048 }
  0x8d   : > { %714 = vrot.lane.b32.xlu2 %v3839_v31, %s3550_s10 }
  0x8e   : > { %712 = vrot.lane.b32.xlu1 %v3842_v32, %s3550_s10 }
  0x8f   : > { %710 = vrot.lane.b32.xlu0 %v2807_v2, %s3550_s10  ;;  %v3849_v33 = vpop.permute.xlu2 %3118 }
  0x90   : > { %5404 = vst [vmem:[#allocation5_spill] sm:$0xff] %v3849_v33  ;;  %v3851_v34 = vpop.permute.xlu1 %3063 }
  0x91   : > { %5405 = vst [vmem:[#allocation6_spill] sm:$0xff] %v3851_v34  ;;  %v3853_v35 = vpop.permute.xlu0 %3053 }
  0x92   : > { %5406 = vst [vmem:[#allocation7_spill] sm:$0xff] %v3853_v35 }
  0x95   : > { %724 = vrot.lane.b32.xlu2 %v3856_v36, %s3552_s12 }
  0x96   : > { %722 = vrot.lane.b32.xlu1 %v3785_v16, %s3552_s12 }
  0x97   : > { %720 = vrot.lane.b32.xlu0 %v3765_v11, %s3552_s12  ;;  %v3864_v38 = vpop.permute.xlu2 %3133 }
  0x98   : > { %5407 = vst [vmem:[#allocation8_spill] sm:$0xff] %v3864_v38  ;;  %v3866_v39 = vpop.permute.xlu1 %3083 }
  0x99   : > { %5408 = vst [vmem:[#allocation9_spill] sm:$0xff] %v3866_v39  ;;  %v3868_v40 = vpop.permute.xlu0 %3078 }
  0x9d   : > { %736 = vrot.lane.b32.xlu2 %v3871_v41, %s3551_s11 }
  0x9e   : > { %734 = vrot.lane.b32.xlu1 %v3874_v42, %s3551_s11 }
  0x9f   : > { %732 = vrot.lane.b32.xlu0 %v2811_v8, %s3551_s11  ;;  %v3881_v44 = vpop.permute.xlu2 %3148 }
  0xa0   : > { %5409 = vst [vmem:[#allocation10_spill] sm:$0xff] %v3881_v44  ;;  %v3883_v45 = vpop.permute.xlu1 %3098 }
  0xa1   : > { %v3885_v46 = vpop.permute.xlu0 %3093 }
  0xa2   : > { %5410 = vst [vmem:[#allocation11_spill] sm:$0xff] %v3885_v46 }
  0xa5   : > { %748 = vrot.lane.b32.xlu2 %v3888_v48, %s3553_s13 }
  0xa6   : > { %746 = vrot.lane.b32.xlu1 %v3891_v49, %s3553_s13 }
  0xa7   : > { %744 = vrot.lane.b32.xlu0 %v3894_v50, %s3553_s13  ;;  %v3902_v53 = vpop.permute.xlu2 %3163 }
  0xa8   : > { %5414 = vst [vmem:[#allocation15_spill] sm:$0xff] %v3902_v53  ;;  %v3904_v55 = vpop.permute.xlu1 %3113 }
  0xa9   : > { %5415 = vst [vmem:[#allocation16_spill] sm:$0xff] %v3904_v55  ;;  %v3906_v56 = vpop.permute.xlu0 %3108 }
  0xad   : > { %758 = vrot.lane.b32.xlu2 %v3909_v57, %s3555_s15 }
  0xae   : > { %756 = vrot.lane.b32.xlu1 %v3822_v26, %s3555_s15 }
  0xaf   : > { %754 = vrot.lane.b32.xlu0 %v3825_v27, %s3555_s15  ;;  %v3917_v59 = vpop.permute.xlu2 %3178 }
  0xb0   : > { %5416 = vst [vmem:[#allocation17_spill] sm:$0xff] %v3917_v59  ;;  %v3919_v61 = vpop.permute.xlu1 %3128 }
  0xb1   : > { %5417 = vst [vmem:[#allocation18_spill] sm:$0xff] %v3919_v61  ;;  %v3921_v62 = vpop.permute.xlu0 %3123 }
  0xb2   : > { %5418 = vst [vmem:[#allocation19_spill] sm:$0xff] %v3921_v62 }
  0xb7   : > { %v3923_v63 = vpop.permute.xlu2 %3193 }
  0xb8   : > { %5419 = vst [vmem:[#allocation20_spill] sm:$0xff] %v3923_v63  ;;  %v3925_v0 = vpop.permute.xlu1 %3143 }
  0xb9   : > { %5420 = vst [vmem:[#allocation21_spill] sm:$0xff] %v3925_v0  ;;  %v3927_v2 = vpop.permute.xlu0 %3138 }
  0xba   : > { %5421 = vst [vmem:[#allocation22_spill] sm:$0xff] %v3927_v2 }
  0xbf   : > { %v655_v4 = vpop.permute.xlu2 %654 }
  0xc0   : > { %v3929_v5 = vpop.permute.xlu1 %3158 }
  0xc1   : > { %5422 = vst [vmem:[#allocation23_spill] sm:$0xff] %v3929_v5  ;;  %v3931_v6 = vpop.permute.xlu0 %3153 }
  0xc2   : > { %5423 = vst [vmem:[#allocation24_spill] sm:$0xff] %v3931_v6 }
  0xc7   : > { %v667_v8 = vpop.permute.xlu2 %666 }
  0xc8   : > { %v3933_v12 = vpop.permute.xlu1 %3173 }
  0xc9   : > { %5424 = vst [vmem:[#allocation25_spill] sm:$0xff] %v3933_v12  ;;  %v3935_v13 = vpop.permute.xlu0 %3168  ;;  %v765_v12 = vsel %vm589_vm0, %v3942_v28, %v655_v4 }
  0xca   : > { %5425 = vst [vmem:[#allocation26_spill] sm:$0xff] %v3935_v13  ;;  %v3560_v13 = vmov 0  }
  0xcb   : > { %3199 = vset.pattern.permute.xlu2 %v3560_v13  ;;  %3198 = vset.pattern.permute.xlu1 %v3560_v13 }
  0xcc   : > { %3197 = vset.pattern.permute.xlu0 %v3560_v13 }
  0xcf   : > { %v679_v14 = vpop.permute.xlu2 %678 }
  0xd0   : > { %v3937_v48 = vpop.permute.xlu1 %3188 }
  0xd1   : > { %5426 = vst [vmem:[#allocation27_spill] sm:$0xff] %v3937_v48  ;;  %v3939_v50 = vpop.permute.xlu0 %3183  ;;  %v768_v48 = vsel %vm593_vm1, %v765_v12, %v667_v8 }
  0xd2   : > { %5427 = vst [vmem:[#allocation28_spill] sm:$0xff] %v3939_v50  ;;  %v771_v5 = vsel %vm5399_vm2, %v768_v48, %v679_v14 }
  0xd7   : > { %v691_v49 = vpop.permute.xlu2 %690 }
  0xd8   : > { %v653_v63 = vpop.permute.xlu1 %652  ;;  %v774_v22 = vsel %vm5380_vm3, %v771_v5, %v691_v49 }
  0xd9   : > { %v651_v53 = vpop.permute.xlu0 %650 }
  0xdf   : > { %v703_v0 = vpop.permute.xlu2 %702 }
  0xe0   : > { %v665_v38 = vpop.permute.xlu1 %664  ;;  %v777_v4 = vsel %vm5381_vm4, %v774_v22, %v703_v0 }
  0xe1   : > { %v663_v62 = vpop.permute.xlu0 %662 }
  0xe7   : > { %v715_v55 = vpop.permute.xlu2 %714 }
  0xe8   : > { %v677_v59 = vpop.permute.xlu1 %676  ;;  %v780_v8 = vsel %vm609_vm5, %v777_v4, %v715_v55 }
  0xe9   : > { %v675_v6 = vpop.permute.xlu0 %674 }
  0xef   : > { %v725_v46 = vpop.permute.xlu2 %724 }
  0xf0   : > { %v689_v50 = vpop.permute.xlu1 %688  ;;  %v783_v12 = vsel %vm613_vm6, %v780_v8, %v725_v46  ;;  %v341_v46 = vld [vmem:[%s5341_s3 + $0x10] sm:$0xff] }
  0xf1   : > { %v687_v39 = vpop.permute.xlu0 %686 }
  0xf7   : > { %v737_v44 = vpop.permute.xlu2 %736 }
  0xf8   : > { %v701_v19 = vpop.permute.xlu1 %700  ;;  %v786_v13 = vsel %vm617_vm7, %v783_v12, %v737_v44  ;;  %v2742_v44 = vld [vmem:[%s3621_s28 + $0x3d] sm:$0xff] }
  0xf9   : > { %v699_v34 = vpop.permute.xlu0 %698  ;;  %v764_v8 = vsel %vm589_vm0, %v2742_v44, %v653_v63 }
  0xff   : > { %v749_v2 = vpop.permute.xlu2 %748 }
 0x100   : > { %v713_v61 = vpop.permute.xlu1 %712  ;;  %v789_v49 = vsel %vm621_vm8, %v786_v13, %v749_v2  ;;  %v3205_v2 = vpack.i.bf16 %v3730_v60, %v3707_v51  ;;  %v763_v13 = vsel %vm589_vm0, %v3682_v37, %v651_v53 }
 0x101   : > { %v711_v48 = vpop.permute.xlu0 %710 }
 0x107   : > { %v759_v5 = vpop.permute.xlu2 %758 }
 0x108   : > { %v723_v22 = vpop.permute.xlu1 %722  ;;  %v792_v0 = vsel %vm625_vm9, %v789_v49, %v759_v5  ;;  %v767_v49 = vsel %vm593_vm1, %v764_v8, %v665_v38  ;;  %v3220_v38 = vpack.i.bf16 %v3762_v10, %v3690_v43  ;;  %v3235_v10 = vpack.i.bf16 %v3776_v15, %v3725_v58  ;;  %v4140_v8 = vld [vmem:[%s5339_s1 + $0x30] sm:$0xff] }
 0x109   : > { %v721_v14 = vpop.permute.xlu0 %720  ;;  %800 = vrot.lane.b32.xlu2 %v792_v0, %s5396_s20  ;;  %v766_v0 = vsel %vm593_vm1, %v763_v13, %v663_v62  ;;  %v770_v35 = vsel %vm5399_vm2, %v767_v49, %v677_v59  ;;  %v3210_v15 = vpack.i.bf16 %v3725_v58, %v3699_v47  ;;  %v3230_v47 = vpack.i.bf16 %v3942_v28, %v2742_v44  ;;  %v4026_v58 = vld [vmem:[%s3621_s28 + $0x80] sm:$0xff]  ;;  %v4091_v28 = vld [vmem:[%s3621_s28 + $0x78] sm:$0xff]  ;;  %v4160_v49 = vld [vmem:[%s5339_s1 + $0x28] sm:$0xff] }
 0x10a   : > { %v773_v33 = vsel %vm5380_vm3, %v770_v35, %v689_v50  ;;  %v4131_v44 = vld [vmem:[%s3621_s28 + $0x87] sm:$0xff] }
 0x10b   : > { %v776_v60 = vsel %vm5381_vm4, %v773_v33, %v701_v19 }
 0x10c   : > { %v779_v37 = vsel %vm609_vm5, %v776_v60, %v713_v61  ;;  %v340_v61 = vld [vmem:[%s5341_s3 + $0x8] sm:$0xff] }
 0x10d   : > { %v782_v62 = vsel %vm613_vm6, %v779_v37, %v723_v22  ;;  %v3250_v22 = vpack.i.bf16 %v3809_v23, %v3812_v24  ;;  %v3225_v23 = vpack.i.bf16 %v3754_v7, %v3759_v9  ;;  %v4037_v7 = vld [vmem:[%s3621_s28 + $0x81] sm:$0xff]  ;;  %v3270_v9 = vpack.i.bf16 %v3871_v41, %v3874_v42  ;;  %v4186_v60 = vld [vmem:[%s3621_s28 + $0x8a] sm:$0xff] }
 0x10e   : > { %v4077_v24 = vld [vmem:[%s5339_s1 + $0x60] sm:$0xff]  ;;  %v4115_v41 = vld [vmem:[%s5339_s1 + $0x48] sm:$0xff] }
 0x10f   : > { %v4122_v42 = vld [vmem:[%s5339_s1 + $0x40] sm:$0xff]  ;;  %v4202_v37 = vld [vmem:[%s5339_s1 + $0x8] sm:$0xff] }
 0x110   : > { %v735_v55 = vpop.permute.xlu1 %734 }
 0x111   : > { %v733_v4 = vpop.permute.xlu0 %732  ;;  %891 = vperm.xlu2 %3199, %v341_v46   ;;  %v769_v46 = vsel %vm5399_vm2, %v766_v0, %v675_v6  ;;  %v785_v6 = vsel %vm617_vm7, %v782_v62, %v735_v55  ;;  %v3265_v55 = vpack.i.bf16 %v3856_v36, %v3785_v16  ;;  %v4172_v0 = vld [vmem:[%s5339_s1 + $0x18] sm:$0xff]  ;;  %v4222_v62 = vld [vmem:[%s3621_s28 + $0x8c] sm:$0xff] }
 0x112   : > { %v772_v51 = vsel %vm5380_vm3, %v769_v46, %v687_v39  ;;  %v4177_v46 = vld [vmem:[%s3621_s28 + $0x7a] sm:$0xff] }
 0x113   : > { %v775_v63 = vsel %vm5381_vm4, %v772_v51, %v699_v34  ;;  %v4182_v51 = vld [vmem:[%s5339_s1 + $0x10] sm:$0xff] }
 0x114   : > { %v778_v53 = vsel %vm609_vm5, %v775_v63, %v711_v48  ;;  %v339_v48 = vld [vmem:[%s5341_s3] sm:$0xff] }
 0x115   : > { %v781_v59 = vsel %vm613_vm6, %v778_v53, %v721_v14  ;;  %v3200_v14 = vpack.i.bf16 %v3711_v52, %v3715_v54  ;;  %v3240_v52 = vpack.i.bf16 %v3785_v16, %v3765_v11  ;;  %v3245_v54 = vpack.i.bf16 %v3796_v20, %v3799_v21  ;;  %v4048_v11 = vld [vmem:[%s5339_s1 + $0x78] sm:$0xff]  ;;  %v4053_v16 = vld [vmem:[%s5339_s1 + $0x70] sm:$0xff]  ;;  %v4058_v20 = vld [vmem:[%s3621_s28 + $0x82] sm:$0xff] }
 0x116   : > { %v784_v35 = vsel %vm617_vm7, %v781_v59, %v733_v4  ;;  %v3215_v4 = vpack.i.bf16 %v3741_v1, %v3745_v3  ;;  %v3255_v1 = vpack.i.bf16 %v3822_v26, %v3825_v27  ;;  %v3260_v3 = vpack.i.bf16 %v3839_v31, %v3842_v32  ;;  %823 = vmatpush.msra.mxu0 %v4048_v11  ;;  %v4071_v21 = vld [vmem:[%s5339_s1 + $0x68] sm:$0xff]  ;;  %v4096_v31 = vld [vmem:[%s5339_s1 + $0x50] sm:$0xff]  ;;  %v4216_v53 = vld [vmem:[%s5339_s1] sm:$0xff] }
 0x117   : > { %1380 = vmatpush.msra.mxu2 %v4048_v11  ;;  %v4099_v32 = vld [vmem:[%s3621_s28 + $0x88] sm:$0xff]  ;;  %v3050_v59 = vunpack.i.l.bf16 %v3836_v30 }
 0x118   : > { %v747_v12 = vpop.permute.xlu1 %746  ;;  %824 = vmatpush.msra.mxu0 %v4053_v16 }
 0x119   : > { %v745_v5 = vpop.permute.xlu0 %744  ;;  %3206 = vrot.lane.b32.xlu2 %v3205_v2, %s3546_s30  ;;  %v788_v39 = vsel %vm621_vm8, %v785_v6, %v747_v12  ;;  %1381 = vmatpush.msra.mxu2 %v4053_v16  ;;  %v4135_v2 = vld [vmem:[%s3621_s28 + $0x79] sm:$0xff]  ;;  %v4144_v12 = vld [vmem:[%s3621_s28 + $0x89] sm:$0xff] }
 0x11a   : > { %v787_v33 = vsel %vm621_vm8, %v784_v35, %v745_v5  ;;  %825 = vmatpush.msra.mxu0 %v4071_v21  ;;  %v4167_v5 = vld [vmem:[%s5339_s1 + $0x20] sm:$0xff] }
 0x11b   : > { %1382 = vmatpush.msra.mxu2 %v4071_v21  ;;  %v4228_v6 = vld [vmem:[%s3621_s28 + $0x7e] sm:$0xff] }
 0x11c   : > { %826 = vmatpush.msra.mxu0 %v4077_v24  ;;  %v342_v35 = vld [vmem:[%s3621_s28] sm:$0xff] }
 0x11d   : > { %1383 = vmatpush.msra.mxu2 %v4077_v24 }
 0x120   : > { %v757_v19 = vpop.permute.xlu1 %756 }
 0x121   : > { %v755_v34 = vpop.permute.xlu0 %754  ;;  %v791_v50 = vsel %vm625_vm9, %v788_v39, %v757_v19  ;;  %3221 = vrot.lane.b32.xlu2 %v3220_v38, %s3548_s8  ;;  %v4207_v38 = vld [vmem:[%s5339_s1 + $0x80] sm:$0x7f]  ;;  %v4235_v39 = vld [vmem:[%s3621_s28 + $0x8e] sm:$0xff]  ;;  %v3060_v19 = vunpack.i.l.bf16 %v3834_v29 }
 0x122   : > { %798 = vrot.lane.b32.xlu1 %v791_v50, %s5396_s20  ;;  %v790_v43 = vsel %vm625_vm9, %v787_v33, %v755_v34  ;;  %2768 = vmatpush.msk.msra.mxu1 %vm819_vm10, %v4207_v38  ;;  %v590_v33 = vsel %vm589_vm0, %v342_v35, %v3050_v59  ;;  %v3070_v50 = vunpack.i.l.bf16 %v3793_v17  ;;  %v4296_v59 = vld [vmem:[%s3621_s28 + $0x90] sm:$0xff]  ;;  %v3091_v35 = vunpack.i.h.bf16 %v3819_v25 }
 0x123   : > { %796 = vrot.lane.b32.xlu0 %v790_v43, %s5396_s20  ;;  %3002 = vmatpush.msk.msra.mxu3 %vm819_vm10, %v4207_v38  ;;  %v594_v43 = vsel %vm593_vm1, %v590_v33, %v3060_v19 }
 0x124   : > { %1922 = vmatpush.msrb.mxu1 %v4048_v11 }
 0x125   : > { %2917 = vmatpush.msk.msrb.mxu3 %vm819_vm10, %v4207_v38 }
 0x126   : > { %1923 = vmatpush.msrb.mxu1 %v4053_v16 }
 0x128   : > { %1924 = vmatpush.msrb.mxu1 %v4071_v21  ;;  %v5431_v21 = vld [vmem:[#allocation7_spill] sm:$0xff] }
 0x129   : > { %3236 = vrot.lane.b32.xlu2 %v3235_v10, %s3551_s11  ;;  %v3080_v10 = vunpack.i.l.bf16 %v3868_v40 }
 0x12a   : > { %886 = vperm.xlu1 %3198, %v340_v61   ;;  %1925 = vmatpush.msrb.mxu1 %v4077_v24  ;;  %v2838_v61 = vld [vmem:[%s3621_s28 + $0x8d] sm:$0xff]  ;;  %v3055_v24 = vunpack.i.l.bf16 %v5431_v21 }
 0x12b   : > { %881 = vperm.xlu0 %3197, %v339_v48   ;;  %v3051_v48 = vunpack.i.h.bf16 %v3836_v30 }
 0x12d   : > { %v591_v30 = vsel %vm589_vm0, %v3650_v18, %v3051_v48  ;;  %v3081_v18 = vunpack.i.h.bf16 %v3868_v40  ;;  %v3111_v48 = vunpack.i.h.bf16 %v3906_v56 }
 0x131   : > { %3251 = vrot.lane.b32.xlu2 %v3250_v22, %s5376_s14  ;;  %v4261_v22 = vld [vmem:[%s3621_s28 + $0x7f] sm:$0xff]  ;;  %s3005_s14 = smul.u32 96, %s5587_s21 }
 0x132   : > { %3201 = vrot.lane.b32.xlu1 %v3200_v14, %s3547_s7  ;;  %v4264_v14 = vld [vmem:[%s3621_s28 + $0x8f] sm:$0xff] }
 0x133   : > { %3211 = vrot.lane.b32.xlu0 %v3210_v15, %s3545_s29  ;;  %v3090_v15 = vunpack.i.l.bf16 %v3819_v25  ;;  %s4501_s26 = scalar_lea.vmem %s5342_s4, %s3005_s14  ;;  %s5474_s14 = smov 70  }
 0x139   : > { %3266 = vrot.lane.b32.xlu2 %v3265_v55, %s5374_s17  ;;  %v598_v55 = vsel %vm5399_vm2, %v594_v43, %v3070_v50  ;;  %v3101_v50 = vunpack.i.h.bf16 %v3883_v45  ;;  %s5472_s17 = smov 65  }
 0x13a   : > { %3216 = vrot.lane.b32.xlu1 %v3215_v4, %s3549_s9  ;;  %v3061_v4 = vunpack.i.h.bf16 %v3834_v29  ;;  %v3071_v29 = vunpack.i.h.bf16 %v3793_v17 }
 0x13b   : > { %3226 = vrot.lane.b32.xlu0 %v3225_v23, %s3550_s10  ;;  %v602_v23 = vsel %vm5380_vm3, %v598_v55, %v3080_v10  ;;  %v5436_v10 = vld [vmem:[#allocation10_spill] sm:$0xff]  ;;  %v5438_v55 = vld [vmem:[#allocation3_spill] sm:$0xff] }
 0x141   : > { %1218 = vrot.lane.b32.xlu2 %v3822_v26, %s3547_s7  ;;  %v4083_v26 = vld [vmem:[%s5339_s1 + $0x58] sm:$0xff] }
 0x142   : > { %3231 = vrot.lane.b32.xlu1 %v3230_v47, %s3552_s12  ;;  %827 = vmatpush.msra.mxu0 %v4083_v26  ;;  %v3100_v47 = vunpack.i.l.bf16 %v3883_v45 }
 0x143   : > { %3241 = vrot.lane.b32.xlu0 %v3240_v52, %s3553_s13  ;;  %1384 = vmatpush.msra.mxu2 %v4083_v26  ;;  %v3110_v52 = vunpack.i.l.bf16 %v3906_v56 }
 0x144   : > { %828 = vmatpush.msra.mxu0 %v4096_v31  ;;  %1926 = vmatpush.msrb.mxu1 %v4083_v26 }
 0x145   : > { %1385 = vmatpush.msra.mxu2 %v4096_v31 }
 0x146   : > { %829 = vmatpush.msra.mxu0 %v4115_v41  ;;  %1927 = vmatpush.msrb.mxu1 %v4096_v31  ;;  %v5432_v31 = vld [vmem:[#allocation18_spill] sm:$0xff] }
 0x147   : > { %1386 = vmatpush.msra.mxu2 %v4115_v41 }
 0x148   : > { %830 = vmatpush.msra.mxu0 %v4122_v42  ;;  %1928 = vmatpush.msrb.mxu1 %v4115_v41  ;;  %v3130_v41 = vunpack.i.l.bf16 %v5432_v31 }
 0x149   : > { %1230 = vrot.lane.b32.xlu2 %v4026_v58, %s3546_s30  ;;  %1387 = vmatpush.msra.mxu2 %v4122_v42 }
 0x14a   : > { %3246 = vrot.lane.b32.xlu1 %v3245_v54, %s3555_s15  ;;  %1929 = vmatpush.msrb.mxu1 %v4122_v42  ;;  %v5433_v42 = vld [vmem:[#allocation22_spill] sm:$0xff] }
 0x14b   : > { %3256 = vrot.lane.b32.xlu0 %v3255_v1, %s5395_s16  ;;  %v606_v1 = vsel %vm5381_vm4, %v602_v23, %v3090_v15  ;;  %v3140_v17 = vunpack.i.l.bf16 %v5433_v42 }
 0x14c   : > { %v610_v16 = vsel %vm609_vm5, %v606_v1, %v3100_v47 }
 0x14d   : > { %v614_v26 = vsel %vm613_vm6, %v610_v16, %v3110_v52  ;;  %v5440_v52 = vld [vmem:[#allocation26_spill] sm:$0xff]  ;;  %v5442_v16 = vld [vmem:[#allocation11_spill] sm:$0xff] }
 0x151   : > { %1242 = vrot.lane.b32.xlu2 %v4037_v7, %s3545_s29 }
 0x152   : > { %3261 = vrot.lane.b32.xlu1 %v3260_v3, %s5378_s18  ;;  %v595_v3 = vsel %vm593_vm1, %v591_v30, %v3061_v4  ;;  %v3075_v4 = vunpack.i.l.bf16 %v5438_v55  ;;  %s5520_s18 = smov 80  }
 0x153   : > { %3271 = vrot.lane.b32.xlu0 %v3270_v9, %s5428_s19  ;;  %v5430_v9 = vld [vmem:[#allocation5_spill] sm:$0xff]  ;;  %v599_v40 = vsel %vm5399_vm2, %v595_v3, %v3071_v29  ;;  %v3170_v29 = vunpack.i.l.bf16 %v5440_v52 }
 0x154   : > { %v3120_v11 = vunpack.i.l.bf16 %v5430_v9  ;;  %v603_v33 = vsel %vm5380_vm3, %v599_v40, %v3081_v18  ;;  %v3121_v30 = vunpack.i.h.bf16 %v5430_v9  ;;  %v5441_v3 = vld [vmem:[#allocation9_spill] sm:$0xff]  ;;  %v3131_v9 = vunpack.i.h.bf16 %v5432_v31 }
 0x155   : > { %v607_v56 = vsel %vm5381_vm4, %v603_v33, %v3091_v35  ;;  %v5444_v40 = vld [vmem:[#allocation17_spill] sm:$0xff]  ;;  %v3141_v33 = vunpack.i.h.bf16 %v5433_v42  ;;  %v5446_v42 = vld [vmem:[#allocation16_spill] sm:$0xff] }
 0x156   : > { %v618_v43 = vsel %vm617_vm7, %v614_v26, %v3120_v11  ;;  %v3085_v11 = vunpack.i.l.bf16 %v5441_v3  ;;  %v611_v18 = vsel %vm609_vm5, %v607_v56, %v3101_v50 }
 0x157   : > { %v622_v15 = vsel %vm621_vm8, %v618_v43, %v3130_v41  ;;  %v4335_v41 = vld [vmem:[%s3621_s28 + $0x84] sm:$0xff]  ;;  %v4342_v43 = vld [vmem:[%s3621_s28 + $0x94] sm:$0xff] }
 0x158   : > { %v626_v23 = vsel %vm625_vm9, %v622_v15, %v3140_v17  ;;  %v5443_v17 = vld [vmem:[#allocation4_spill] sm:$0xff] }
 0x159   : > { %1254 = vrot.lane.b32.xlu2 %v4058_v20, %s3549_s9  ;;  %v3105_v35 = vunpack.i.l.bf16 %v5443_v17 }
 0x15a   : > { %1216 = vrot.lane.b32.xlu1 %v3825_v27, %s3547_s7  ;;  %v4086_v27 = vld [vmem:[%s3621_s28 + $0x86] sm:$0xff] }
 0x15b   : > { %1220 = vrot.lane.b32.xlu0 %v3909_v57, %s3547_s7  ;;  %v4127_v57 = vld [vmem:[%s5339_s1 + $0x38] sm:$0xff] }
 0x15c   : > { %831 = vmatpush.msra.mxu0 %v4127_v57  ;;  %1388 = vmatpush.msra.mxu2 %v4127_v57 }
 0x15d   : > { %1930 = vmatpush.msrb.mxu1 %v4127_v57  ;;  %v5434_v57 = vld [vmem:[#allocation6_spill] sm:$0xff] }
 0x15e   : > { %832 = vmatpush.msra.mxu0 %v4140_v8  ;;  %1389 = vmatpush.msra.mxu2 %v4140_v8  ;;  %v3065_v19 = vunpack.i.l.bf16 %v5434_v57 }
 0x15f   : > { %1931 = vmatpush.msrb.mxu1 %v4140_v8  ;;  %v5435_v8 = vld [vmem:[#allocation2_spill] sm:$0xff] }
 0x160   : > { %833 = vmatpush.msra.mxu0 %v4160_v49  ;;  %1390 = vmatpush.msra.mxu2 %v4160_v49  ;;  %v592_v25 = vsel %vm589_vm0, %v5435_v8, %v3055_v24  ;;  %v3095_v24 = vunpack.i.l.bf16 %v5442_v16  ;;  %v5445_v8 = vld [vmem:[#allocation27_spill] sm:$0xff] }
 0x161   : > { %1266 = vrot.lane.b32.xlu2 %v4086_v27, %s3548_s8  ;;  %1932 = vmatpush.msrb.mxu1 %v4160_v49  ;;  %v5439_v49 = vld [vmem:[#allocation23_spill] sm:$0xff]  ;;  %v596_v1 = vsel %vm593_vm1, %v592_v25, %v3065_v19  ;;  %v3180_v19 = vunpack.i.l.bf16 %v5444_v40  ;;  %v3190_v31 = vunpack.i.l.bf16 %v5445_v8 }
 0x162   : > { %1228 = vrot.lane.b32.xlu1 %v4091_v28, %s3546_s30  ;;  %834 = vmatpush.msra.mxu0 %v4167_v5  ;;  %v3160_v47 = vunpack.i.l.bf16 %v5439_v49 }
 0x163   : > { %1232 = vrot.lane.b32.xlu0 %v4099_v32, %s3546_s30  ;;  %v4110_v36 = vpop.permute.xlu2 %800  ;;  %1391 = vmatpush.msra.mxu2 %v4167_v5 }
 0x164   : > { %835 = vmatpush.msra.mxu0 %v4172_v0  ;;  %1933 = vmatpush.msrb.mxu1 %v4167_v5  ;;  %v615_v5 = vsel %vm613_vm6, %v611_v18, %v3111_v48  ;;  %v3151_v48 = vunpack.i.h.bf16 %v5436_v10 }
 0x165   : > { %1392 = vmatpush.msra.mxu2 %v4172_v0  ;;  %v619_v15 = vsel %vm617_vm7, %v615_v5, %v3121_v30 }
 0x166   : > { %836 = vmatpush.msra.mxu0 %v4182_v51  ;;  %1934 = vmatpush.msrb.mxu1 %v4172_v0  ;;  %v600_v0 = vsel %vm5399_vm2, %v596_v1, %v3075_v4  ;;  %v3115_v4 = vunpack.i.l.bf16 %v5446_v42 }
 0x167   : > { %1393 = vmatpush.msra.mxu2 %v4182_v51 }
 0x168   : > { %837 = vmatpush.msra.mxu0 %v4202_v37  ;;  %1935 = vmatpush.msrb.mxu1 %v4182_v51 }
 0x169   : > { %1278 = vrot.lane.b32.xlu2 %v4131_v44, %s3550_s10  ;;  %1394 = vmatpush.msra.mxu2 %v4202_v37 }
 0x16a   : > { %1240 = vrot.lane.b32.xlu1 %v4135_v2, %s3545_s29  ;;  %838 = vmatpush.msra.mxu0 %v4216_v53 }
 0x16b   : > { %1244 = vrot.lane.b32.xlu0 %v4144_v12, %s3545_s29  ;;  %v4155_v13 = vpop.permute.xlu2 %891  ;;  %1395 = vmatpush.msra.mxu2 %v4216_v53 }
 0x16c   : > { %2993 = vmatpush.msk.msrb.mxu0 %vm819_vm10, %v4207_v38  ;;  %1936 = vmatpush.msrb.mxu1 %v4202_v37 }
 0x16d   : > { %2841 = vmatpush.msk.msrb.mxu2 %vm819_vm10, %v4207_v38 }
 0x16e   : > { %1937 = vmatpush.msrb.mxu1 %v4216_v53  ;;  %v4375_v53 = vld [vmem:[%s3621_s28 + $0x85] sm:$0xff] }
 0x171   : > { %1288 = vrot.lane.b32.xlu2 %v4099_v32, %s3552_s12 }
 0x172   : > { %1252 = vrot.lane.b32.xlu1 %v4177_v46, %s3549_s9 }
 0x173   : > { %1256 = vrot.lane.b32.xlu0 %v4186_v60, %s3549_s9  ;;  %v4197_v63 = vpop.permute.xlu2 %3206 }
 0x179   : > { %1300 = vrot.lane.b32.xlu2 %v4222_v62, %s3551_s11 }
 0x17a   : > { %1264 = vrot.lane.b32.xlu1 %v4228_v6, %s3548_s8 }
 0x17b   : > { %1268 = vrot.lane.b32.xlu0 %v4235_v39, %s3548_s8  ;;  %v4251_v34 = vpop.permute.xlu2 %3221 }
 0x181   : > { %1312 = vrot.lane.b32.xlu2 %v2838_v61, %s3553_s13  ;;  %v3150_v61 = vunpack.i.l.bf16 %v5436_v10  ;;  %v5448_v10 = vld [vmem:[#allocation19_spill] sm:$0xff] }
 0x182   : > { %1276 = vrot.lane.b32.xlu1 %v4261_v22, %s3550_s10  ;;  %v3125_v30 = vunpack.i.l.bf16 %v5448_v10  ;;  %v5467_v10 = vld [vmem:[#allocation12_spill] sm:$0xff] }
 0x183   : > { %1280 = vrot.lane.b32.xlu0 %v4264_v14, %s3550_s10  ;;  %v4281_v54 = vpop.permute.xlu2 %3236  ;;  %v630_v26 = vsel %vm629_vm11, %v626_v23, %v3150_v61  ;;  %v604_v61 = vsel %vm5380_vm3, %v600_v0, %v3085_v11  ;;  %v623_v23 = vsel %vm621_vm8, %v619_v15, %v3131_v9  ;;  %vm5385_vm3 = vcmask 56320  }
 0x184   : > { %5429 = vst [vmem:[#allocation29_spill] sm:$0xff] %v4281_v54  ;;  %v634_v50 = vsel %vm633_vm12, %v630_v26, %v3160_v47  ;;  %v608_v51 = vsel %vm5381_vm4, %v604_v61, %v3095_v24  ;;  %v627_v56 = vsel %vm625_vm9, %v623_v23, %v3141_v33  ;;  %v3171_v11 = vunpack.i.h.bf16 %v5440_v52  ;;  %v5449_v26 = vld [vmem:[#allocation8_spill] sm:$0xff] }
 0x185   : > { %v638_v25 = vsel %vm637_vm13, %v634_v50, %v3170_v29  ;;  %v3161_v29 = vunpack.i.h.bf16 %v5439_v49  ;;  %vm5393_vm4 = vcmask 654336   ;;  %v612_v5 = vsel %vm609_vm5, %v608_v51, %v3105_v35  ;;  %v5450_v50 = vld [vmem:[#allocation21_spill] sm:$0xff]  ;;  %v5451_v61 = vld [vmem:[#allocation24_spill] sm:$0xff] }
 0x186   : > { %v642_v1 = vsel %vm5400_vm14, %v638_v25, %v3180_v19  ;;  %v3135_v49 = vunpack.i.l.bf16 %v5449_v26  ;;  %v616_v33 = vsel %vm613_vm6, %v612_v5, %v3115_v4  ;;  %v631_v19 = vsel %vm629_vm11, %v627_v56, %v3151_v48  ;;  %v2839_v25 = vld [vmem:[%s3621_s28 + $0x95] sm:$0xff]  ;;  %v5452_v4 = vld [vmem:[#allocation15_spill] sm:$0xff] }
 0x187   : > { %v646_v24 = vsel %vm5394_vm15, %v642_v1, %v3190_v31  ;;  %v620_v52 = vsel %vm617_vm7, %v616_v33, %v3125_v30  ;;  %v3181_v35 = vunpack.i.h.bf16 %v5444_v40  ;;  %v3145_v0 = vunpack.i.l.bf16 %v5450_v50  ;;  %v5453_v1 = vld [vmem:[#allocation25_spill] sm:$0xff]  ;;  %v5454_v5 = vld [vmem:[#allocation28_spill] sm:$0xff] }
 0x188   : > { %v635_v31 = vsel %vm633_vm12, %v631_v19, %v3161_v29  ;;  %v3155_v15 = vunpack.i.l.bf16 %v5451_v61  ;;  %v3191_v51 = vunpack.i.h.bf16 %v5445_v8  ;;  %v3165_v23 = vunpack.i.l.bf16 %v5452_v4  ;;  %v4405_v33 = vld [vmem:[%s3621_s28 + $0x96] sm:$0xff]  ;;  %v2865_v61 = vld [vmem:[%s3621_s28 + $0x64] sm:$0xff]  ;;  %v2869_v26 = vld [vmem:[%s3621_s28 + $0x6d] sm:$0xff] }
 0x189   : > { %1322 = vrot.lane.b32.xlu2 %v4235_v39, %s3555_s15  ;;  %v639_v48 = vsel %vm637_vm13, %v635_v31, %v3171_v11  ;;  %v3175_v11 = vunpack.i.l.bf16 %v5453_v1 }
 0x18a   : > { %1286 = vrot.lane.b32.xlu1 %v4026_v58, %s3552_s12  ;;  %v643_v29 = vsel %vm5400_vm14, %v639_v48, %v3181_v35 }
 0x18b   : > { %1290 = vrot.lane.b32.xlu0 %v4296_v59, %s3552_s12  ;;  %v4317_v45 = vpop.permute.xlu2 %3251 }
 0x18c   : > { %5437 = vst [vmem:[#allocation5_spill] sm:$0xff] %v4317_v45 }
 0x192   : > { %1298 = vrot.lane.b32.xlu1 %v4335_v41, %s3551_s11 }
 0x193   : > { %1302 = vrot.lane.b32.xlu0 %v4342_v43, %s3551_s11  ;;  %v4359_v47 = vpop.permute.xlu2 %3266 }
 0x194   : > { %5447 = vst [vmem:[#allocation7_spill] sm:$0xff] %v4359_v47  ;;  %v799_v37 = vpop.permute.xlu1 %798 }
 0x195   : > { %v797_v18 = vpop.permute.xlu0 %796 }
 0x196   : > { %2769 = vmatmul.msk.f32.vlgmr.msra.gmra.mxu1 %vm5385_vm3, %v797_v18  ;;  %v806_v9 = vsel %vm5393_vm4, %v646_v24, %v797_v18  ;;  %v647_v24 = vsel %vm5394_vm15, %v643_v29, %v3191_v51 }
 0x197   : > { %839 = vmatmul.f32.vlgmr.msra.gmra.mxu0 %v806_v9  ;;  %3003 = vmatpush.msk.msra.mxu1 %vm819_vm10, %v4207_v38  ;;  %v624_v38 = vsel %vm621_vm8, %v620_v52, %v3135_v49  ;;  %v3185_v9 = vunpack.i.l.bf16 %v5454_v5  ;;  %v807_v49 = vsel %vm5393_vm4, %v647_v24, %v799_v37  ;;  %v5455_v52 = vld [vmem:[#allocation20_spill] sm:$0xff]  ;;  %vm5464_vm10 = vcmask 162816  }
 0x198   : > { %v628_v30 = vsel %vm625_vm9, %v624_v38, %v3145_v0  ;;  %v3195_v35 = vunpack.i.l.bf16 %v5455_v52 }
 0x199   : > { %v632_v8 = vsel %vm629_vm11, %v628_v30, %v3155_v15 }
 0x19a   : > { %1310 = vrot.lane.b32.xlu1 %v4375_v53, %s3553_s13  ;;  %v636_v19 = vsel %vm633_vm12, %v632_v8, %v3165_v23 }
 0x19b   : > { %1314 = vrot.lane.b32.xlu0 %v2839_v25, %s3553_s13  ;;  %v1219_v40 = vpop.permute.xlu2 %1218  ;;  %v640_v0 = vsel %vm637_vm13, %v636_v19, %v3175_v11 }
 0x19c   : > { %v4393_v56 = vpop.permute.xlu1 %886  ;;  %v644_v31 = vsel %vm5400_vm14, %v640_v0, %v3185_v9  ;;  %v5463_v0 = vld [vmem:[#allocation13_spill] sm:$0xff] }
 0x19d   : > { %v4398_v18 = vpop.permute.xlu0 %881  ;;  %v648_v51 = vsel %vm5394_vm15, %v644_v31, %v3195_v35  ;;  %v1330_v31 = vsel %vm589_vm0, %v5463_v0, %v1219_v40 }
 0x19e   : > { %2770 = vmatmul.msk.f32.gmra.mxu1 %vm5385_vm3, %v799_v37  ;;  %v808_v48 = vsel %vm5393_vm4, %v648_v51, %v4110_v36  ;;  %vm5470_vm4 = vcmask 203776  }
 0x19f   : > { %842 = vmatmul.f32.gmra.mxu0 %v807_v49  ;;  %vm5471_vm15 = vmmov %vm5470_vm4 }
 0x1a2   : > { %1320 = vrot.lane.b32.xlu1 %v4086_v27, %s3555_s15 }
 0x1a3   : > { %1324 = vrot.lane.b32.xlu0 %v4405_v33, %s3555_s15  ;;  %v1231_v25 = vpop.permute.xlu2 %1230 }
 0x1a4   : > { %v4415_v15 = vpop.permute.xlu1 %3201 }
 0x1a5   : > { %v4417_v37 = vpop.permute.xlu0 %3211 }
 0x1a6   : > { %2771 = vmatmul.msk.f32.gmra.mxu1 %vm5385_vm3, %v4110_v36  ;;  %vm5465_vm3 = vcmask 203776  }
 0x1a7   : > { %845 = vmatmul.f32.gmra.mxu0 %v808_v48  ;;  %v1333_v48 = vsel %vm593_vm1, %v1330_v31, %v1231_v25 }
 0x1ab   : > { %v1243_v38 = vpop.permute.xlu2 %1242 }
 0x1ac   : > { %v4424_v23 = vpop.permute.xlu1 %3216  ;;  %v1336_v45 = vsel %vm5399_vm2, %v1333_v48, %v1243_v38 }
 0x1ad   : > { %v4426_v30 = vpop.permute.xlu0 %3226 }
 0x1ae   : > { %5456 = vst [vmem:[#allocation18_spill] sm:$0xff] %v4426_v30 }
 0x1b3   : > { %v1255_v29 = vpop.permute.xlu2 %1254 }
 0x1b4   : > { %v4428_v8 = vpop.permute.xlu1 %3231  ;;  %v1339_v5 = vsel %vm5464_vm10, %v1336_v45, %v1255_v29 }
 0x1b5   : > { %5457 = vst [vmem:[#allocation22_spill] sm:$0xff] %v4428_v8  ;;  %v4430_v11 = vpop.permute.xlu0 %3241  ;;  %v5466_v8 = vld [vmem:[#allocation14_spill] sm:$0xff] }
 0x1b6   : > { %5458 = vst [vmem:[#allocation6_spill] sm:$0xff] %v4430_v11  ;;  %v2864_v11 = vld [vmem:[%s3621_s28 + $0x5c] sm:$0xff] }
 0x1bb   : > { %v1267_v24 = vpop.permute.xlu2 %1266 }
 0x1bc   : > { %v4432_v9 = vpop.permute.xlu1 %3246  ;;  %v1342_v4 = vsel %vm5465_vm3, %v1339_v5, %v1267_v24  ;;  %vm5468_vm3 = vmmov %vm5464_vm10 }
 0x1bd   : > { %5459 = vst [vmem:[#allocation2_spill] sm:$0xff] %v4432_v9  ;;  %v4434_v49 = vpop.permute.xlu0 %3256  ;;  %vm5469_vm10 = vmmov %vm5468_vm3 }
 0x1be   : > { %5460 = vst [vmem:[#allocation10_spill] sm:$0xff] %v4434_v49 }
 0x1c3   : > { %v1279_v19 = vpop.permute.xlu2 %1278 }
 0x1c4   : > { %v4436_v35 = vpop.permute.xlu1 %3261 }
 0x1c5   : > { %5461 = vst [vmem:[#allocation3_spill] sm:$0xff] %v4436_v35  ;;  %v4438_v36 = vpop.permute.xlu0 %3271 }
 0x1c6   : > { %5462 = vst [vmem:[#allocation23_spill] sm:$0xff] %v4438_v36  ;;  %v1345_v36 = vsel %vm609_vm5, %v1342_v4, %v1279_v19  ;;  %v2853_v4 = vld [vmem:[%s3621_s28 + $0x61] sm:$0xff] }
 0x1c7   : > { %v3280_v24 = vpack.i.bf16 %v4135_v2, %v2853_v4 }
 0x1cb   : > { %v1289_v51 = vpop.permute.xlu2 %1288 }
 0x1cc   : > { %v1217_v47 = vpop.permute.xlu1 %1216  ;;  %v1348_v9 = vsel %vm613_vm6, %v1345_v36, %v1289_v51 }
 0x1cd   : > { %v1221_v52 = vpop.permute.xlu0 %1220 }
 0x1d3   : > { %v1301_v1 = vpop.permute.xlu2 %1300 }
 0x1d4   : > { %v1229_v49 = vpop.permute.xlu1 %1228  ;;  %v1351_v31 = vsel %vm617_vm7, %v1348_v9, %v1301_v1  ;;  %v2857_v1 = vld [vmem:[%s3621_s28 + $0x56] sm:$0xff]  ;;  %v4457_v9 = vld [vmem:[%s3621_s28 + $0x5e] sm:$0xff] }
 0x1d5   : > { %v1233_v35 = vpop.permute.xlu0 %1232  ;;  %v3295_v51 = vpack.i.bf16 %v4457_v9, %v2857_v1  ;;  %v3340_v1 = vpack.i.bf16 %v4375_v53, %v2869_v26 }
 0x1db   : > { %v1313_v40 = vpop.permute.xlu2 %1312 }
 0x1dc   : > { %v1241_v25 = vpop.permute.xlu1 %1240  ;;  %v1354_v38 = vsel %vm621_vm8, %v1351_v31, %v1313_v40 }
 0x1dd   : > { %v1245_v0 = vpop.permute.xlu0 %1244 }
 0x1e3   : > { %v1323_v45 = vpop.permute.xlu2 %1322 }
 0x1e4   : > { %v1253_v29 = vpop.permute.xlu1 %1252  ;;  %v1357_v48 = vsel %vm625_vm9, %v1354_v38, %v1323_v45  ;;  %v2862_v38 = vld [vmem:[%s3621_s28 + $0x67] sm:$0xff] }
 0x1e5   : > { %v1257_v5 = vpop.permute.xlu0 %1256  ;;  %1364 = vrot.lane.b32.xlu2 %v1357_v48, %s5396_s20  ;;  %v3310_v45 = vpack.i.bf16 %v4261_v22, %v2862_v38  ;;  %v1331_v38 = vsel %vm589_vm0, %v5467_v10, %v1221_v52 }
 0x1ec   : > { %v1265_v19 = vpop.permute.xlu1 %1264 }
 0x1ed   : > { %v1269_v36 = vpop.permute.xlu0 %1268  ;;  %3281 = vrot.lane.b32.xlu2 %v3280_v24, %s3547_s7  ;;  %v3325_v24 = vpack.i.bf16 %v2865_v61, %v2864_v11  ;;  %v1334_v61 = vsel %vm593_vm1, %v1331_v38, %v1233_v35  ;;  %v2854_v38 = vld [vmem:[%s3621_s28 + $0x52] sm:$0xff] }
 0x1f4   : > { %v1277_v40 = vpop.permute.xlu1 %1276 }
 0x1f5   : > { %v1281_v31 = vpop.permute.xlu0 %1280  ;;  %3296 = vrot.lane.b32.xlu2 %v3295_v51, %s3545_s29  ;;  %v1329_v51 = vsel %vm589_vm0, %v5466_v8, %v1217_v47  ;;  %v3490_v8 = vld [vmem:[%s5340_s2] ss:$0 sm:$0xff] }
 0x1fc   : > { %v1287_v48 = vpop.permute.xlu1 %1286 }
 0x1fd   : > { %v1291_v4 = vpop.permute.xlu0 %1290  ;;  %3311 = vrot.lane.b32.xlu2 %v3310_v45, %s3549_s9  ;;  %v1332_v45 = vsel %vm593_vm1, %v1329_v51, %v1229_v49  ;;  %v3355_v49 = vpack.i.bf16 %v4026_v58, %v4091_v28  ;;  %v2852_v51 = vld [vmem:[%s3621_s28 + $0x59] sm:$0xff] }
 0x1fe   : > { %v1335_v11 = vsel %vm5399_vm2, %v1332_v45, %v1241_v25  ;;  %v2855_v45 = vld [vmem:[%s3621_s28 + $0x5a] sm:$0xff] }
 0x1ff   : > { %v1338_v26 = vsel %vm5468_vm3, %v1335_v11, %v1253_v29 }
 0x200   : > { %v1341_v53 = vsel %vm5470_vm4, %v1338_v26, %v1265_v19  ;;  %vm5398_vm4 = vcmask 523264  }
 0x201   : > { %v1344_v52 = vsel %vm609_vm5, %v1341_v53, %v1277_v40 }
 0x202   : > { %v1347_v25 = vsel %vm613_vm6, %v1344_v52, %v1287_v48 }
 0x204   : > { %v1299_v50 = vpop.permute.xlu1 %1298 }
 0x205   : > { %v1303_v54 = vpop.permute.xlu0 %1302  ;;  %3326 = vrot.lane.b32.xlu2 %v3325_v24, %s3550_s10  ;;  %v1337_v24 = vsel %vm5399_vm2, %v1334_v61, %v1245_v0  ;;  %v1350_v29 = vsel %vm617_vm7, %v1347_v25, %v1299_v50  ;;  %v4506_v50 = vld [vmem:[%s3621_s28 + $0xa1] sm:$0xff] }
 0x206   : > { %v1340_v47 = vsel %vm5469_vm10, %v1337_v24, %v1257_v5  ;;  %v3370_v61 = vpack.i.bf16 %v4506_v50, %v4144_v12  ;;  %v3285_v24 = vpack.i.bf16 %v2855_v45, %v2854_v38  ;;  %v2861_v38 = vld [vmem:[%s3621_s28 + $0x5f] sm:$0xff]  ;;  %vm5476_vm10 = vcmask 203776  }
 0x207   : > { %v1343_v10 = vsel %vm5471_vm15, %v1340_v47, %v1269_v36  ;;  %v4543_v45 = vld [vmem:[%s3621_s28 + $0x58] sm:$0xff]  ;;  %vm5475_vm15 = vmmov %vm5468_vm3 }
 0x208   : > { %v1346_v35 = vsel %vm609_vm5, %v1343_v10, %v1281_v31 }
 0x209   : > { %v1349_v0 = vsel %vm613_vm6, %v1346_v35, %v1291_v4  ;;  %v2859_v35 = vld [vmem:[%s3621_s28 + $0x66] sm:$0xff] }
 0x20a   : > { %v1352_v19 = vsel %vm617_vm7, %v1349_v0, %v1303_v54  ;;  %v3385_v0 = vpack.i.bf16 %v4086_v27, %v4228_v6 }
 0x20c   : > { %v1311_v30 = vpop.permute.xlu1 %1310 }
 0x20d   : > { %v1315_v42 = vpop.permute.xlu0 %1314  ;;  %3341 = vrot.lane.b32.xlu2 %v3340_v1, %s3552_s12  ;;  %v1353_v36 = vsel %vm621_vm8, %v1350_v29, %v1311_v30  ;;  %v2851_v30 = vld [vmem:[%s3621_s28 + $0x51] sm:$0xff] }
 0x20e   : > { %v1355_v31 = vsel %vm621_vm8, %v1352_v19, %v1315_v42  ;;  %v3275_v11 = vpack.i.bf16 %v2852_v51, %v2851_v30  ;;  %v4537_v30 = vld [vmem:[%s3621_s28 + $0xa7] sm:$0xff] }
 0x213   : > { %v866_v5 = vpop.f32.mrf.mxu1 }
 0x214   : > { %v840_v40 = vpop.f32.mrf.mxu0  ;;  %v1321_v28 = vpop.permute.xlu1 %1320 }
 0x215   : > { %v841_v48 = vadd.f32 %v3490_v8, %v840_v40  ;;  %v1325_v1 = vpop.permute.xlu0 %1324  ;;  %v1356_v4 = vsel %vm625_vm9, %v1353_v36, %v1321_v28  ;;  %3356 = vrot.lane.b32.xlu2 %v3355_v49, %s3553_s13  ;;  %v2856_v49 = vld [vmem:[%s3621_s28 + $0x62] sm:$0xff]  ;;  %v3300_v40 = vpack.i.bf16 %v4228_v6, %v2859_v35  ;;  %v2860_v6 = vld [vmem:[%s3621_s28 + $0x57] sm:$0xff] }
 0x216   : > { %1362 = vrot.lane.b32.xlu1 %v1356_v4, %s5396_s20  ;;  %v1358_v54 = vsel %vm625_vm9, %v1355_v31, %v1325_v1  ;;  %v3290_v29 = vpack.i.bf16 %v4177_v46, %v2856_v49 }
 0x217   : > { %v867_v42 = vadd.f32 %v866_v5, %v841_v48  ;;  %1366 = vrot.lane.b32.xlu0 %v1358_v54, %s5396_s20 }
 0x219   : > { %876 = vst.msk [vmem:[%s4501_s26] sm:$0xff] %vm5398_vm4, %v867_v42  ;;  %v894_v53 = vmul.f32 %v4398_v18, %v867_v42 }
 0x21b   : > { %v869_v26 = vpop.f32.mrf.mxu1  ;;  %v909_v25 = vmul.f32 %v894_v53, %v867_v42  ;;  %v897_v5 = vsel %vm5398_vm4, %v894_v53, 0.0 }
 0x21c   : > { %v843_v47 = vpop.f32.mrf.mxu0 }
 0x21d   : > { %v844_v10 = vadd.f32 %v3490_v8, %v843_v47  ;;  %3371 = vrot.lane.b32.xlu2 %v3370_v61, %s3555_s15  ;;  %v912_v48 = vsel %vm5398_vm4, %v909_v25, 0.0  ;;  %v2850_v61 = vld [vmem:[%s3621_s28 + $0x60] sm:$0xff]  ;;  %v2866_v25 = vld [vmem:[%s3621_s28 + $0x6c] sm:$0xff] }
 0x21e   : > { %3276 = vrot.lane.b32.xlu1 %v3275_v11, %s3547_s7  ;;  %v3400_v11 = vpack.i.bf16 %v4537_v30, %v4264_v14  ;;  %v3315_v53 = vpack.i.bf16 %v2850_v61, %v4543_v45  ;;  %v2863_v14 = vld [vmem:[%s3621_s28 + $0x68] sm:$0xff] }
 0x21f   : > { %v870_v52 = vadd.f32 %v869_v26, %v844_v10  ;;  %3286 = vrot.lane.b32.xlu0 %v3285_v24, %s3546_s30  ;;  %v3305_v24 = vpack.i.bf16 %v2861_v38, %v2860_v6  ;;  %v4608_v6 = vld [vmem:[%s3621_s28 + $0xa2] sm:$0xff] }
 0x220   : > { %v4611_v38 = vld [vmem:[%s3621_s28 + $0xa6] sm:$0xff] }
 0x221   : > { %877 = vst.msk [vmem:[%s4501_s26 + $0x8] sm:$0xff] %vm5398_vm4, %v870_v52  ;;  %v895_v12 = vmul.f32 %v4393_v56, %v870_v52 }
 0x223   : > { %v898_v19 = vsel %vm5398_vm4, %v895_v12, 0.0  ;;  %v910_v36 = vmul.f32 %v895_v12, %v870_v52  ;;  %v872_v42 = vpop.f32.mrf.mxu1  ;;  %v3415_v12 = vpack.i.bf16 %v4222_v62, %v4335_v41 }
 0x224   : > { %v899_v28 = vadd.f32 %v898_v19, %v897_v5  ;;  %v846_v31 = vpop.f32.mrf.mxu0  ;;  %v2867_v5 = vld [vmem:[%s3621_s28 + $0x5d] sm:$0xff]  ;;  %v2868_v19 = vld [vmem:[%s3621_s28 + $0x65] sm:$0xff] }
 0x225   : > { %v913_v1 = vsel %vm5398_vm4, %v910_v36, 0.0  ;;  %v847_v4 = vadd.f32 %v3490_v8, %v846_v31  ;;  %3386 = vrot.lane.b32.xlu2 %v3385_v0, %s5395_s16  ;;  %v3320_v0 = vpack.i.bf16 %v4026_v58, %v2863_v14  ;;  %v3335_v36 = vpack.i.bf16 %v2868_v19, %v2867_v5 }
 0x226   : > { %v914_v54 = vadd.f32 %v913_v1, %v912_v48  ;;  %3291 = vrot.lane.b32.xlu1 %v3290_v29, %s3546_s30  ;;  %v3330_v29 = vpack.i.bf16 %v4335_v41, %v2866_v25  ;;  %v2870_v41 = vld [vmem:[%s3621_s28 + $0x6e] sm:$0xff]  ;;  %v3086_v25 = vunpack.i.h.bf16 %v5441_v3  ;;  %v3223_v5 = vunpack.i.l.bf16 %v4251_v34 }
 0x227   : > { %v873_v51 = vadd.f32 %v872_v42, %v847_v4  ;;  %3301 = vrot.lane.b32.xlu0 %v3300_v40, %s3545_s29  ;;  %v3345_v40 = vpack.i.bf16 %v2859_v35, %v4457_v9  ;;  %v3350_v31 = vpack.i.bf16 %v4086_v27, %v2870_v41  ;;  %v4585_v48 = vld [vmem:[%s3621_s28 + $0xa8] sm:$0xff]  ;;  %v3365_v4 = vpack.i.bf16 %v4037_v7, %v4135_v2  ;;  %v4673_v41 = vld [vmem:[%s3621_s28 + $0xb0] sm:$0xff] }
 0x228   : > { %v2898_v42 = vld [vmem:[%s3621_s28 + $0xa9] sm:$0xff]  ;;  %v3380_v7 = vpack.i.bf16 %v4608_v6, %v4186_v60  ;;  %v3106_v19 = vunpack.i.h.bf16 %v5443_v17  ;;  %v3209_v3 = vunpack.i.h.bf16 %v4197_v63 }
 0x229   : > { %878 = vst.msk [vmem:[%s4501_s26 + $0x10] sm:$0xff] %vm5398_vm4, %v873_v51  ;;  %v896_v8 = vmul.f32 %v4155_v13, %v873_v51  ;;  %v2901_v2 = vld [vmem:[%s3621_s28 + $0xaa] sm:$0xff] }
 0x22a   : > { %v2963_v60 = vld [vmem:[%s3621_s28 + $0xac] sm:$0xff] }
 0x22b   : > { %v900_v26 = vsel %vm5398_vm4, %v896_v8, 0.0  ;;  %v911_v47 = vmul.f32 %v896_v8, %v873_v51  ;;  %v3375_v51 = vpack.i.bf16 %v4058_v20, %v4177_v46  ;;  %v3395_v20 = vpack.i.bf16 %v4131_v44, %v4261_v22  ;;  %v4624_v46 = vld [vmem:[%s3621_s28 + $0xae] sm:$0xff] }
 0x22c   : > { %v4553_v10 = vadd.f32 %v900_v26, %v899_v28  ;;  %v4581_v28 = vld [vmem:[%s3621_s28 + $0xa0] sm:$0xff]  ;;  %v3405_v8 = vpack.i.bf16 %v4099_v32, %v4026_v58  ;;  %v3420_v44 = vpack.i.bf16 %v2963_v60, %v4342_v43  ;;  %v3056_v58 = vunpack.i.h.bf16 %v5431_v21  ;;  %v3492_v43 = vld [vmem:[%s3621_s28 + $0x30] sm:$0xff] }
 0x22d   : > { %v915_v52 = vsel %vm5398_vm4, %v911_v47, 0.0  ;;  %3401 = vrot.lane.b32.xlu2 %v3400_v11, %s5472_s17  ;;  %v3360_v9 = vpack.i.bf16 %v4581_v28, %v4099_v32  ;;  %v2907_v11 = vld [vmem:[%s3621_s28 + $0xaf] sm:$0xff]  ;;  %v3203_v32 = vunpack.i.l.bf16 %v4415_v15  ;;  %v3208_v26 = vunpack.i.l.bf16 %v4197_v63 }
 0x22e   : > { %v4557_v49 = vadd.f32 %v915_v52, %v914_v54  ;;  %3306 = vrot.lane.b32.xlu1 %v3305_v24, %s3549_s9  ;;  %v3066_v24 = vunpack.i.h.bf16 %v5434_v57  ;;  %v3076_v52 = vunpack.i.h.bf16 %v5438_v55  ;;  %v3213_v21 = vunpack.i.l.bf16 %v4417_v37 }
 0x22f   : > { %3316 = vrot.lane.b32.xlu0 %v3315_v53, %s3548_s8  ;;  %v1171_v53 = vsel %vm589_vm0, %v3492_v43, %v3203_v32  ;;  %v3204_v55 = vunpack.i.h.bf16 %v4415_v15  ;;  %v3214_v63 = vunpack.i.h.bf16 %v4417_v37  ;;  %v5482_v37 = vld [vmem:[#allocation8_spill] sm:$0xff]  ;;  %vm5506_vm4 = vcmask 203776  }
 0x235   : > { %3416 = vrot.lane.b32.xlu2 %v3415_v12, %s5428_s19  ;;  %v1174_v12 = vsel %vm593_vm1, %v1171_v53, %v3208_v26  ;;  %v5484_v26 = vld [vmem:[#allocation21_spill] sm:$0xff]  ;;  %v5485_v53 = vld [vmem:[#allocation24_spill] sm:$0xff] }
 0x236   : > { %3321 = vrot.lane.b32.xlu1 %v3320_v0, %s3548_s8  ;;  %v3218_v0 = vunpack.i.l.bf16 %v4424_v23 }
 0x237   : > { %3331 = vrot.lane.b32.xlu0 %v3330_v29, %s3550_s10 }
 0x23d   : > { %1760 = vrot.lane.b32.xlu2 %v4235_v39, %s3547_s7 }
 0x23e   : > { %3336 = vrot.lane.b32.xlu1 %v3335_v36, %s3552_s12 }
 0x23f   : > { %3346 = vrot.lane.b32.xlu0 %v3345_v40, %s3551_s11  ;;  %v4577_v62 = vpop.permute.xlu2 %1364 }
 0x245   : > { %1772 = vrot.lane.b32.xlu2 %v4585_v48, %s3546_s30 }
 0x246   : > { %3351 = vrot.lane.b32.xlu1 %v3350_v31, %s3551_s11  ;;  %v5477_v31 = vld [vmem:[#allocation16_spill] sm:$0xff] }
 0x247   : > { %3361 = vrot.lane.b32.xlu0 %v3360_v9, %s3553_s13  ;;  %v4593_v35 = vpop.permute.xlu2 %3281  ;;  %v3116_v15 = vunpack.i.h.bf16 %v5477_v31  ;;  %v3493_v9 = vld [vmem:[%s3621_s28 + $0x38] sm:$0xff] }
 0x248   : > { %v3283_v1 = vunpack.i.l.bf16 %v4593_v35  ;;  %v5489_v31 = vld [vmem:[#allocation25_spill] sm:$0xff] }
 0x24a   : > { %v4599_v54 = vsel %vm589_vm0, %v2850_v61, %v3283_v1  ;;  %v3390_v61 = vpack.i.bf16 %v4611_v38, %v4235_v39  ;;  %v3410_v39 = vpack.i.bf16 %v4585_v48, %v4296_v59  ;;  %v3491_v59 = vld [vmem:[%s3621_s28 + $0x28] sm:$0xff]  ;;  %v1172_v1 = vsel %vm589_vm0, %v3493_v9, %v3204_v55  ;;  %v5490_v9 = vld [vmem:[#allocation28_spill] sm:$0xff] }
 0x24b   : > { %v1170_v47 = vsel %vm589_vm0, %v3491_v59, %v3056_v58  ;;  %v5483_v58 = vld [vmem:[#allocation29_spill] sm:$0xff]  ;;  %v3146_v59 = vunpack.i.h.bf16 %v5484_v26 }
 0x24c   : > { %v1173_v14 = vsel %vm593_vm1, %v1170_v47, %v3066_v24  ;;  %v3238_v32 = vunpack.i.l.bf16 %v5483_v58  ;;  %v3224_v47 = vunpack.i.h.bf16 %v4251_v34 }
 0x24d   : > { %1784 = vrot.lane.b32.xlu2 %v2898_v42, %s3545_s29  ;;  %v1176_v29 = vsel %vm5399_vm2, %v1173_v14, %v3076_v52  ;;  %v5479_v42 = vld [vmem:[#allocation18_spill] sm:$0xff]  ;;  %v3156_v52 = vunpack.i.h.bf16 %v5485_v53  ;;  %v4707_v14 = vld [vmem:[%s3621_s28 + $0xb1] sm:$0xff] }
 0x24e   : > { %3366 = vrot.lane.b32.xlu1 %v3365_v4, %s3555_s15  ;;  %v1179_v36 = vsel %vm5475_vm15, %v1176_v29, %v3086_v25  ;;  %v5478_v4 = vld [vmem:[#allocation19_spill] sm:$0xff]  ;;  %vm5480_vm15 = vmmov %vm5476_vm10  ;;  %v4710_v25 = vld [vmem:[%s3621_s28 + $0xb6] sm:$0xff]  ;;  %v3229_v34 = vunpack.i.h.bf16 %v5479_v42 }
 0x24f   : > { %3376 = vrot.lane.b32.xlu0 %v3375_v51, %s5473_s27  ;;  %v4637_v22 = vpop.permute.xlu2 %3296  ;;  %v3126_v17 = vunpack.i.h.bf16 %v5478_v4  ;;  %v3228_v51 = vunpack.i.l.bf16 %v5479_v42  ;;  %v5487_v29 = vld [vmem:[#allocation2_spill] sm:$0xff]  ;;  %v5491_v4 = vld [vmem:[#allocation5_spill] sm:$0xff]  ;;  %v3239_v42 = vunpack.i.h.bf16 %v5483_v58 }
 0x255   : > { %1796 = vrot.lane.b32.xlu2 %v2901_v2, %s3549_s9  ;;  %v5481_v2 = vld [vmem:[#allocation22_spill] sm:$0xff] }
 0x256   : > { %3381 = vrot.lane.b32.xlu1 %v3380_v7, %s5473_s27 }
 0x257   : > { %3391 = vrot.lane.b32.xlu0 %v3390_v61, %s5395_s16  ;;  %v4657_v57 = vpop.permute.xlu2 %3311  ;;  %v3233_v61 = vunpack.i.l.bf16 %v5481_v2 }
 0x25d   : > { %1808 = vrot.lane.b32.xlu2 %v4624_v46, %s3548_s8 }
 0x25e   : > { %3396 = vrot.lane.b32.xlu1 %v3395_v20, %s5472_s17 }
 0x25f   : > { %3406 = vrot.lane.b32.xlu0 %v3405_v8, %s5474_s14  ;;  %v1175_v8 = vsel %vm593_vm1, %v1172_v1, %v3209_v3  ;;  %v3186_v1 = vunpack.i.h.bf16 %v5490_v9  ;;  %v3496_v9 = vld [vmem:[%s5339_s1 + $0x68] sm:$0xff] }
 0x260   : > { %v1178_v43 = vsel %vm5399_vm2, %v1175_v8, %v3214_v63 }
 0x265   : > { %1820 = vrot.lane.b32.xlu2 %v2907_v11, %s3550_s10  ;;  %v3136_v11 = vunpack.i.h.bf16 %v5482_v37  ;;  %v4742_v37 = vld [vmem:[%s3621_s28 + $0xb2] sm:$0xff] }
 0x266   : > { %3411 = vrot.lane.b32.xlu1 %v3410_v39, %s5474_s14 }
 0x267   : > { %3421 = vrot.lane.b32.xlu0 %v3420_v44, %s5428_s19 }
 0x26d   : > { %1840 = vrot.lane.b32.xlu2 %v2963_v60, %s3551_s11  ;;  %v3219_v60 = vunpack.i.h.bf16 %v4424_v23 }
 0x26e   : > { %1758 = vrot.lane.b32.xlu1 %v4086_v27, %s3547_s7  ;;  %v3096_v27 = vunpack.i.h.bf16 %v5442_v16 }
 0x26f   : > { %1762 = vrot.lane.b32.xlu0 %v4405_v33, %s3547_s7  ;;  %v1177_v33 = vsel %vm5399_vm2, %v1174_v12, %v3213_v21  ;;  %v1181_v21 = vsel %vm5468_vm3, %v1178_v43, %v3219_v60  ;;  %v5486_v12 = vld [vmem:[#allocation6_spill] sm:$0xff]  ;;  %v5495_v43 = vld [vmem:[#allocation7_spill] sm:$0xff] }
 0x270   : > { %v1180_v40 = vsel %vm5468_vm3, %v1177_v33, %v3218_v0  ;;  %v1182_v16 = vsel %vm5476_vm10, %v1179_v36, %v3096_v27  ;;  %v3243_v0 = vunpack.i.l.bf16 %v5486_v12  ;;  %v5488_v33 = vld [vmem:[#allocation15_spill] sm:$0xff]  ;;  %v1184_v3 = vsel %vm5476_vm10, %v1181_v21, %v3224_v47  ;;  %v5493_v60 = vld [vmem:[#allocation10_spill] sm:$0xff] }
 0x271   : > { %v1183_v7 = vsel %vm5480_vm15, %v1180_v40, %v3223_v5  ;;  %v1185_v20 = vsel %vm609_vm5, %v1182_v16, %v3106_v19  ;;  %v3248_v5 = vunpack.i.l.bf16 %v5487_v29  ;;  %v3166_v19 = vunpack.i.h.bf16 %v5488_v33  ;;  %v3494_v33 = vld [vmem:[%s5339_s1 + $0x78] sm:$0xff] }
 0x272   : > { %v1188_v39 = vsel %vm613_vm6, %v1185_v20, %v3116_v15  ;;  %v1186_v24 = vsel %vm609_vm5, %v1183_v7, %v3228_v51  ;;  %v3234_v40 = vunpack.i.h.bf16 %v5481_v2  ;;  %v3176_v15 = vunpack.i.h.bf16 %v5489_v31  ;;  %v5492_v20 = vld [vmem:[#allocation20_spill] sm:$0xff] }
 0x273   : > { %v1191_v44 = vsel %vm617_vm7, %v1188_v39, %v3126_v17  ;;  %v1189_v23 = vsel %vm613_vm6, %v1186_v24, %v3233_v61  ;;  %v1187_v51 = vsel %vm609_vm5, %v1184_v3, %v3229_v34  ;;  %v3196_v8 = vunpack.i.h.bf16 %v5492_v20  ;;  %v3497_v20 = vld [vmem:[%s5339_s1 + $0x60] sm:$0xff] }
 0x274   : > { %v1194_v27 = vsel %vm621_vm8, %v1191_v44, %v3136_v11  ;;  %v1192_v55 = vsel %vm617_vm7, %v1189_v23, %v3238_v32  ;;  %v1190_v7 = vsel %vm613_vm6, %v1187_v51, %v3234_v40  ;;  %v3258_v39 = vunpack.i.l.bf16 %v5493_v60  ;;  %v5494_v32 = vld [vmem:[#allocation3_spill] sm:$0xff] }
 0x275   : > { %1830 = vrot.lane.b32.xlu2 %v4673_v41, %s3552_s12  ;;  %v1197_v36 = vsel %vm625_vm9, %v1194_v27, %v3146_v59  ;;  %v1195_v17 = vsel %vm621_vm8, %v1192_v55, %v3243_v0  ;;  %v3244_v44 = vunpack.i.h.bf16 %v5486_v12  ;;  %v3263_v24 = vunpack.i.l.bf16 %v5494_v32 }
 0x276   : > { %1770 = vrot.lane.b32.xlu1 %v4581_v28, %s3546_s30  ;;  %v4694_v28 = vpop.permute.xlu2 %3326  ;;  %v1200_v16 = vsel %vm629_vm11, %v1197_v36, %v3156_v52  ;;  %v1198_v63 = vsel %vm625_vm9, %v1195_v17, %v3248_v5  ;;  %v1193_v59 = vsel %vm617_vm7, %v1190_v7, %v3239_v42  ;;  %v3249_v47 = vunpack.i.h.bf16 %v5487_v29  ;;  %v5499_v29 = vld [vmem:[#allocation23_spill] sm:$0xff] }
 0x277   : > { %1774 = vrot.lane.b32.xlu0 %v4673_v41, %s3546_s30  ;;  %v1203_v61 = vsel %vm633_vm12, %v1200_v16, %v3166_v19  ;;  %v3268_v23 = vunpack.i.l.bf16 %v5495_v43  ;;  %vm5496_vm15 = vcmask 613376   ;;  %v3254_v12 = vunpack.i.h.bf16 %v5491_v4  ;;  %v3495_v16 = vld [vmem:[%s5339_s1 + $0x70] sm:$0xff] }
 0x278   : > { %v1206_v11 = vsel %vm637_vm13, %v1203_v61, %v3176_v15  ;;  %v1196_v0 = vsel %vm621_vm8, %v1193_v59, %v3244_v44  ;;  %vm5497_vm3 = vcmask 654336   ;;  %vm5498_vm10 = vcmask 56320  }
 0x279   : > { %v1209_v26 = vsel %vm5400_vm14, %v1206_v11, %v3186_v1  ;;  %v1199_v55 = vsel %vm625_vm9, %v1196_v0, %v3249_v47  ;;  %v3273_v5 = vunpack.i.l.bf16 %v5499_v29  ;;  %v3259_v19 = vunpack.i.h.bf16 %v5493_v60 }
 0x27a   : > { %v1212_v21 = vsel %vm5496_vm15, %v1209_v26, %v3196_v8  ;;  %v1202_v3 = vsel %vm629_vm11, %v1199_v55, %v3254_v12  ;;  %v3264_v31 = vunpack.i.h.bf16 %v5494_v32  ;;  %v3269_v1 = vunpack.i.h.bf16 %v5495_v43  ;;  %v4814_v26 = vld [vmem:[%s3621_s28 + $0xb7] sm:$0xff] }
 0x27b   : > { %v3298_v51 = vunpack.i.l.bf16 %v4637_v22  ;;  %v3499_v43 = vld [vmem:[%s5339_s1 + $0x50] sm:$0xff]  ;;  %v3314_v12 = vunpack.i.h.bf16 %v4657_v57 }
 0x27d   : > { %1864 = vrot.lane.b32.xlu2 %v4710_v25, %s3555_s15 }
 0x27e   : > { %1782 = vrot.lane.b32.xlu1 %v4506_v50, %s3545_s29  ;;  %v3253_v50 = vunpack.i.l.bf16 %v5491_v4  ;;  %v4736_v2 = vpop.permute.xlu2 %3341  ;;  %v1205_v4 = vsel %vm633_vm12, %v1202_v3, %v3259_v19 }
 0x27f   : > { %1786 = vrot.lane.b32.xlu0 %v4707_v14, %s3545_s29 }
 0x280   : > { %v1201_v58 = vsel %vm629_vm11, %v1198_v63, %v3253_v50  ;;  %v2848_v50 = vld [vmem:[%s3621_s28 + $0x50] sm:$0xff] }
 0x281   : > { %v1204_v53 = vsel %vm633_vm12, %v1201_v58, %v3258_v39  ;;  %v1208_v39 = vsel %vm637_vm13, %v1205_v4, %v3264_v31  ;;  %v3274_v58 = vunpack.i.h.bf16 %v5499_v29 }
 0x282   : > { %v1207_v34 = vsel %vm637_vm13, %v1204_v53, %v3263_v24  ;;  %v1211_v59 = vsel %vm5400_vm14, %v1208_v39, %v3269_v1  ;;  %v3507_v39 = vld [vmem:[%s5339_s1 + $0x18] sm:$0xff] }
 0x283   : > { %v1210_v36 = vsel %vm5400_vm14, %v1207_v34, %v3268_v23  ;;  %v3284_v23 = vunpack.i.h.bf16 %v4593_v35  ;;  %v3313_v35 = vunpack.i.l.bf16 %v4657_v57 }
 0x284   : > { %v1213_v15 = vsel %vm5496_vm15, %v1210_v36, %v3273_v5  ;;  %v3501_v5 = vld [vmem:[%s5339_s1 + $0x40] sm:$0xff] }
 0x285   : > { %2300 = vrot.lane.b32.xlu2 %v4624_v46, %s3547_s7  ;;  %v1372_v42 = vsel %vm5497_vm3, %v1213_v15, %v4577_v62 }
 0x286   : > { %1794 = vrot.lane.b32.xlu1 %v4608_v6, %s3549_s9  ;;  %v4779_v40 = vpop.permute.xlu2 %3356 }
 0x287   : > { %1798 = vrot.lane.b32.xlu0 %v4742_v37, %s3549_s9 }
 0x288   : > { %v4759_v52 = vpop.permute.xlu1 %1362 }
 0x289   : > { %v4764_v27 = vpop.permute.xlu0 %1366  ;;  %v1371_v6 = vsel %vm5497_vm3, %v1212_v21, %v4759_v52  ;;  %v3500_v21 = vld [vmem:[%s5339_s1 + $0x48] sm:$0xff] }
 0x28a   : > { %2844 = vmatmul.msk.f32.vlgmr.msra.gmra.mxu3 %vm5498_vm10, %v4764_v27  ;;  %1396 = vmatmul.f32.vlgmr.msra.gmra.mxu2 %v1371_v6  ;;  %vm5500_vm10 = vmmov %vm5496_vm15 }
 0x28b   : > { %2464 = vmatpush.msra.mxu3 %v3494_v33  ;;  %v1214_v6 = vsel %vm5500_vm10, %v1211_v59, %v3274_v58  ;;  %vm5501_vm15 = vmmov %vm5497_vm3  ;;  %v3502_v33 = vld [vmem:[%s3621_s28 + $0x78] sm:$0xff]  ;;  %vm5502_vm3 = vcmask 162816  }
 0x28c   : > { %v1373_v29 = vsel %vm5501_vm15, %v1214_v6, %v4764_v27  ;;  %v2254_v19 = vsel %vm589_vm0, %v3502_v33, %v3284_v23  ;;  %v3503_v27 = vld [vmem:[%s5339_s1 + $0x38] sm:$0xff]  ;;  %vm5503_vm10 = vmmov %vm5502_vm3  ;;  %vm5504_vm15 = vcmask 56320  }
 0x28d   : > { %2465 = vmatpush.msra.mxu3 %v3495_v16 }
 0x28e   : > { %1806 = vrot.lane.b32.xlu1 %v4611_v38, %s3548_s8  ;;  %v3299_v38 = vunpack.i.h.bf16 %v4637_v22  ;;  %v3498_v22 = vld [vmem:[%s5339_s1 + $0x58] sm:$0xff]  ;;  %v4825_v53 = vpop.permute.xlu2 %3371 }
 0x28f   : > { %1810 = vrot.lane.b32.xlu0 %v4710_v25, %s3548_s8  ;;  %2466 = vmatpush.msra.mxu3 %v3496_v9  ;;  %v4851_v9 = vld [vmem:[%s3621_s28 + $0xad] sm:$0xff] }
 0x290   : > { %v3277_v17 = vpop.permute.xlu1 %3276 }
 0x291   : > { %v3279_v63 = vunpack.i.h.bf16 %v3277_v17  ;;  %v3278_v7 = vunpack.i.l.bf16 %v3277_v17  ;;  %v3287_v61 = vpop.permute.xlu0 %3286  ;;  %2467 = vmatpush.msra.mxu3 %v3497_v20 }
 0x292   : > { %v3289_v8 = vunpack.i.h.bf16 %v3287_v61  ;;  %v3288_v60 = vunpack.i.l.bf16 %v3287_v61  ;;  %1399 = vmatmul.f32.gmra.mxu2 %v1372_v42  ;;  %v3329_v42 = vunpack.i.h.bf16 %v4694_v28 }
 0x293   : > { %v1713_v11 = vsel %vm589_vm0, %v4543_v45, %v3279_v63  ;;  %v1712_v44 = vsel %vm589_vm0, %v2848_v50, %v3278_v7  ;;  %2468 = vmatpush.msra.mxu3 %v3498_v22  ;;  %v3505_v50 = vld [vmem:[%s5339_s1 + $0x28] sm:$0xff]  ;;  %v4882_v22 = vld [vmem:[%s3621_s28 + $0xb4] sm:$0xff] }
 0x294   : > { %v1716_v32 = vsel %vm593_vm1, %v1713_v11, %v3289_v8  ;;  %v1715_v24 = vsel %vm593_vm1, %v1712_v44, %v3288_v60 }
 0x295   : > { %v1718_v47 = vsel %vm5399_vm2, %v1715_v24, %v3298_v51  ;;  %v1719_v45 = vsel %vm5399_vm2, %v1716_v32, %v3299_v38  ;;  %2469 = vmatpush.msra.mxu3 %v3499_v43  ;;  %v3328_v38 = vunpack.i.l.bf16 %v4694_v28  ;;  %v3509_v24 = vld [vmem:[%s5339_s1 + $0x8] sm:$0xff] }
 0x296   : > { %1818 = vrot.lane.b32.xlu1 %v4537_v30, %s3550_s10  ;;  %v4867_v51 = vpop.permute.xlu2 %3386 }
 0x297   : > { %1822 = vrot.lane.b32.xlu0 %v4814_v26, %s3550_s10  ;;  %2470 = vmatpush.msra.mxu3 %v3500_v21 }
 0x298   : > { %v3292_v0 = vpop.permute.xlu1 %3291 }
 0x299   : > { %v3294_v34 = vunpack.i.h.bf16 %v3292_v0  ;;  %v3293_v55 = vunpack.i.l.bf16 %v3292_v0  ;;  %v3302_v30 = vpop.permute.xlu0 %3301  ;;  %2471 = vmatpush.msra.mxu3 %v3501_v5 }
 0x29a   : > { %v3304_v36 = vunpack.i.h.bf16 %v3302_v30  ;;  %v3303_v3 = vunpack.i.l.bf16 %v3302_v30  ;;  %1402 = vmatmul.f32.gmra.mxu2 %v1373_v29  ;;  %v4913_v29 = vld [vmem:[%s3621_s28 + $0xb8] sm:$0xff] }
 0x29b   : > { %v1717_v57 = vsel %vm593_vm1, %v4599_v54, %v3293_v55  ;;  %v2257_v16 = vsel %vm593_vm1, %v2254_v19, %v3294_v34  ;;  %2472 = vmatpush.msra.mxu3 %v3503_v27  ;;  %v3504_v54 = vld [vmem:[%s5339_s1 + $0x30] sm:$0xff]  ;;  %v4922_v19 = vld [vmem:[%s3621_s28 + $0xbe] sm:$0xff] }
 0x29c   : > { %v1720_v31 = vsel %vm5399_vm2, %v1717_v57, %v3303_v3  ;;  %v2260_v15 = vsel %vm5399_vm2, %v2257_v16, %v3304_v36  ;;  %vm5507_vm2 = vmmov %vm5506_vm4  ;;  %v4908_v34 = vld [vmem:[%s3621_s28 + $0xb5] sm:$0xff]  ;;  %v3359_v36 = vunpack.i.h.bf16 %v4779_v40  ;;  %v3358_v3 = vunpack.i.l.bf16 %v4779_v40  ;;  %1866 = vrot.lane.b32.xlu2 %v4922_v19, %s3555_s15  ;;  %v4936_v40 = vld [vmem:[%s3621_s28 + $0xbd] sm:$0xff] }
 0x29d   : > { %v1723_v1 = vsel %vm5502_vm3, %v1720_v31, %v3313_v35  ;;  %v2263_v4 = vsel %vm5503_vm10, %v2260_v15, %v3314_v12  ;;  %2473 = vmatpush.msra.mxu3 %v3504_v54  ;;  %vm5505_vm10 = vmmov %vm5502_vm3  ;;  %v4931_v54 = vld [vmem:[%s3621_s28 + $0xbc] sm:$0xff] }
 0x29e   : > { %1828 = vrot.lane.b32.xlu1 %v4585_v48, %s3552_s12  ;;  %v3506_v48 = vld [vmem:[%s5339_s1 + $0x20] sm:$0xff]  ;;  %v4903_v6 = vpop.permute.xlu2 %3401 }
 0x29f   : > { %1852 = vrot.lane.b32.xlu0 %v4851_v9, %s3553_s13  ;;  %2474 = vmatpush.msra.mxu3 %v3505_v50 }
 0x2a0   : > { %v3307_v17 = vpop.permute.xlu1 %3306 }
 0x2a1   : > { %v3309_v63 = vunpack.i.h.bf16 %v3307_v17  ;;  %v3308_v7 = vunpack.i.l.bf16 %v3307_v17  ;;  %v3317_v61 = vpop.permute.xlu0 %3316  ;;  %2475 = vmatpush.msra.mxu3 %v3506_v48  ;;  %v3374_v48 = vunpack.i.h.bf16 %v4825_v53 }
 0x2a2   : > { %v3319_v20 = vunpack.i.h.bf16 %v3317_v61  ;;  %v3318_v8 = vunpack.i.l.bf16 %v3317_v61  ;;  %2842 = vmatmul.msk.f32.vlgmr.msrb.gmra.mxu2 %vm5504_vm15, %v4759_v52  ;;  %v3508_v52 = vld [vmem:[%s5339_s1 + $0x10] sm:$0xff] }
 0x2a3   : > { %v1721_v60 = vsel %vm5502_vm3, %v1718_v47, %v3308_v7  ;;  %v1722_v28 = vsel %vm5505_vm10, %v1719_v45, %v3309_v63  ;;  %2476 = vmatpush.msra.mxu3 %v3507_v39  ;;  %v3344_v47 = vunpack.i.h.bf16 %v4736_v2  ;;  %v3343_v45 = vunpack.i.l.bf16 %v4736_v2  ;;  %v2979_v61 = vld [vmem:[%s3621_s28 + $0xce] sm:$0xff] }
 0x2a4   : > { %v1724_v11 = vsel %vm5506_vm4, %v1721_v60, %v3318_v8  ;;  %v1725_v44 = vsel %vm5507_vm2, %v1722_v28, %v3319_v20  ;;  %vm5508_vm2 = vmmov %vm5504_vm15  ;;  %v3373_v20 = vunpack.i.l.bf16 %v4825_v53  ;;  %2348 = vrot.lane.b32.xlu2 %v2979_v61, %s3548_s8  ;;  %vm5510_vm3 = vcmask 613376  }
 0x2a5   : > { %v1727_v58 = vsel %vm609_vm5, %v1724_v11, %v3328_v38  ;;  %v1728_v32 = vsel %vm609_vm5, %v1725_v44, %v3329_v42  ;;  %2477 = vmatpush.msra.mxu3 %v3508_v52  ;;  %vm5509_vm15 = vmmov %vm5506_vm4 }
 0x2a6   : > { %1862 = vrot.lane.b32.xlu1 %v4624_v46, %s3555_s15  ;;  %v3510_v46 = vld [vmem:[%s5339_s1] sm:$0xff]  ;;  %v4938_v42 = vpop.permute.xlu2 %3416  ;;  %vm5511_vm10 = vmmov %vm5510_vm3 }
 0x2a7   : > { %1842 = vrot.lane.b32.xlu0 %v4882_v22, %s3551_s11  ;;  %2478 = vmatpush.msra.mxu3 %v3509_v24 }
 0x2a8   : > { %v3322_v59 = vpop.permute.xlu1 %3321 }
 0x2a9   : > { %v3324_v43 = vunpack.i.h.bf16 %v3322_v59  ;;  %v3323_v23 = vunpack.i.l.bf16 %v3322_v59  ;;  %v3332_v21 = vpop.permute.xlu0 %3331  ;;  %2479 = vmatpush.msra.mxu3 %v3510_v46  ;;  %v2973_v59 = vld [vmem:[%s3621_s28 + $0xc9] sm:$0xff]  ;;  %v3388_v46 = vunpack.i.l.bf16 %v4867_v51 }
 0x2aa   : > { %v3334_v12 = vunpack.i.h.bf16 %v3332_v21  ;;  %v3333_v0 = vunpack.i.l.bf16 %v3332_v21  ;;  %2843 = vmatmul.msk.f32.gmra.mxu2 %vm5508_vm2, %v4577_v62  ;;  %v3389_v21 = vunpack.i.h.bf16 %v4867_v51  ;;  %vm5512_vm2 = vmmov %vm5510_vm3 }
 0x2ab   : > { %v1726_v35 = vsel %vm5506_vm4, %v1723_v1, %v3323_v23  ;;  %v2266_v2 = vsel %vm5509_vm15, %v2263_v4, %v3324_v43  ;;  %v2986_v23 = vld [vmem:[%s3621_s28 + $0xd4] sm:$0xff]  ;;  %vm5513_vm4 = vmmov %vm5512_vm2  ;;  %vm5514_vm15 = vcmask 121856  }
 0x2ac   : > { %v1729_v55 = vsel %vm609_vm5, %v1726_v35, %v3333_v0  ;;  %v2269_v30 = vsel %vm609_vm5, %v2266_v2, %v3334_v12  ;;  %2382 = vrot.lane.b32.xlu2 %v2986_v23, %s3551_s11  ;;  %v2980_v23 = vld [vmem:[%s3621_s28 + $0xd6] sm:$0xff] }
 0x2ad   : > { %v1732_v5 = vsel %vm613_vm6, %v1729_v55, %v3343_v45  ;;  %v2272_v33 = vsel %vm613_vm6, %v2269_v30, %v3344_v47 }
 0x2ae   : > { %1854 = vrot.lane.b32.xlu1 %v4908_v34, %s3553_s13  ;;  %v4959_v45 = vpop.permute.xlu2 %1760 }
 0x2af   : > { %1832 = vrot.lane.b32.xlu0 %v4913_v29, %s3552_s12 }
 0x2b0   : > { %v3337_v62 = vpop.permute.xlu1 %3336 }
 0x2b1   : > { %v3339_v57 = vunpack.i.h.bf16 %v3337_v62  ;;  %v3338_v16 = vunpack.i.l.bf16 %v3337_v62  ;;  %v3347_v27 = vpop.permute.xlu0 %3346 }
 0x2b2   : > { %v3349_v31 = vunpack.i.h.bf16 %v3347_v27  ;;  %v3348_v15 = vunpack.i.l.bf16 %v3347_v27  ;;  %v2971_v27 = vld [vmem:[%s3621_s28 + $0xd0] sm:$0xff] }
 0x2b3   : > { %v1730_v1 = vsel %vm613_vm6, %v1727_v58, %v3338_v16  ;;  %v1731_v4 = vsel %vm613_vm6, %v1728_v32, %v3339_v57  ;;  %v2970_v32 = vld [vmem:[%s3621_s28 + $0xc8] sm:$0xff] }
 0x2b4   : > { %v1733_v50 = vsel %vm617_vm7, %v1730_v1, %v3348_v15  ;;  %v1734_v17 = vsel %vm617_vm7, %v1731_v4, %v3349_v31  ;;  %v3404_v31 = vunpack.i.h.bf16 %v4903_v6  ;;  %v3403_v15 = vunpack.i.l.bf16 %v4903_v6  ;;  %2314 = vrot.lane.b32.xlu2 %v2971_v27, %s3546_s30 }
 0x2b5   : > { %v1736_v38 = vsel %vm621_vm8, %v1733_v50, %v3358_v3  ;;  %v1737_v63 = vsel %vm621_vm8, %v1734_v17, %v3359_v36  ;;  %v2982_v3 = vld [vmem:[%s3621_s28 + $0xcf] sm:$0xff] }
 0x2b6   : > { %1844 = vrot.lane.b32.xlu1 %v4931_v54, %s3551_s11  ;;  %v4979_v1 = vpop.permute.xlu2 %1772 }
 0x2b7   : > { %1856 = vrot.lane.b32.xlu0 %v4936_v40, %s3553_s13 }
 0x2b8   : > { %v3352_v7 = vpop.permute.xlu1 %3351 }
 0x2b9   : > { %v3354_v8 = vunpack.i.h.bf16 %v3352_v7  ;;  %v3353_v60 = vunpack.i.l.bf16 %v3352_v7  ;;  %v3362_v28 = vpop.permute.xlu0 %3361 }
 0x2ba   : > { %v3364_v39 = vunpack.i.h.bf16 %v3362_v28  ;;  %v3363_v11 = vunpack.i.l.bf16 %v3362_v28  ;;  %v3419_v28 = vunpack.i.h.bf16 %v4938_v42 }
 0x2bb   : > { %v1735_v44 = vsel %vm617_vm7, %v1732_v5, %v3353_v60  ;;  %v2275_v58 = vsel %vm617_vm7, %v2272_v33, %v3354_v8  ;;  %v2976_v33 = vld [vmem:[%s3621_s28 + $0xca] sm:$0xff] }
 0x2bc   : > { %v1738_v52 = vsel %vm621_vm8, %v1735_v44, %v3363_v11  ;;  %v2278_v24 = vsel %vm621_vm8, %v2275_v58, %v3364_v39  ;;  %v3418_v39 = vunpack.i.l.bf16 %v4938_v42 }
 0x2bd   : > { %v1741_v53 = vsel %vm625_vm9, %v1738_v52, %v3373_v20  ;;  %v2281_v47 = vsel %vm625_vm9, %v2278_v24, %v3374_v48 }
 0x2be   : > { %2312 = vrot.lane.b32.xlu1 %v2970_v32, %s3546_s30  ;;  %v2977_v32 = vld [vmem:[%s3621_s28 + $0xd2] sm:$0xff] }
 0x2bf   : > { %2324 = vrot.lane.b32.xlu0 %v2973_v59, %s3545_s29  ;;  %2338 = vrot.lane.b32.xlu2 %v2977_v32, %s3549_s9  ;;  %v4995_v59 = vpop.permute.xlu2 %1784 }
 0x2c0   : > { %v3367_v43 = vpop.permute.xlu1 %3366 }
 0x2c1   : > { %v3369_v12 = vunpack.i.h.bf16 %v3367_v43  ;;  %v3368_v0 = vunpack.i.l.bf16 %v3367_v43  ;;  %v3377_v35 = vpop.permute.xlu0 %3376  ;;  %v2989_v43 = vld [vmem:[%s3621_s28 + $0xd5] sm:$0xff] }
 0x2c2   : > { %v3379_v2 = vunpack.i.h.bf16 %v3377_v35  ;;  %v3378_v55 = vunpack.i.l.bf16 %v3377_v35 }
 0x2c3   : > { %v1739_v30 = vsel %vm625_vm9, %v1736_v38, %v3368_v0  ;;  %v1740_v5 = vsel %vm625_vm9, %v1737_v63, %v3369_v12 }
 0x2c4   : > { %v1742_v62 = vsel %vm629_vm11, %v1739_v30, %v3378_v55  ;;  %v1743_v36 = vsel %vm629_vm11, %v1740_v5, %v3379_v2  ;;  %v2972_v30 = vld [vmem:[%s3621_s28 + $0xd8] sm:$0xff] }
 0x2c5   : > { %v1745_v51 = vsel %vm633_vm12, %v1742_v62, %v3388_v46  ;;  %v1746_v57 = vsel %vm633_vm12, %v1743_v36, %v3389_v21  ;;  %v2974_v62 = vld [vmem:[%s3621_s28 + $0xd1] sm:$0xff] }
 0x2c6   : > { %2336 = vrot.lane.b32.xlu1 %v2976_v33, %s3549_s9 }
 0x2c7   : > { %2360 = vrot.lane.b32.xlu0 %v2982_v3, %s3550_s10  ;;  %2372 = vrot.lane.b32.xlu2 %v2972_v30, %s3552_s12 }
 0x2c8   : > { %v3382_v16 = vpop.permute.xlu1 %3381 }
 0x2c9   : > { %v3384_v4 = vunpack.i.h.bf16 %v3382_v16  ;;  %v3383_v50 = vunpack.i.l.bf16 %v3382_v16  ;;  %v3392_v17 = vpop.permute.xlu0 %3391  ;;  %v5022_v16 = vpop.permute.xlu2 %1796 }
 0x2ca   : > { %v3394_v38 = vunpack.i.h.bf16 %v3392_v17  ;;  %v3393_v63 = vunpack.i.l.bf16 %v3392_v17 }
 0x2cb   : > { %v1744_v7 = vsel %vm629_vm11, %v1741_v53, %v3383_v50  ;;  %v2284_v61 = vsel %vm629_vm11, %v2281_v47, %v3384_v4  ;;  %v2983_v4 = vld [vmem:[%s3621_s28 + $0xd7] sm:$0xff] }
 0x2cc   : > { %v1747_v48 = vsel %vm633_vm12, %v1744_v7, %v3393_v63  ;;  %v2287_v20 = vsel %vm633_vm12, %v2284_v61, %v3394_v38  ;;  %v2987_v50 = vld [vmem:[%s3621_s28 + $0xdc] sm:$0xff] }
 0x2cd   : > { %v1750_v6 = vsel %vm637_vm13, %v1747_v48, %v3403_v15  ;;  %v2290_v8 = vsel %vm637_vm13, %v2287_v20, %v3404_v31  ;;  %v2990_v15 = vld [vmem:[%s3621_s28 + $0xdd] sm:$0xff] }
 0x2ce   : > { %2370 = vrot.lane.b32.xlu1 %v2971_v27, %s3552_s12  ;;  %v2975_v7 = vld [vmem:[%s3621_s28 + $0xd9] sm:$0xff] }
 0x2cf   : > { %2302 = vrot.lane.b32.xlu0 %v4710_v25, %s3547_s7  ;;  %2396 = vrot.lane.b32.xlu2 %v2990_v15, %s3553_s13 }
 0x2d0   : > { %v3397_v60 = vpop.permute.xlu1 %3396 }
 0x2d1   : > { %v3399_v11 = vunpack.i.h.bf16 %v3397_v60  ;;  %v3398_v44 = vunpack.i.l.bf16 %v3397_v60  ;;  %v3407_v58 = vpop.permute.xlu0 %3406  ;;  %v1809_v17 = vpop.permute.xlu2 %1808  ;;  %v2978_v60 = vld [vmem:[%s3621_s28 + $0xda] sm:$0xff] }
 0x2d2   : > { %v3409_v52 = vunpack.i.h.bf16 %v3407_v58  ;;  %v3408_v24 = vunpack.i.l.bf16 %v3407_v58 }
 0x2d3   : > { %v1748_v53 = vsel %vm637_vm13, %v1745_v51, %v3398_v44  ;;  %v1749_v47 = vsel %vm637_vm13, %v1746_v57, %v3399_v11  ;;  %v2985_v44 = vld [vmem:[%s3621_s28 + $0xe0] sm:$0xff] }
 0x2d4   : > { %v1751_v42 = vsel %vm5400_vm14, %v1748_v53, %v3408_v24  ;;  %v1752_v21 = vsel %vm5400_vm14, %v1749_v47, %v3409_v52  ;;  %v2988_v52 = vld [vmem:[%s3621_s28 + $0xe4] sm:$0xff] }
 0x2d5   : > { %v5004_v46 = vsel %vm5510_vm3, %v1751_v42, %v3418_v39  ;;  %v5007_v12 = vsel %vm5511_vm10, %v1752_v21, %v3419_v28  ;;  %v2991_v39 = vld [vmem:[%s3621_s28 + $0xe5] sm:$0xff]  ;;  %v5064_v42 = vld [vmem:[%s3621_s28 + $0x8d] sm:$0xff]  ;;  %vm5515_vm3 = vcmask 162816   ;;  %vm5516_vm10 = vcmask 203776  }
 0x2d6   : > { %2394 = vrot.lane.b32.xlu1 %v2989_v43, %s3553_s13  ;;  %v2992_v24 = vld [vmem:[%s3621_s28 + $0xe6] sm:$0xff] }
 0x2d7   : > { %2404 = vrot.lane.b32.xlu0 %v2980_v23, %s3555_s15  ;;  %2328 = vrot.lane.b32.xlu2 %v2975_v7, %s3545_s29  ;;  %v2890_v43 = vld [vmem:[%s3621_s28 + $0x85] sm:$0xff] }
 0x2d8   : > { %v3412_v0 = vpop.permute.xlu1 %3411 }
 0x2d9   : > { %v3414_v35 = vunpack.i.h.bf16 %v3412_v0  ;;  %v3413_v2 = vunpack.i.l.bf16 %v3412_v0  ;;  %v3422_v55 = vpop.permute.xlu0 %3421  ;;  %v1821_v48 = vpop.permute.xlu2 %1820  ;;  %v1872_v0 = vsel %vm589_vm0, %v5064_v42, %v4959_v45 }
 0x2da   : > { %v3424_v5 = vunpack.i.h.bf16 %v3422_v55  ;;  %v3423_v33 = vunpack.i.l.bf16 %v3422_v55 }
 0x2db   : > { %v1753_v36 = vsel %vm5400_vm14, %v1750_v6, %v3413_v2  ;;  %v2293_v3 = vsel %vm5400_vm14, %v2290_v8, %v3414_v35  ;;  %v2981_v6 = vld [vmem:[%s3621_s28 + $0xde] sm:$0xff] }
 0x2dc   : > { %v5017_v51 = vsel %vm5512_vm2, %v1753_v36, %v3423_v33  ;;  %v5020_v57 = vsel %vm5513_vm4, %v2293_v3, %v3424_v5  ;;  %v2984_v8 = vld [vmem:[%s3621_s28 + $0xdf] sm:$0xff]  ;;  %v1875_v33 = vsel %vm593_vm1, %v1872_v0, %v4979_v1  ;;  %vm5517_vm2 = vmmov %vm5514_vm15 }
 0x2dd   : > { %v1878_v15 = vsel %vm5517_vm2, %v1875_v33, %v4995_v59  ;;  %vm5518_vm4 = vmmov %vm5515_vm3  ;;  %v2928_v59 = vld [vmem:[%s3621_s28 + $0x81] sm:$0xff] }
 0x2de   : > { %2326 = vrot.lane.b32.xlu1 %v2974_v62, %s3545_s29  ;;  %v1881_v1 = vsel %vm5518_vm4, %v1878_v15, %v5022_v16  ;;  %v5095_v16 = vld [vmem:[%s5340_s2] ss:$0 sm:$0xff]  ;;  %v2937_v33 = vld [vmem:[%s3621_s28 + $0x87] sm:$0xff] }
 0x2df   : > { %2350 = vrot.lane.b32.xlu0 %v2980_v23, %s3548_s8  ;;  %2364 = vrot.lane.b32.xlu2 %v2984_v8, %s3550_s10 }
 0x2e0   : > { %v1759_v27 = vpop.permute.xlu1 %1758 }
 0x2e1   : > { %v5026_v31 = vpop.permute.xlu0 %1762  ;;  %v1841_v11 = vpop.permute.xlu2 %1840  ;;  %v1871_v21 = vsel %vm589_vm0, %v2890_v43, %v1759_v27 }
 0x2e6   : > { %2362 = vrot.lane.b32.xlu1 %v2983_v4, %s3550_s10 }
 0x2e7   : > { %2384 = vrot.lane.b32.xlu0 %v2987_v50, %s3551_s11  ;;  %2398 = vrot.lane.b32.xlu2 %v2991_v39, %s3553_s13 }
 0x2e8   : > { %v1771_v38 = vpop.permute.xlu1 %1770 }
 0x2e9   : > { %v5034_v63 = vpop.permute.xlu0 %1774  ;;  %v1831_v53 = vpop.permute.xlu2 %1830  ;;  %v1874_v35 = vsel %vm593_vm1, %v1871_v21, %v1771_v38 }
 0x2ee   : > { %2304 = vrot.lane.b32.xlu1 %v4922_v19, %s3547_s7 }
 0x2ef   : > { %2316 = vrot.lane.b32.xlu0 %v2972_v30, %s3546_s30 }
 0x2f0   : > { %v1783_v61 = vpop.permute.xlu1 %1782 }
 0x2f1   : > { %v5041_v20 = vpop.permute.xlu0 %1786  ;;  %v1865_v55 = vpop.permute.xlu2 %1864  ;;  %v1877_v30 = vsel %vm5514_vm15, %v1874_v35, %v1783_v61  ;;  %vm5519_vm15 = vmmov %vm5516_vm10 }
 0x2f6   : > { %2406 = vrot.lane.b32.xlu1 %v2981_v6, %s3555_s15 }
 0x2f7   : > { %2340 = vrot.lane.b32.xlu0 %v2978_v60, %s3549_s9 }
 0x2f8   : > { %v1795_v28 = vpop.permute.xlu1 %1794 }
 0x2f9   : > { %v5049_v19 = vpop.permute.xlu0 %1798  ;;  %v1880_v5 = vsel %vm5515_vm3, %v1877_v30, %v1795_v28  ;;  %v5083_v38 = vpop.permute.xlu2 %2300  ;;  %v2929_v28 = vld [vmem:[%s3621_s28 + $0x89] sm:$0xff]  ;;  %vm5521_vm3 = vcmask 523264  }
 0x2fe   : > { %2352 = vrot.lane.b32.xlu1 %v2981_v6, %s3548_s8  ;;  %v1884_v6 = vsel %vm5519_vm15, %v1881_v1, %v1809_v17  ;;  %v5099_v17 = vld [vmem:[%s3621_s28 + $0x95] sm:$0xff] }
 0x2ff   : > { %2374 = vrot.lane.b32.xlu0 %v2985_v44, %s3552_s12  ;;  %v1887_v39 = vsel %vm609_vm5, %v1884_v6, %v1821_v48  ;;  %v1873_v30 = vsel %vm589_vm0, %v5099_v17, %v5026_v31  ;;  %v2931_v31 = vld [vmem:[%s3621_s28 + $0x82] sm:$0xff] }
 0x300   : > { %v1807_v58 = vpop.permute.xlu1 %1806 }
 0x301   : > { %v5056_v32 = vpop.permute.xlu0 %1810  ;;  %v1883_v62 = vsel %vm5516_vm10, %v1880_v5, %v1807_v58  ;;  %v3425_v58 = vpack.i.bf16 %v2929_v28, %v2928_v59  ;;  %v1867_v35 = vpop.permute.xlu2 %1866  ;;  %vm5522_vm10 = vmmov %vm5517_vm2  ;;  %v5140_v59 = vld [vmem:[%s3621_s28 + $0x88] sm:$0xff]  ;;  %v2939_v28 = vld [vmem:[%s3621_s28 + $0x90] sm:$0xff] }
 0x302   : > { %vm5523_vm2 = vmmov %vm5518_vm4 }
 0x303   : > { %vm5524_vm4 = vmmov %vm5519_vm15 }
 0x304   : > { %vm5525_vm15 = vmmov %vm5521_vm3 }
 0x306   : > { %2386 = vrot.lane.b32.xlu1 %v2988_v52, %s3551_s11  ;;  %v1890_v52 = vsel %vm613_vm6, %v1887_v39, %v1831_v53  ;;  %v1876_v53 = vsel %vm593_vm1, %v1873_v30, %v5034_v63  ;;  %v902_v39 = vrot.slane %v4553_v10, 4 }
 0x307   : > { %2408 = vrot.lane.b32.xlu0 %v2992_v24, %s3555_s15 }
 0x308   : > { %v1819_v47 = vpop.permute.xlu1 %1818 }
 0x309   : > { %v1823_v23 = vpop.permute.xlu0 %1822  ;;  %v1886_v3 = vsel %vm609_vm5, %v1883_v62, %v1819_v47  ;;  %v2938_v62 = vld [vmem:[%s3621_s28 + $0x8f] sm:$0xff] }
 0x30d   : > { %v1397_v2 = vpop.f32.mrf.mxu2  ;;  %v1429_v24 = vpop.f32.mrf.mxu3 }
 0x310   : > { %v1829_v36 = vpop.permute.xlu1 %1828 }
 0x311   : > { %v1853_v27 = vpop.permute.xlu0 %1852  ;;  %v1889_v45 = vsel %vm613_vm6, %v1886_v3, %v1829_v36  ;;  %v1879_v36 = vsel %vm5522_vm10, %v1876_v53, %v5041_v20  ;;  %v1398_v3 = vadd.f32 %v5095_v16, %v1397_v2  ;;  %vm5526_vm10 = vmmov %vm5521_vm3 }
 0x312   : > { %v1892_v4 = vsel %vm617_vm7, %v1889_v45, %v1841_v11 }
 0x313   : > { %v1895_v7 = vsel %vm621_vm8, %v1892_v4, %v1853_v27  ;;  %v2932_v27 = vld [vmem:[%s3621_s28 + $0x8a] sm:$0xff]  ;;  %v3440_v4 = vpack.i.bf16 %v2938_v62, %v2937_v33 }
 0x315   : > { %v1400_v50 = vpop.f32.mrf.mxu2 }
 0x318   : > { %v1863_v61 = vpop.permute.xlu1 %1862 }
 0x319   : > { %v1898_v8 = vsel %vm625_vm9, %v1895_v7, %v1863_v61  ;;  %v1843_v60 = vpop.permute.xlu0 %1842  ;;  %v3430_v7 = vpack.i.bf16 %v2932_v27, %v2931_v31  ;;  %v2946_v27 = vld [vmem:[%s3621_s28 + $0x96] sm:$0xff] }
 0x31a   : > { %1904 = vrot.lane.b32.xlu1 %v1898_v8, %s5520_s18  ;;  %v1893_v47 = vsel %vm617_vm7, %v1890_v52, %v1843_v60  ;;  %v5133_v8 = vpop.permute.xlu2 %2348  ;;  %v3455_v52 = vpack.i.bf16 %v5099_v17, %v5064_v42 }
 0x31d   : > { %v1403_v11 = vpop.f32.mrf.mxu2 }
 0x31e   : > { %v1404_v44 = vadd.f32 %v5095_v16, %v1403_v11 }
 0x320   : > { %v1430_v48 = vadd.f32 %v1429_v24, %v1404_v44  ;;  %v1855_v43 = vpop.permute.xlu1 %1854  ;;  %v917_v24 = vrot.slane %v4557_v49, 4 }
 0x321   : > { %v1896_v21 = vsel %vm621_vm8, %v1893_v47, %v1855_v43  ;;  %v1833_v0 = vpop.permute.xlu0 %1832  ;;  %v3512_v47 = vld [vmem:[%s3621_s28 + $0x86] sm:$0xff]  ;;  %v3513_v43 = vld [vmem:[%s3621_s28 + $0x8e] sm:$0xff] }
 0x322   : > { %2847 = vst.msk [vmem:[%s4501_s26 + $0x28] sm:$0xff] %vm5521_vm3, %v1430_v48  ;;  %v1899_v5 = vsel %vm625_vm9, %v1896_v21, %v1865_v55  ;;  %3426 = vrot.lane.b32.xlu1 %v3425_v58, %s3547_s7  ;;  %v1882_v55 = vsel %vm5523_vm2, %v1879_v36, %v5049_v19  ;;  %v1438_v44 = vmul.f32 %v1430_v48, %v4155_v13  ;;  %vm5527_vm2 = vmmov %vm5521_vm3  ;;  %s314_s7 = scalar_lea.vmem %s5343_s5, %s5587_s21 }
 0x323   : > { %1906 = vrot.lane.b32.xlu2 %v1899_v5, %s5520_s18  ;;  %v1885_v15 = vsel %vm5524_vm4, %v1882_v55, %v5056_v32  ;;  %v3435_v21 = vpack.i.bf16 %v3513_v43, %v3512_v47  ;;  %v903_v5 = vadd.f32 %v902_v39, %v4553_v10  ;;  %v918_v36 = vadd.f32 %v917_v24, %v4557_v49  ;;  %vm5528_vm4 = vmmov %vm5527_vm2 }
 0x324   : > { %v1888_v1 = vsel %vm609_vm5, %v1885_v15, %v1823_v23  ;;  %v1401_v23 = vadd.f32 %v5095_v16, %v1400_v50  ;;  %v3445_v50 = vpack.i.bf16 %v2939_v28, %v5140_v59  ;;  %v1453_v33 = vmul.f32 %v1438_v44, %v1430_v48 }
 0x325   : > { %v1423_v45 = vpop.f32.mrf.mxu2  ;;  %v1891_v20 = vsel %vm613_vm6, %v1888_v1, %v1833_v0  ;;  %v1442_v31 = vsel %vm5528_vm4, %v1438_v44, 0.0  ;;  %v904_v55 = vrot.slane %v903_v5, 2  ;;  %v2942_v1 = vld [vmem:[%s3621_s28 + $0x94] sm:$0xff]  ;;  %v2413_v28 = vsel %vm589_vm0, %v4851_v9, %v5083_v38 }
 0x326   : > { %v1424_v63 = vadd.f32 %v1423_v45, %v1398_v3  ;;  %v3515_v38 = vld [vmem:[%s3621_s28 + $0xae] sm:$0xff]  ;;  %vm5533_vm4 = vcmask 162816  }
 0x328   : > { %2845 = vst.msk [vmem:[%s4501_s26 + $0x18] sm:$0xff] %vm5525_vm15, %v1424_v63  ;;  %v1845_v2 = vpop.permute.xlu1 %1844  ;;  %v1436_v60 = vmul.f32 %v1424_v63, %v4398_v18  ;;  %vm5529_vm15 = vmmov %vm5527_vm2 }
 0x329   : > { %v1894_v61 = vsel %vm617_vm7, %v1891_v20, %v1845_v2  ;;  %v1857_v6 = vpop.permute.xlu0 %1856  ;;  %v919_v2 = vrot.slane %v918_v36, 2 }
 0x32a   : > { %v1897_v19 = vsel %vm621_vm8, %v1894_v61, %v1857_v6  ;;  %3441 = vrot.lane.b32.xlu1 %v3440_v4, %s3549_s9  ;;  %v1451_v0 = vmul.f32 %v1436_v60, %v1424_v63  ;;  %v1439_v42 = vsel %vm5526_vm10, %v1436_v60, 0.0  ;;  %v2383_v63 = vpop.permute.xlu2 %2382  ;;  %v2941_v4 = vld [vmem:[%s3621_s28 + $0x8c] sm:$0xff]  ;;  %vm5531_vm10 = vmmov %vm5527_vm2  ;;  %v905_v60 = vadd.f32 %v904_v55, %v903_v5 }
 0x32b   : > { %v1900_v32 = vsel %vm625_vm9, %v1897_v19, %v1867_v35  ;;  %3431 = vrot.lane.b32.xlu2 %v3430_v7, %s3546_s30  ;;  %v3514_v7 = vld [vmem:[%s3621_s28 + $0xa8] sm:$0xff]  ;;  %v1457_v20 = vsel %vm5531_vm10, %v1453_v33, 0.0  ;;  %v3460_v19 = vpack.i.bf16 %v2946_v27, %v3513_v43  ;;  %vm5537_vm10 = vmmov %vm5533_vm4 }
 0x32c   : > { %1908 = vrot.lane.b32.xlu0 %v1900_v32, %s5520_s18  ;;  %v1454_v10 = vsel %vm5529_vm15, %v1451_v0, 0.0  ;;  %v3465_v49 = vpack.i.bf16 %v4673_v41, %v3514_v7  ;;  %v920_v41 = vadd.f32 %v919_v2, %v918_v36  ;;  %vm5534_vm15 = vcmask 203776  }
 0x32d   : > { %v1426_v11 = vpop.f32.mrf.mxu2 }
 0x32e   : > { %v1427_v58 = vadd.f32 %v1426_v11, %v1401_v23  ;;  %v3450_v23 = vpack.i.bf16 %v2942_v1, %v2941_v4 }
 0x330   : > { %2846 = vst.msk [vmem:[%s4501_s26 + $0x20] sm:$0xff] %vm5521_vm3, %v1427_v58  ;;  %v1437_v35 = vmul.f32 %v1427_v58, %v4393_v56  ;;  %v2313_v30 = vpop.permute.xlu1 %2312  ;;  %vm5530_vm3 = vmmov %vm5527_vm2 }
 0x331   : > { %v2325_v53 = vpop.permute.xlu0 %2324 }
 0x332   : > { %v1440_v17 = vsel %vm5527_vm2, %v1437_v35, 0.0  ;;  %v1452_v62 = vmul.f32 %v1437_v35, %v1427_v58  ;;  %3456 = vrot.lane.b32.xlu1 %v3455_v52, %s3552_s12  ;;  %v2416_v58 = vsel %vm593_vm1, %v2413_v28, %v2313_v30  ;;  %vm5532_vm2 = vcmask 121856   ;;  %v2315_v33 = vpop.permute.xlu2 %2314 }
 0x333   : > { %v1441_v3 = vadd.f32 %v1440_v17, %v1439_v42  ;;  %3446 = vrot.lane.b32.xlu2 %v3445_v50, %s3548_s8  ;;  %v906_v50 = vrot.slane %v905_v60, 1  ;;  %v2419_v9 = vsel %vm5532_vm2, %v2416_v58, %v2325_v53  ;;  %v921_v35 = vrot.slane %v920_v41, 1  ;;  %v3516_v42 = vld [vmem:[%s3621_s28 + $0xa9] sm:$0xff] }
 0x334   : > { %v1455_v48 = vsel %vm5530_vm3, %v1452_v62, 0.0  ;;  %3436 = vrot.lane.b32.xlu0 %v3435_v21, %s3545_s29  ;;  %v3480_v21 = vpack.i.bf16 %v4710_v25, %v3515_v38  ;;  %v3470_v17 = vpack.i.bf16 %v4707_v14, %v3516_v42  ;;  %s5535_s29 = smov 60   ;;  %vm5536_vm3 = vmmov %vm5532_vm2 }
 0x335   : > { %v1443_v45 = vadd.f32 %v1442_v31, %v1441_v3  ;;  %v1456_v15 = vadd.f32 %v1455_v48, %v1454_v10  ;;  %v907_v36 = vadd.f32 %v906_v50, %v905_v60  ;;  %v922_v25 = vadd.f32 %v921_v35, %v920_v41  ;;  %vm5538_vm2 = vmmov %vm5534_vm15 }
 0x337   : > { %v1444_v61 = vrot.slane %v1443_v45, 4  ;;  %v1458_v6 = vadd.f32 %v1457_v20, %v1456_v15  ;;  %v3517_v15 = vld [vmem:[%s3621_s28 + $0xaf] sm:$0xff] }
 0x338   : > { %v2337_v32 = vpop.permute.xlu1 %2336  ;;  %v3485_v4 = vpack.i.bf16 %v4814_v26, %v3517_v15 }
 0x339   : > { %v1445_v39 = vadd.f32 %v1444_v61, %v1443_v45  ;;  %v1459_v11 = vrot.slane %v1458_v6, 4  ;;  %v2361_v44 = vpop.permute.xlu0 %2360  ;;  %v2422_v0 = vsel %vm5533_vm4, %v2419_v9, %v2337_v32  ;;  %v3518_v61 = vld [vmem:[%s3621_s28 + $0xaa] sm:$0xff]  ;;  %vm5539_vm4 = vmmov %vm5536_vm3 }
 0x33a   : > { %3466 = vrot.lane.b32.xlu1 %v3465_v49, %s3553_s13  ;;  %v2425_v53 = vsel %vm5534_vm15, %v2422_v0, %v5133_v8  ;;  %v2339_v20 = vpop.permute.xlu2 %2338  ;;  %v3475_v26 = vpack.i.bf16 %v4742_v37, %v3518_v61  ;;  %v3519_v37 = vld [vmem:[%s3621_s28 + $0xb0] sm:$0xff]  ;;  %vm5540_vm15 = vmmov %vm5537_vm10  ;;  %v3520_v61 = vld [vmem:[%s3621_s28 + $0x80] sm:$0xff] }
 0x33b   : > { %v1446_v52 = vrot.slane %v1445_v39, 2  ;;  %v1460_v24 = vadd.f32 %v1459_v11, %v1458_v6  ;;  %3461 = vrot.lane.b32.xlu2 %v3460_v19, %s3551_s11  ;;  %v2428_v55 = vsel %vm609_vm5, %v2425_v53, %v2361_v44 }
 0x33c   : > { %3451 = vrot.lane.b32.xlu0 %v3450_v23, %s3550_s10  ;;  %s320_s10 = scalar_lea.vmem %s5344_s6, %s5587_s21 }
 0x33d   : > { %v1447_v47 = vadd.f32 %v1446_v52, %v1445_v39  ;;  %v1461_v43 = vrot.slane %v1460_v24, 2 }
 0x33f   : > { %v1448_v30 = vrot.slane %v1447_v47, 1  ;;  %v1462_v5 = vadd.f32 %v1461_v43, %v1460_v24 }
 0x340   : > { %v2371_v62 = vpop.permute.xlu1 %2370 }
 0x341   : > { %v1449_v3 = vadd.f32 %v1448_v30, %v1447_v47  ;;  %v1463_v31 = vrot.slane %v1462_v5, 1  ;;  %v2303_v10 = vpop.permute.xlu0 %2302  ;;  %v2431_v14 = vsel %vm613_vm6, %v2428_v55, %v2371_v62 }
 0x342   : > { %3481 = vrot.lane.b32.xlu1 %v3480_v21, %s5535_s29  ;;  %v2434_v1 = vsel %vm617_vm7, %v2431_v14, %v2383_v63  ;;  %v2373_v63 = vpop.permute.xlu2 %2372  ;;  %v2414_v32 = vsel %vm589_vm0, %v4908_v34, %v2303_v10 }
 0x343   : > { %v1464_v48 = vadd.f32 %v1463_v31, %v1462_v5  ;;  %3471 = vrot.lane.b32.xlu2 %v3470_v17, %s3555_s15  ;;  %v5187_v27 = vadd.f32 %v1449_v3, %v907_v36 }
 0x345   : > { %v5191_v45 = vadd.f32 %v1464_v48, %v922_v25 }
 0x348   : > { %v2395_v8 = vpop.permute.xlu1 %2394 }
 0x349   : > { %v2437_v7 = vsel %vm621_vm8, %v2434_v1, %v2395_v8  ;;  %v2405_v49 = vpop.permute.xlu0 %2404 }
 0x34a   : > { %v2440_v2 = vsel %vm625_vm9, %v2437_v7, %v2405_v49  ;;  %2247 = vrot.lane.b32.xlu1 %v4882_v22, %s5428_s19  ;;  %v2417_v22 = vsel %vm593_vm1, %v2414_v32, %v2315_v33  ;;  %v2397_v11 = vpop.permute.xlu2 %2396 }
 0x34b   : > { %2446 = vrot.lane.b32.xlu0 %v2440_v2, %s5520_s18  ;;  %3486 = vrot.lane.b32.xlu2 %v3485_v4, %s5472_s17 }
 0x350   : > { %v2327_v6 = vpop.permute.xlu1 %2326 }
 0x351   : > { %v2351_v19 = vpop.permute.xlu0 %2350  ;;  %v2420_v23 = vsel %vm5536_vm3, %v2417_v22, %v2327_v6  ;;  %vm5541_vm3 = vmmov %vm5538_vm2 }
 0x352   : > { %2249 = vrot.lane.b32.xlu1 %v4931_v54, %s5428_s19  ;;  %v2423_v39 = vsel %vm5537_vm10, %v2420_v23, %v2339_v20  ;;  %v2329_v24 = vpop.permute.xlu2 %2328  ;;  %vm5542_vm10 = vcmask 56320  }
 0x353   : > { %3476 = vrot.lane.b32.xlu0 %v3475_v26, %s5473_s27  ;;  %v2426_v54 = vsel %vm5538_vm2, %v2423_v39, %v2351_v19  ;;  %vm5543_vm2 = vcmask 654336  }
 0x354   : > { %vm5547_vm14 = vmmov %vm5543_vm2 }
 0x358   : > { %v2363_v60 = vpop.permute.xlu1 %2362 }
 0x359   : > { %v2385_v28 = vpop.permute.xlu0 %2384  ;;  %v2429_v44 = vsel %vm609_vm5, %v2426_v54, %v2363_v60 }
 0x35a   : > { %v2432_v34 = vsel %vm613_vm6, %v2429_v44, %v2373_v63  ;;  %v2365_v0 = vpop.permute.xlu2 %2364 }
 0x35b   : > { %2235 = vrot.lane.b32.xlu0 %v3519_v37, %s5474_s14  ;;  %v2435_v52 = vsel %vm617_vm7, %v2432_v34, %v2385_v28 }
 0x35c   : > { %v2438_v50 = vsel %vm621_vm8, %v2435_v52, %v2397_v11 }
 0x360   : > { %v2305_v58 = vpop.permute.xlu1 %2304 }
 0x361   : > { %v2317_v41 = vpop.permute.xlu0 %2316  ;;  %v2415_v38 = vsel %vm589_vm0, %v4936_v40, %v2305_v58 }
 0x362   : > { %v2418_v21 = vsel %vm593_vm1, %v2415_v38, %v2317_v41  ;;  %v2399_v36 = vpop.permute.xlu2 %2398 }
 0x363   : > { %2237 = vrot.lane.b32.xlu0 %v4913_v29, %s5474_s14  ;;  %v2421_v35 = vsel %vm5539_vm4, %v2418_v21, %v2329_v24  ;;  %vm5544_vm4 = vmmov %vm5542_vm10 }
 0x368   : > { %v2407_v47 = vpop.permute.xlu1 %2406 }
 0x369   : > { %v2441_v43 = vsel %vm625_vm9, %v2438_v50, %v2407_v47  ;;  %v2341_v9 = vpop.permute.xlu0 %2340 }
 0x36a   : > { %2448 = vrot.lane.b32.xlu2 %v2441_v43, %s5520_s18  ;;  %v2424_v30 = vsel %vm5540_vm15, %v2421_v35, %v2341_v9  ;;  %vm5545_vm15 = vmmov %vm5543_vm2 }
 0x370   : > { %v2353_v29 = vpop.permute.xlu1 %2352 }
 0x371   : > { %v2375_v5 = vpop.permute.xlu0 %2374  ;;  %v2427_v33 = vsel %vm5541_vm3, %v2424_v30, %v2353_v29  ;;  %vm5546_vm3 = vmmov %vm5544_vm4 }
 0x372   : > { %v2430_v42 = vsel %vm609_vm5, %v2427_v33, %v2365_v0 }
 0x373   : > { %v2433_v17 = vsel %vm613_vm6, %v2430_v42, %v2375_v5 }
 0x378   : > { %v2387_v62 = vpop.permute.xlu1 %2386 }
 0x379   : > { %v2436_v40 = vsel %vm617_vm7, %v2433_v17, %v2387_v62  ;;  %v2409_v3 = vpop.permute.xlu0 %2408 }
 0x37a   : > { %v2439_v31 = vsel %vm621_vm8, %v2436_v40, %v2399_v36 }
 0x37b   : > { %v2442_v53 = vsel %vm625_vm9, %v2439_v31, %v2409_v3 }
 0x37c   : > { %2450 = vrot.lane.b32.xlu2 %v2442_v53, %s5520_s18 }
 0x37d   : > { %v1907_v10 = vpop.permute.xlu2 %1906 }
 0x37e   : > { %v1914_v14 = vsel %vm5545_vm15, %v5007_v12, %v1907_v10 }
 0x385   : > { %v3432_v55 = vpop.permute.xlu2 %3431 }
 0x386   : > { %v3433_v2 = vunpack.i.l.bf16 %v3432_v55  ;;  %v3434_v23 = vunpack.i.h.bf16 %v3432_v55 }
 0x38c   : > { %v1905_v25 = vpop.permute.xlu1 %1904 }
 0x38d   : > { %2918 = vmatmul.msk.f32.vlgmr.msrb.gmra.mxu3 %vm5542_vm10, %v1905_v25  ;;  %v1913_v48 = vsel %vm5543_vm2, %v5004_v46, %v1905_v25  ;;  %v3447_v8 = vpop.permute.xlu2 %3446  ;;  %vm5548_vm10 = vcmask 121856   ;;  %vm5550_vm2 = vcmask 203776  }
 0x38e   : > { %1938 = vmatmul.f32.vlgmr.msrb.gmra.mxu1 %v1913_v48  ;;  %v3448_v39 = vunpack.i.l.bf16 %v3447_v8  ;;  %v3449_v43 = vunpack.i.h.bf16 %v3447_v8 }
 0x394   : > { %v3427_v15 = vpop.permute.xlu1 %3426 }
 0x395   : > { %2919 = vmatmul.msk.f32.gmra.mxu3 %vm5544_vm4, %v1907_v10  ;;  %v3462_v46 = vpop.permute.xlu2 %3461  ;;  %v3428_v49 = vunpack.i.l.bf16 %v3427_v15  ;;  %v3429_v19 = vunpack.i.h.bf16 %v3427_v15  ;;  %vm5551_vm4 = vmmov %vm5548_vm10 }
 0x396   : > { %1941 = vmatmul.f32.gmra.mxu1 %v1914_v14  ;;  %v3463_v9 = vunpack.i.l.bf16 %v3462_v46  ;;  %v3464_v36 = vunpack.i.h.bf16 %v3462_v46 }
 0x397   : > { %v2255_v26 = vsel %vm589_vm0, %v3520_v61, %v3428_v49  ;;  %v2256_v28 = vsel %vm589_vm0, %v5140_v59, %v3429_v19 }
 0x398   : > { %v2258_v63 = vsel %vm593_vm1, %v2255_v26, %v3433_v2  ;;  %v2259_v44 = vsel %vm593_vm1, %v2256_v28, %v3434_v23  ;;  %vm5553_vm1 = vmmov %vm5545_vm15 }
 0x399   : > { %vm5554_vm15 = vmmov %vm5546_vm3 }
 0x39c   : > { %v3442_v7 = vpop.permute.xlu1 %3441 }
 0x39d   : > { %v3472_v32 = vpop.permute.xlu2 %3471  ;;  %v3443_v22 = vunpack.i.l.bf16 %v3442_v7  ;;  %v3444_v41 = vunpack.i.h.bf16 %v3442_v7 }
 0x39e   : > { %v1909_v4 = vpop.permute.xlu0 %1908  ;;  %v3473_v62 = vunpack.i.l.bf16 %v3472_v32 }
 0x39f   : > { %2920 = vmatmul.msk.f32.gmra.mxu3 %vm5546_vm3, %v1909_v4  ;;  %v1915_v1 = vsel %vm5547_vm14, %v5017_v51, %v1909_v4  ;;  %vm5549_vm14 = vcmask 162816   ;;  %vm5555_vm3 = vmmov %vm5550_vm2  ;;  %v3474_v4 = vunpack.i.h.bf16 %v3472_v32 }
 0x3a0   : > { %1944 = vmatmul.f32.gmra.mxu1 %v1915_v1  ;;  %vm5552_vm0 = vmmov %vm5549_vm14 }
 0x3a4   : > { %v3457_v6 = vpop.permute.xlu1 %3456 }
 0x3a5   : > { %v3458_v34 = vunpack.i.l.bf16 %v3457_v6  ;;  %v3487_v24 = vpop.permute.xlu2 %3486  ;;  %v3459_v5 = vunpack.i.h.bf16 %v3457_v6 }
 0x3a6   : > { %v3437_v20 = vpop.permute.xlu0 %3436  ;;  %v3488_v15 = vunpack.i.l.bf16 %v3487_v24 }
 0x3a7   : > { %v3438_v12 = vunpack.i.l.bf16 %v3437_v20  ;;  %v3439_v37 = vunpack.i.h.bf16 %v3437_v20 }
 0x3a9   : > { %v2261_v60 = vsel %vm5548_vm10, %v2258_v63, %v3438_v12  ;;  %v2262_v50 = vsel %vm5551_vm4, %v2259_v44, %v3439_v37  ;;  %vm5556_vm10 = vmmov %vm5554_vm15  ;;  %v3489_v63 = vunpack.i.h.bf16 %v3487_v24 }
 0x3aa   : > { %v2264_v11 = vsel %vm5549_vm14, %v2261_v60, %v3443_v22  ;;  %v2265_v38 = vsel %vm5552_vm0, %v2262_v50, %v3444_v41  ;;  %vm5563_vm14 = vmmov %vm5553_vm1 }
 0x3ab   : > { %v2267_v52 = vsel %vm5550_vm2, %v2264_v11, %v3448_v39  ;;  %v2268_v33 = vsel %vm5555_vm3, %v2265_v38, %v3449_v43 }
 0x3ac   : > { %v3467_v58 = vpop.permute.xlu1 %3466 }
 0x3ad   : > { %v3468_v29 = vunpack.i.l.bf16 %v3467_v58  ;;  %v3469_v25 = vunpack.i.h.bf16 %v3467_v58 }
 0x3ae   : > { %v3452_v51 = vpop.permute.xlu0 %3451 }
 0x3af   : > { %v3453_v54 = vunpack.i.l.bf16 %v3452_v51  ;;  %v3454_v21 = vunpack.i.h.bf16 %v3452_v51 }
 0x3b1   : > { %v2270_v47 = vsel %vm609_vm5, %v2267_v52, %v3453_v54  ;;  %v2271_v17 = vsel %vm609_vm5, %v2268_v33, %v3454_v21  ;;  %vm5557_vm5 = vcmask 572416  }
 0x3b2   : > { %v2273_v0 = vsel %vm613_vm6, %v2270_v47, %v3458_v34  ;;  %v2274_v31 = vsel %vm613_vm6, %v2271_v17, %v3459_v5  ;;  %vm5558_vm6 = vcmask 613376  }
 0x3b3   : > { %v2276_v42 = vsel %vm617_vm7, %v2273_v0, %v3463_v9  ;;  %v2277_v55 = vsel %vm617_vm7, %v2274_v31, %v3464_v36  ;;  %vm5559_vm7 = vmmov %vm5553_vm1 }
 0x3b4   : > { %v3482_v30 = vpop.permute.xlu1 %3481  ;;  %v2279_v40 = vsel %vm621_vm8, %v2276_v42, %v3468_v29  ;;  %v2280_v7 = vsel %vm621_vm8, %v2277_v55, %v3469_v25  ;;  %vm5560_vm8 = vmmov %vm5557_vm5 }
 0x3b5   : > { %v3483_v10 = vunpack.i.l.bf16 %v3482_v30  ;;  %v2282_v48 = vsel %vm625_vm9, %v2279_v40, %v3473_v62  ;;  %v2283_v2 = vsel %vm625_vm9, %v2280_v7, %v3474_v4  ;;  %v3484_v61 = vunpack.i.h.bf16 %v3482_v30  ;;  %vm5561_vm9 = vmmov %vm5558_vm6 }
 0x3bc   : > { %v2248_v1 = vpop.permute.xlu1 %2247 }
 0x3bd   : > { %v2447_v59 = vpop.permute.xlu0 %2446 }
 0x3be   : > { %v2455_v35 = vsel %vm5553_vm1, %v5020_v57, %v2447_v59  ;;  %2994 = vmatmul.msk.f32.vlgmr.msrb.gmra.mxu0 %vm5554_vm15, %v2447_v59 }
 0x3bf   : > { %2480 = vmatmul.f32.vlgmr.msra.gmra.mxu3 %v2455_v35 }
 0x3c4   : > { %v2449_v3 = vpop.permute.xlu2 %2448  ;;  %v2250_v22 = vpop.permute.xlu1 %2249 }
 0x3c5   : > { %v3477_v57 = vpop.permute.xlu0 %3476 }
 0x3c6   : > { %v3478_v53 = vunpack.i.l.bf16 %v3477_v57  ;;  %2995 = vmatmul.msk.f32.gmra.mxu0 %vm5556_vm10, %v2449_v3  ;;  %v3479_v46 = vunpack.i.h.bf16 %v3477_v57 }
 0x3c8   : > { %v2285_v14 = vsel %vm629_vm11, %v2282_v48, %v3478_v53  ;;  %v2286_v6 = vsel %vm629_vm11, %v2283_v2, %v3479_v46  ;;  %vm5562_vm11 = vmmov %vm5556_vm10 }
 0x3c9   : > { %v2288_v8 = vsel %vm633_vm12, %v2285_v14, %v3483_v10  ;;  %v2289_v32 = vsel %vm633_vm12, %v2286_v6, %v3484_v61  ;;  %vm5564_vm12 = vcmask 523264  }
 0x3ca   : > { %v2291_v20 = vsel %vm637_vm13, %v2288_v8, %v3488_v15  ;;  %v2292_v60 = vsel %vm637_vm13, %v2289_v32, %v3489_v63  ;;  %vm5565_vm13 = vmmov %vm5564_vm12 }
 0x3cb   : > { %vm5566_vm2 = vmmov %vm5564_vm12 }
 0x3cc   : > { %vm5567_vm4 = vmmov %vm5566_vm2 }
 0x3cd   : > { %v2236_v49 = vpop.permute.xlu0 %2235  ;;  %vm5568_vm0 = vmmov %vm5566_vm2 }
 0x3ce   : > { %v2294_v26 = vsel %vm5557_vm5, %v2291_v20, %v2236_v49  ;;  %vm5569_vm1 = vmmov %vm5568_vm0 }
 0x3cf   : > { %v2297_v12 = vsel %vm5558_vm6, %v2294_v26, %v2248_v1  ;;  %vm5570_vm15 = vmmov %vm5568_vm0 }
 0x3d0   : > { %v2456_v19 = vsel %vm5559_vm7, %v2297_v12, %v2449_v3  ;;  %vm5571_vm3 = vmmov %vm5568_vm0 }
 0x3d1   : > { %2483 = vmatmul.f32.gmra.mxu3 %v2456_v19  ;;  %vm5572_vm10 = vmmov %vm5568_vm0 }
 0x3d2   : > { %vm5573_vm5 = vmmov %vm5568_vm0 }
 0x3d3   : > { %vm5574_vm6 = vmmov %vm5568_vm0 }
 0x3d4   : > { %vm5575_vm7 = vmmov %vm5568_vm0 }
 0x3d5   : > { %v2238_v23 = vpop.permute.xlu0 %2237 }
 0x3d6   : > { %v2295_v51 = vsel %vm5560_vm8, %v2292_v60, %v2238_v23  ;;  %v2451_v28 = vpop.permute.xlu2 %2450  ;;  %vm5576_vm8 = vmmov %vm5568_vm0 }
 0x3d7   : > { %v2298_v39 = vsel %vm5561_vm9, %v2295_v51, %v2250_v22  ;;  %2996 = vmatmul.msk.f32.vlgmr.msra.gmra.mxu1 %vm5562_vm11, %v2451_v28  ;;  %vm5577_vm9 = vmmov %vm5568_vm0 }
 0x3d8   : > { %v2457_v37 = vsel %vm5563_vm14, %v2298_v39, %v2451_v28  ;;  %vm5578_vm11 = vmmov %vm5568_vm0 }
 0x3d9   : > { %2486 = vmatmul.f32.gmra.mxu3 %v2457_v37  ;;  %vm5579_vm14 = vmmov %vm5568_vm0 }
 0x40b   : > { %v1939_v11 = vpop.f32.mrf.mxu1 }
 0x40c   : > { %v1940_v54 = vadd.f32 %v5095_v16, %v1939_v11 }
 0x410   : > { %v1965_v44 = vpop.f32.mrf.mxu3 }
 0x411   : > { %v1966_v58 = vadd.f32 %v1965_v44, %v1940_v54 }
 0x413   : > { %2921 = vst.msk [vmem:[%s4501_s26 + $0x30] sm:$0xff] %vm5564_vm12, %v1966_v58  ;;  %v1942_v41 = vpop.f32.mrf.mxu1  ;;  %v1978_v34 = vmul.f32 %v1966_v58, %v4398_v18  ;;  %vm5580_vm12 = vmmov %vm5568_vm0 }
 0x414   : > { %v1943_v52 = vadd.f32 %v5095_v16, %v1942_v41 }
 0x415   : > { %v1993_v47 = vmul.f32 %v1978_v34, %v1966_v58  ;;  %v1981_v9 = vsel %vm5566_vm2, %v1978_v34, 0.0  ;;  %vm2550_vm2 = vcmask 516096  }
 0x417   : > { %v1996_v35 = vsel %vm5568_vm0, %v1993_v47, 0.0 }
 0x418   : > { %v1968_v24 = vpop.f32.mrf.mxu3 }
 0x419   : > { %v1969_v50 = vadd.f32 %v1968_v24, %v1943_v52 }
 0x41b   : > { %2922 = vst.msk [vmem:[%s4501_s26 + $0x38] sm:$0xff] %vm5565_vm13, %v1969_v50  ;;  %v1979_v43 = vmul.f32 %v1969_v50, %v4393_v56  ;;  %vm5581_vm13 = vmmov %vm5568_vm0 }
 0x41d   : > { %v1982_v59 = vsel %vm5567_vm4, %v1979_v43, 0.0  ;;  %v1994_v38 = vmul.f32 %v1979_v43, %v1969_v50  ;;  %v1945_v0 = vpop.f32.mrf.mxu1 }
 0x41e   : > { %v1983_v21 = vadd.f32 %v1982_v59, %v1981_v9  ;;  %v1946_v5 = vadd.f32 %v5095_v16, %v1945_v0 }
 0x41f   : > { %v1997_v29 = vsel %vm5569_vm1, %v1994_v38, 0.0 }
 0x420   : > { %v1998_v30 = vadd.f32 %v1997_v29, %v1996_v35 }
 0x422   : > { %v1971_v33 = vpop.f32.mrf.mxu3 }
 0x423   : > { %v1972_v42 = vadd.f32 %v1971_v33, %v1946_v5 }
 0x425   : > { %2923 = vst.msk [vmem:[%s4501_s26 + $0x40] sm:$0xff] %vm5570_vm15, %v1972_v42  ;;  %v1980_v17 = vmul.f32 %v1972_v42, %v4155_v13 }
 0x427   : > { %v1984_v62 = vsel %vm5571_vm3, %v1980_v17, 0.0  ;;  %v1995_v36 = vmul.f32 %v1980_v17, %v1972_v42 }
 0x428   : > { %v1985_v40 = vadd.f32 %v1984_v62, %v1983_v21 }
 0x429   : > { %v1999_v3 = vsel %vm5572_vm10, %v1995_v36, 0.0 }
 0x42a   : > { %v1986_v31 = vrot.slane %v1985_v40, 4  ;;  %v2000_v57 = vadd.f32 %v1999_v3, %v1998_v30 }
 0x42c   : > { %v1987_v53 = vadd.f32 %v1986_v31, %v1985_v40  ;;  %v2001_v10 = vrot.slane %v2000_v57, 4 }
 0x42e   : > { %v1988_v25 = vrot.slane %v1987_v53, 2  ;;  %v2002_v48 = vadd.f32 %v2001_v10, %v2000_v57 }
 0x430   : > { %v1989_v55 = vadd.f32 %v1988_v25, %v1987_v53  ;;  %v2003_v14 = vrot.slane %v2002_v48, 2 }
 0x432   : > { %v1990_v15 = vrot.slane %v1989_v55, 1  ;;  %v2004_v4 = vadd.f32 %v2003_v14, %v2002_v48 }
 0x434   : > { %v1991_v8 = vadd.f32 %v1990_v15, %v1989_v55  ;;  %v2005_v1 = vrot.slane %v2004_v4, 1 }
 0x436   : > { %v1992_v7 = vadd.f32 %v1991_v8, %v5187_v27  ;;  %v2006_v46 = vadd.f32 %v2005_v1, %v2004_v4 }
 0x438   : > { %v2007_v49 = vadd.f32 %v2006_v46, %v5191_v45 }
 0x43b   : > { %v2507_v61 = vpop.f32.mrf.mxu0 }
 0x442   : > { %v2481_v20 = vpop.f32.mrf.mxu3 }
 0x443   : > { %v2482_v2 = vadd.f32 %v5095_v16, %v2481_v20  ;;  %v2510_v19 = vpop.f32.mrf.mxu0 }
 0x445   : > { %v2508_v26 = vadd.f32 %v2507_v61, %v2482_v2 }
 0x447   : > { %2997 = vst.msk [vmem:[%s4501_s26 + $0x48] sm:$0xff] %vm5573_vm5, %v2508_v26  ;;  %v2520_v32 = vmul.f32 %v2508_v26, %v4398_v18 }
 0x449   : > { %v2535_v51 = vmul.f32 %v2520_v32, %v2508_v26  ;;  %v2523_v37 = vsel %vm5576_vm8, %v2520_v32, 0.0 }
 0x44b   : > { %v2538_v18 = vsel %vm5579_vm14, %v2535_v51, 0.0 }
 0x454   : > { %v2484_v6 = vpop.f32.mrf.mxu3  ;;  %v2513_v60 = vpop.f32.mrf.mxu1 }
 0x455   : > { %v2485_v12 = vadd.f32 %v5095_v16, %v2484_v6 }
 0x457   : > { %v2511_v63 = vadd.f32 %v2510_v19, %v2485_v12 }
 0x459   : > { %2998 = vst.msk [vmem:[%s4501_s26 + $0x50] sm:$0xff] %vm5574_vm6, %v2511_v63  ;;  %v2521_v27 = vmul.f32 %v2511_v63, %v4393_v56 }
 0x45b   : > { %v2536_v22 = vmul.f32 %v2521_v27, %v2511_v63  ;;  %v2524_v28 = vsel %vm5575_vm7, %v2521_v27, 0.0 }
 0x45c   : > { %v2487_v45 = vpop.f32.mrf.mxu3  ;;  %v2525_v56 = vadd.f32 %v2524_v28, %v2523_v37 }
 0x45d   : > { %v2488_v23 = vadd.f32 %v5095_v16, %v2487_v45  ;;  %v2539_v11 = vsel %vm5577_vm9, %v2536_v22, 0.0 }
 0x45e   : > { %v2540_v16 = vadd.f32 %v2539_v11, %v2538_v18 }
 0x45f   : > { %v2514_v39 = vadd.f32 %v2513_v60, %v2488_v23 }
 0x461   : > { %2999 = vst.msk [vmem:[%s4501_s26 + $0x58] sm:$0xff] %vm5578_vm11, %v2514_v39  ;;  %v2522_v54 = vmul.f32 %v2514_v39, %v4155_v13 }
 0x463   : > { %v2526_v44 = vsel %vm5580_vm12, %v2522_v54, 0.0  ;;  %v2537_v58 = vmul.f32 %v2522_v54, %v2514_v39 }
 0x464   : > { %v2527_v41 = vadd.f32 %v2526_v44, %v2525_v56 }
 0x465   : > { %v2541_v34 = vsel %vm5581_vm13, %v2537_v58, 0.0 }
 0x466   : > { %v2528_v52 = vrot.slane %v2527_v41, 4  ;;  %v2542_v24 = vadd.f32 %v2541_v34, %v2540_v16 }
 0x468   : > { %v2529_v50 = vadd.f32 %v2528_v52, %v2527_v41  ;;  %v2543_v47 = vrot.slane %v2542_v24, 4 }
 0x46a   : > { %v2530_v43 = vrot.slane %v2529_v50, 2  ;;  %v2544_v9 = vadd.f32 %v2543_v47, %v2542_v24 }
 0x46c   : > { %v2531_v59 = vadd.f32 %v2530_v43, %v2529_v50  ;;  %v2545_v13 = vrot.slane %v2544_v9, 2 }
 0x46e   : > { %v2532_v38 = vrot.slane %v2531_v59, 1  ;;  %v2546_v21 = vadd.f32 %v2545_v13, %v2544_v9 }
 0x470   : > { %v2533_v0 = vadd.f32 %v2532_v38, %v2531_v59  ;;  %v2547_v35 = vrot.slane %v2546_v21, 1 }
 0x472   : > { %v2534_v29 = vadd.f32 %v2533_v0, %v1992_v7  ;;  %v2548_v30 = vadd.f32 %v2547_v35, %v2546_v21 }
 0x474   : > { %v2549_v5 = vadd.f32 %v2548_v30, %v2007_v49  ;;  %2551 = vst.msk [vmem:[%s314_s7] sm:$0x1] %vm2550_vm2, %v2534_v29 }
 0x476   : > { %2552 = vst.msk [vmem:[%s320_s10] sm:$0x1] %vm2550_vm2, %v2549_v5 }
 0x477 PF: > { %s17_s23 = sadd.s32 1, %s3543_s23   ;;  %s5582_s21 = smov %s3539_s22 }
 0x478   : > { %p14_p5 = scmp.ge.s32.totalorder %s17_s23, 4   ;;  %s5583_s22 = smov %s5585_s24 }
 0x47a   :  { %16 = sbr.rel (!%p14_p5) target bundleno = 2 (0x2), region = 98 }

</bundles_post_ra>
